<compile_context>
chip_gen: v6e
topology: v6e:2x2x1
jax: 0.10.0
libtpu: 0.0.40
codegen_flags: <defaults>
</compile_context>

<pallas_src>
import jax
import jax.numpy as jnp
from jax.experimental import pallas as pl
from jax.experimental.pallas import tpu as pltpu

BN_EPS = 1e-5


def _round_up(x, m):
    return ((x + m - 1) // m) * m


# ----------------------------------------------------------------------------
# Fused per-FPN-scale kernel
#   x   = pooled_image @ Wp + bp            (1x1 projection, norm pre-folded)
#   x1  = bn1(conv1(relu(x)))     \  both heads (locs & wts) of this scale,
#   x2  = bn2(conv2(relu(x1)))     | computed together: conv weights merged
#   x3  = bn3(conv3(relu(x2)))     | block-diagonally into a 128-lane trunk
#   y   = conv_out(relu(x3+x1))   /  + bias + pixel offsets, (n*h*w, coutp)
# ----------------------------------------------------------------------------
def _fused_scale_kernel(xp_ref, wp_ref, bp_ref, w1_ref, w2_ref, w3_ref,
                        gamma_ref, beta_ref, wot_ref, add_ref,
                        o_ref, pad_ref, x1_ref):
    n, h, w, cin = xp_ref.shape
    cp = pad_ref.shape[-1]            # 128 padded fused channels (lane-dense)
    hw = h * w
    rows = n * hw

    # -- 1x1 projection with (x - mean)/std folded into wp/bp (K=3 matmul);
    #    padded output channels are exactly zero (zero weight columns). --
    xproj = jnp.dot(xp_ref[...].reshape(rows, cin), wp_ref[...],
                    preferred_element_type=jnp.float32) + bp_ref[...]

    # -- zero ONLY the 1-px border strips of the padded slab, once; the
    #    interior is fully overwritten before every conv layer reads it. --
    zrow = jnp.zeros((n, 1, w + 2, cp), jnp.float32)
    zcol = jnp.zeros((n, h + 2, 1, cp), jnp.float32)
    pad_ref[:, 0:1, :, :] = zrow
    pad_ref[:, h + 1:h + 2, :, :] = zrow
    pad_ref[:, :, 0:1, :] = zcol
    pad_ref[:, :, w + 1:w + 2, :] = zcol

    def conv3x3(w_layer_ref):
        # 9 accumulated MXU matmuls straight from slab views: no im2col
        # concat, no (rows, 9*Cp) buffer, every operand lane-dense (K=N=128).
        acc = None
        for dy in range(3):
            for dx in range(3):
                tap = pad_ref[:, dy:dy + h, dx:dx + w, :].reshape(rows, cp)
                part = jnp.dot(tap, w_layer_ref[dy * 3 + dx],
                               preferred_element_type=jnp.float32)
                acc = part if acc is None else acc + part
        return acc

    def bn(acc, layer):
        # Training-mode BatchNorm2d, single-pass stats (E[x^2]-E[x]^2, biased,
        # eps=1e-5); conv bias before BN cancels exactly, so it was dropped.
        # Normalization folded to one scale+shift FMA over the activation.
        inv = 1.0 / rows
        mu = jnp.sum(acc, axis=0, keepdims=True) * inv
        var = jnp.sum(acc * acc, axis=0, keepdims=True) * inv - mu * mu
        scale = gamma_ref[layer:layer + 1, :] * jax.lax.rsqrt(var + BN_EPS)
        shift = beta_ref[layer:layer + 1, :] - mu * scale
        return acc * scale + shift

    # layer 1: shared projected input, both heads' conv1 concatenated on N.
    pad_ref[:, 1:1 + h, 1:1 + w, :] = jnp.maximum(xproj, 0.0).reshape(n, h, w, cp)
    x1 = bn(conv3x3(w1_ref), 0)
    x1_ref[...] = x1                                  # pin residual in VMEM

    # layer 2 (block-diagonal weights keep the two heads independent).
    pad_ref[:, 1:1 + h, 1:1 + w, :] = jnp.maximum(x1, 0.0).reshape(n, h, w, cp)
    x2 = bn(conv3x3(w2_ref), 1)

    # layer 3.
    pad_ref[:, 1:1 + h, 1:1 + w, :] = jnp.maximum(x2, 0.0).reshape(n, h, w, cp)
    x3 = bn(conv3x3(w3_ref), 2)

    # residual + 1x1 conv_out: ONE rows-tall matmul, lane-dense output store;
    # conv_out bias + meshgrid pixel offsets pre-tiled into add_ref.
    t = jnp.maximum(x3 + x1_ref[...], 0.0)            # (rows, Cp)
    o_ref[...] = jnp.dot(t, wot_ref[...],
                         preferred_element_type=jnp.float32) + add_ref[...]


def fused_scale_apply(x_pooled_nhwc, params, addend):
    n, h, w, cin = x_pooled_nhwc.shape
    cp = params["w1"].shape[-1]
    coutp = params["wot"].shape[-1]
    rows = n * h * w

    # Advisory cost estimate: helps XLA overlap the two scale calls and the
    # wrapper-side pooling.
    flops = 2 * rows * (cin * cp + 3 * 9 * cp * cp + cp * coutp)
    bytes_accessed = 4 * (n * h * w * cin + 3 * 9 * cp * cp + 3 * cp
                          + cp * coutp + 2 * rows * coutp)
    cost = pl.CostEstimate(flops=flops, transcendentals=3 * cp,
                           bytes_accessed=bytes_accessed)

    # TODO(synk): at real FPN resolutions this whole-tensor-resident kernel
    # must be row-tiled (1-px halo) with a two-pass / carried-accumulator
    # BatchNorm (batch statistics couple the whole (N,H,W) extent) and given
    # a 'parallel' grid axis so v7x's two TensorCores are both used; the row
    # tile should be derived from pltpu.get_tpu_info().vmem_capacity_bytes
    # (64 MiB on v7x vs 128 MiB on v5e/v6e) with vmem_limit_bytes raised
    # accordingly.  The gridless form is correct and tiny at these toy sizes.
    return pl.pallas_call(
        _fused_scale_kernel,
        out_shape=jax.ShapeDtypeStruct((rows, coutp), jnp.float32),
        in_specs=[pl.BlockSpec(memory_space=pltpu.MemorySpace.VMEM)] * 10,
        out_specs=pl.BlockSpec(memory_space=pltpu.MemorySpace.VMEM),
        scratch_shapes=[pltpu.VMEM((n, h + 2, w + 2, cp), jnp.float32),
                        pltpu.VMEM((rows, cp), jnp.float32)],
        cost_estimate=cost,
    )(x_pooled_nhwc, params["wp"], params["bp"], params["w1"], params["w2"],
      params["w3"], params["gamma"], params["beta"], params["wot"], addend)


# ----------------------------------------------------------------------------
# Parameter construction (shapes / init match pred_layers.__init__)
# ----------------------------------------------------------------------------
def _xavier_normal(key, shape, fan_in, fan_out):
    return ((2.0 / (fan_in + fan_out)) ** 0.5
            * jax.random.normal(key, shape, jnp.float32))


def init_pred_head_params(key, c, n_out):
    """One pred_layers head.  3x3 weights are stored as (9, C_in, C_out) with
    tap = dy*3 + dx, i.e. w[tap] == torch_weight[:, :, dy, dx].T if pretrained
    weights were ever loaded."""
    k1, k2, k3, k4 = jax.random.split(key, 4)
    fan3 = 9 * c
    return dict(
        w1=_xavier_normal(k1, (9, c, c), fan3, fan3),
        w2=_xavier_normal(k2, (9, c, c), fan3, fan3),
        w3=_xavier_normal(k3, (9, c, c), fan3, fan3),
        wo=_xavier_normal(k4, (c, n_out), c, n_out),
        bo=jnp.zeros((n_out,), jnp.float32),
        gamma=jnp.ones((3, c), jnp.float32),
        beta=jnp.zeros((3, c), jnp.float32),
    )


def fuse_two_heads(pa, pb, c, cp):
    """Merge two pred_layers heads (sharing one input) into one lane-dense,
    Cp(=128)-channel block-structured parameter set: conv1 outputs concatenate,
    conv2/conv3/conv_out are block-diagonal, BN params concatenate, and all
    padded channels carry exact zeros so they stay zero through the trunk."""
    c2 = 2 * c

    def place(blocks):
        w = jnp.zeros((9, cp, cp), jnp.float32)
        for r0, c0, arr in blocks:
            w = w.at[:, r0:r0 + arr.shape[1], c0:c0 + arr.shape[2]].set(arr)
        return w

    w1 = place([(0, 0, pa["w1"]), (0, c, pb["w1"])])     # shared input
    w2 = place([(0, 0, pa["w2"]), (c, c, pb["w2"])])     # block-diagonal
    w3 = place([(0, 0, pa["w3"]), (c, c, pb["w3"])])

    cout_a = pa["wo"].shape[1]
    cout_b = pb["wo"].shape[1]
    cout = cout_a + cout_b
    coutp = _round_up(cout, 128)
    wot = jnp.zeros((cp, coutp), jnp.float32)            # pre-transposed
    wot = wot.at[:c, :cout_a].set(pa["wo"])
    wot = wot.at[c:c2, cout_a:cout].set(pb["wo"])

    gamma = jnp.zeros((3, cp), jnp.float32)
    gamma = gamma.at[:, :c].set(pa["gamma"]).at[:, c:c2].set(pb["gamma"])
    beta = jnp.zeros((3, cp), jnp.float32)
    beta = beta.at[:, :c].set(pa["beta"]).at[:, c:c2].set(pb["beta"])

    return dict(w1=w1, w2=w2, w3=w3, gamma=gamma, beta=beta, wot=wot,
                bo=jnp.concatenate([pa["bo"], pb["bo"]], axis=0),
                cout=cout, cout_a=cout_a, coutp=coutp)


def make_epilogue_addend(npts, k, cout_total, coutp, bo, n, h, w):
    """conv_out bias + the reference's meshgrid pixel offsets (x for d=0 and
    y for d=1 channels of the locs head), pre-tiled to (n*h*w, coutp) so the
    kernel epilogue is a single lane-dense add."""
    cout_a = npts * 2 * k
    yy, xx = jnp.meshgrid(jnp.arange(h, dtype=jnp.float32),
                          jnp.arange(w, dtype=jnp.float32), indexing="ij")
    xx = xx.reshape(h * w, 1)
    yy = yy.reshape(h * w, 1)
    ch = jnp.arange(coutp)
    d = (ch // k) % 2
    sel_x = ((ch < cout_a) & (d == 0)).astype(jnp.float32)[None, :]
    sel_y = ((ch < cout_a) & (d == 1)).astype(jnp.float32)[None, :]
    bo_p = jnp.zeros((coutp,), jnp.float32).at[:cout_total].set(bo)
    add = sel_x * xx + sel_y * yy + bo_p[None, :]        # (h*w, coutp)
    return jnp.tile(add, (n, 1))                         # (n*h*w, coutp)


class MDNJointPallas:
    """Pallas implementation of mdn_joint.forward (use_fpn=True path)."""

    def __init__(self, npts, n_ftrs=32, k_j=4, k_r=3, key=None):
        if key is None:
            key = jax.random.PRNGKey(0)
        self.npts, self.k_j, self.k_r, self.n_ftrs = npts, k_j, k_r, n_ftrs
        cp = _round_up(2 * n_ftrs, 128)                  # lane-dense trunk width
        self.cp = cp
        keys = jax.random.split(key, 6)
        mean = jnp.array([0.485, 0.456, 0.406], jnp.float32)
        std = jnp.array([0.229, 0.224, 0.225], jnp.float32)

        # TODO(synk): the pretrained torchvision ResNet50-FPN backbone has no
        # clean Pallas equivalent; it is replaced by deterministic stride-4
        # ('0') and stride-32 ('3') average pooling + a 1x1 projection to
        # n_ftrs channels (fused into the per-scale kernel).  Everything
        # downstream matches the reference math exactly.
        std_p = (2.0 / (3 + n_ftrs)) ** 0.5
        w_proj_r = std_p * jax.random.normal(keys[0], (3, n_ftrs), jnp.float32)
        w_proj_j = std_p * jax.random.normal(keys[1], (3, n_ftrs), jnp.float32)

        def fold_norm(wp):
            # (x-mean)/std then 1x1 conv == x @ (wp/std) + (-(mean/std) @ wp);
            # padded (zero) columns stay exactly zero through both terms.
            wp_pad = jnp.zeros((3, cp), jnp.float32).at[:, :n_ftrs].set(wp)
            return wp_pad / std[:, None], (-(mean / std) @ wp_pad).reshape(1, cp)

        p_locs_j = init_pred_head_params(keys[2], n_ftrs, 2 * npts * k_j)
        p_wts_j = init_pred_head_params(keys[3], n_ftrs, k_j)
        p_locs_r = init_pred_head_params(keys[4], n_ftrs, npts * 2 * k_r)
        p_wts_r = init_pred_head_params(keys[5], n_ftrs, npts * k_r)

        self.params_j = fuse_two_heads(p_locs_j, p_wts_j, n_ftrs, cp)
        self.params_r = fuse_two_heads(p_locs_r, p_wts_r, n_ftrs, cp)
        self.params_j["wp"], self.params_j["bp"] = fold_norm(w_proj_j)
        self.params_r["wp"], self.params_r["bp"] = fold_norm(w_proj_r)

    @staticmethod
    def _pool_nchw_to_nhwc(x, s):
        # average pool in NCHW, then transpose only the small pooled tensor.
        n, ch, hh, ww = x.shape
        p = x.reshape(n, ch, hh // s, s, ww // s, s).mean(axis=(3, 5))
        return jnp.transpose(p, (0, 2, 3, 1))            # (n, h/s, w/s, 3)

    def __call__(self, inputs):
        x = inputs["images"].astype(jnp.float32)         # (N, 3, H, W)
        n = x.shape[0]
        # Single pass over the full-resolution image: stride-4 pool once and
        # derive the stride-32 scale from it with an extra 8x8 average.
        x_r = self._pool_nchw_to_nhwc(x, 4)              # FPN '0' stand-in
        hr, wr = x_r.shape[1:3]
        x_j = x_r.reshape(n, hr // 8, 8, wr // 8, 8, 3).mean(axis=(2, 4))
        hj, wj = x_j.shape[1:3]                          # FPN '3' stand-in

        pj, pr = self.params_j, self.params_r
        add_j = make_epilogue_addend(self.npts, self.k_j, pj["cout"],
                                     pj["coutp"], pj["bo"], n, hj, wj)
        add_r = make_epilogue_addend(self.npts, self.k_r, pr["cout"],
                                     pr["coutp"], pr["bo"], n, hr, wr)

        out_j = fused_scale_apply(x_j, pj, add_j)        # (n*hj*wj, coutp_j)
        out_r = fused_scale_apply(x_r, pr, add_r)        # (n*hr*wr, coutp_r)

        def to_nchw(out, h, w, cout):
            # tiny metadata-only post-processing on the small pooled outputs
            return jnp.transpose(out.reshape(n, h, w, -1)[..., :cout],
                                 (0, 3, 1, 2))

        out_j = to_nchw(out_j, hj, wj, pj["cout"])       # (n, cout_j, hj, wj)
        out_r = to_nchw(out_r, hr, wr, pr["cout"])

        ca_j, ca_r = pj["cout_a"], pr["cout_a"]
        locs_j_off = out_j[:, :ca_j].reshape(n, self.npts, 2, self.k_j, hj, wj)
        wts_j = out_j[:, ca_j:]
        locs_r_off = out_r[:, :ca_r].reshape(n, self.npts, 2, self.k_r, hr, wr)
        wts_r = out_r[:, ca_r:].reshape(n, self.npts, self.k_r, hr, wr)
        return locs_j_off, wts_j, locs_r_off, wts_r


if __name__ == "__main__":
    npts, k_j, k_r, n_ftrs = 2, 4, 3, 32
    model = MDNJointPallas(npts=npts, n_ftrs=n_ftrs, k_j=k_j, k_r=k_r,
                           key=jax.random.PRNGKey(0))
    images = jax.random.uniform(jax.random.PRNGKey(0), (2, 3, 64, 64), jnp.float32)
    outs = model({"images": images})
    outs = jax.block_until_ready(outs)

    locs_j_off, wts_j, locs_r_off, wts_r = outs
    assert locs_j_off.shape == (2, npts, 2, k_j, 2, 2)
    assert wts_j.shape == (2, k_j, 2, 2)
    assert locs_r_off.shape == (2, npts, 2, k_r, 16, 16)
    assert wts_r.shape == (2, npts, k_r, 16, 16)
    assert all(bool(jnp.all(jnp.isfinite(o))) for o in outs)
    print("KERNEL_OK")
</pallas_src>

<mosaic_0001>
module attributes {stable_mosaic.version = 11 : i64} {
  func.func @_fused_scale_kernel(%arg0: memref<2x2x2x3xf32, #tpu.memory_space<vmem>>, %arg1: memref<3x128xf32, #tpu.memory_space<vmem>>, %arg2: memref<1x128xf32, #tpu.memory_space<vmem>>, %arg3: memref<9x128x128xf32, #tpu.memory_space<vmem>>, %arg4: memref<9x128x128xf32, #tpu.memory_space<vmem>>, %arg5: memref<9x128x128xf32, #tpu.memory_space<vmem>>, %arg6: memref<3x128xf32, #tpu.memory_space<vmem>>, %arg7: memref<3x128xf32, #tpu.memory_space<vmem>>, %arg8: memref<128x128xf32, #tpu.memory_space<vmem>>, %arg9: memref<8x128xf32, #tpu.memory_space<vmem>>, %arg10: memref<8x128xf32, #tpu.memory_space<vmem>>, %arg11: memref<2x4x4x128xf32, #tpu.memory_space<vmem>>, %arg12: memref<8x128xf32, #tpu.memory_space<vmem>>) attributes {dimension_semantics = [], scalar_prefetch = 0 : i64, scratch_operands = 2 : i64, tpu.core_type = #tpu.core_type<tc>} {
    %c0 = arith.constant 0 : index
    %c0_0 = arith.constant 0 : index
    %c0_1 = arith.constant 0 : index
    %c0_2 = arith.constant 0 : index
    %0 = vector.load %arg0[%c0, %c0_0, %c0_1, %c0_2] : memref<2x2x2x3xf32, #tpu.memory_space<vmem>>, vector<2x2x2x3xf32>
    %1 = vector.shape_cast %0 : vector<2x2x2x3xf32> to vector<8x3xf32>
    %c0_3 = arith.constant 0 : index
    %c0_4 = arith.constant 0 : index
    %2 = vector.load %arg1[%c0_3, %c0_4] : memref<3x128xf32, #tpu.memory_space<vmem>>, vector<3x128xf32>
    %cst = arith.constant dense<0.000000e+00> : vector<8x128xf32>
    %3 = tpu.matmul %1, %2, %cst {dimension_numbers = #tpu.dot_dimension_numbers<[1], [0], [0], [1], [0, 0, 1, 1], [], []>} : vector<8x3xf32>, vector<3x128xf32>, vector<8x128xf32> -> vector<8x128xf32>
    %c0_5 = arith.constant 0 : index
    %c0_6 = arith.constant 0 : index
    %4 = vector.load %arg2[%c0_5, %c0_6] : memref<1x128xf32, #tpu.memory_space<vmem>>, vector<1x128xf32>
    %5 = vector.broadcast %4 : vector<1x128xf32> to vector<8x128xf32>
    %6 = arith.addf %3, %5 : vector<8x128xf32>
    %cst_7 = arith.constant 0.000000e+00 : f32
    %7 = vector.broadcast %cst_7 : f32 to vector<2x1x4x128xf32>
    %cst_8 = arith.constant 0.000000e+00 : f32
    %8 = vector.broadcast %cst_8 : f32 to vector<2x4x1x128xf32>
    %c0_9 = arith.constant 0 : index
    %c0_10 = arith.constant 0 : index
    %c0_11 = arith.constant 0 : index
    %c0_12 = arith.constant 0 : index
    %9 = vector.load %arg11[%c0_9, %c0_10, %c0_11, %c0_12] : memref<2x4x4x128xf32, #tpu.memory_space<vmem>>, vector<2x1x4x128xf32>
    tpu.vector_store %arg11[%c0_9, %c0_10, %c0_11, %c0_12], %7 {strides = array<i32>} : memref<2x4x4x128xf32, #tpu.memory_space<vmem>>, vector<2x1x4x128xf32>,
    %c0_13 = arith.constant 0 : index
    %c3 = arith.constant 3 : index
    %c0_14 = arith.constant 0 : index
    %c0_15 = arith.constant 0 : index
    %10 = vector.load %arg11[%c0_13, %c3, %c0_14, %c0_15] : memref<2x4x4x128xf32, #tpu.memory_space<vmem>>, vector<2x1x4x128xf32>
    tpu.vector_store %arg11[%c0_13, %c3, %c0_14, %c0_15], %7 {strides = array<i32>} : memref<2x4x4x128xf32, #tpu.memory_space<vmem>>, vector<2x1x4x128xf32>,
    %c0_16 = arith.constant 0 : index
    %c0_17 = arith.constant 0 : index
    %c0_18 = arith.constant 0 : index
    %c0_19 = arith.constant 0 : index
    %11 = vector.load %arg11[%c0_16, %c0_17, %c0_18, %c0_19] : memref<2x4x4x128xf32, #tpu.memory_space<vmem>>, vector<2x4x1x128xf32>
    tpu.vector_store %arg11[%c0_16, %c0_17, %c0_18, %c0_19], %8 {strides = array<i32>} : memref<2x4x4x128xf32, #tpu.memory_space<vmem>>, vector<2x4x1x128xf32>,
    %c0_20 = arith.constant 0 : index
    %c0_21 = arith.constant 0 : index
    %c3_22 = arith.constant 3 : index
    %c0_23 = arith.constant 0 : index
    %12 = vector.load %arg11[%c0_20, %c0_21, %c3_22, %c0_23] : memref<2x4x4x128xf32, #tpu.memory_space<vmem>>, vector<2x4x1x128xf32>
    tpu.vector_store %arg11[%c0_20, %c0_21, %c3_22, %c0_23], %8 {strides = array<i32>} : memref<2x4x4x128xf32, #tpu.memory_space<vmem>>, vector<2x4x1x128xf32>,
    %cst_24 = arith.constant 0.000000e+00 : f32
    %13 = vector.broadcast %cst_24 : f32 to vector<8x128xf32>
    %14 = arith.maximumf %6, %13 : vector<8x128xf32>
    %15 = vector.shape_cast %14 : vector<8x128xf32> to vector<2x2x2x128xf32>
    %c0_25 = arith.constant 0 : index
    %c1 = arith.constant 1 : index
    %c1_26 = arith.constant 1 : index
    %c0_27 = arith.constant 0 : index
    %16 = vector.load %arg11[%c0_25, %c1, %c1_26, %c0_27] : memref<2x4x4x128xf32, #tpu.memory_space<vmem>>, vector<2x2x2x128xf32>
    tpu.vector_store %arg11[%c0_25, %c1, %c1_26, %c0_27], %15 {strides = array<i32>} : memref<2x4x4x128xf32, #tpu.memory_space<vmem>>, vector<2x2x2x128xf32>,
    %c0_28 = arith.constant 0 : index
    %c0_29 = arith.constant 0 : index
    %c0_30 = arith.constant 0 : index
    %c0_31 = arith.constant 0 : index
    %17 = vector.load %arg11[%c0_28, %c0_29, %c0_30, %c0_31] : memref<2x4x4x128xf32, #tpu.memory_space<vmem>>, vector<2x2x2x128xf32>
    %18 = vector.shape_cast %17 : vector<2x2x2x128xf32> to vector<8x128xf32>
    %c0_32 = arith.constant 0 : index
    %c0_33 = arith.constant 0 : index
    %c0_34 = arith.constant 0 : index
    %19 = vector.load %arg3[%c0_32, %c0_33, %c0_34] : memref<9x128x128xf32, #tpu.memory_space<vmem>>, vector<1x128x128xf32>
    %20 = vector.shape_cast %19 : vector<1x128x128xf32> to vector<128x128xf32>
    %cst_35 = arith.constant dense<0.000000e+00> : vector<8x128xf32>
    %21 = tpu.matmul %18, %20, %cst_35 {dimension_numbers = #tpu.dot_dimension_numbers<[1], [0], [0], [1], [0, 0, 1, 1], [], []>} : vector<8x128xf32>, vector<128x128xf32>, vector<8x128xf32> -> vector<8x128xf32>
    %c0_36 = arith.constant 0 : index
    %c0_37 = arith.constant 0 : index
    %c1_38 = arith.constant 1 : index
    %c0_39 = arith.constant 0 : index
    %22 = vector.load %arg11[%c0_36, %c0_37, %c1_38, %c0_39] : memref<2x4x4x128xf32, #tpu.memory_space<vmem>>, vector<2x2x2x128xf32>
    %23 = vector.shape_cast %22 : vector<2x2x2x128xf32> to vector<8x128xf32>
    %c1_40 = arith.constant 1 : index
    %c0_41 = arith.constant 0 : index
    %c0_42 = arith.constant 0 : index
    %24 = vector.load %arg3[%c1_40, %c0_41, %c0_42] : memref<9x128x128xf32, #tpu.memory_space<vmem>>, vector<1x128x128xf32>
    %25 = vector.shape_cast %24 : vector<1x128x128xf32> to vector<128x128xf32>
    %cst_43 = arith.constant dense<0.000000e+00> : vector<8x128xf32>
    %26 = tpu.matmul %23, %25, %cst_43 {dimension_numbers = #tpu.dot_dimension_numbers<[1], [0], [0], [1], [0, 0, 1, 1], [], []>} : vector<8x128xf32>, vector<128x128xf32>, vector<8x128xf32> -> vector<8x128xf32>
    %27 = arith.addf %21, %26 : vector<8x128xf32>
    %c0_44 = arith.constant 0 : index
    %c0_45 = arith.constant 0 : index
    %c2 = arith.constant 2 : index
    %c0_46 = arith.constant 0 : index
    %28 = vector.load %arg11[%c0_44, %c0_45, %c2, %c0_46] : memref<2x4x4x128xf32, #tpu.memory_space<vmem>>, vector<2x2x2x128xf32>
    %29 = vector.shape_cast %28 : vector<2x2x2x128xf32> to vector<8x128xf32>
    %c2_47 = arith.constant 2 : index
    %c0_48 = arith.constant 0 : index
    %c0_49 = arith.constant 0 : index
    %30 = vector.load %arg3[%c2_47, %c0_48, %c0_49] : memref<9x128x128xf32, #tpu.memory_space<vmem>>, vector<1x128x128xf32>
    %31 = vector.shape_cast %30 : vector<1x128x128xf32> to vector<128x128xf32>
    %cst_50 = arith.constant dense<0.000000e+00> : vector<8x128xf32>
    %32 = tpu.matmul %29, %31, %cst_50 {dimension_numbers = #tpu.dot_dimension_numbers<[1], [0], [0], [1], [0, 0, 1, 1], [], []>} : vector<8x128xf32>, vector<128x128xf32>, vector<8x128xf32> -> vector<8x128xf32>
    %33 = arith.addf %27, %32 : vector<8x128xf32>
    %c0_51 = arith.constant 0 : index
    %c1_52 = arith.constant 1 : index
    %c0_53 = arith.constant 0 : index
    %c0_54 = arith.constant 0 : index
    %34 = vector.load %arg11[%c0_51, %c1_52, %c0_53, %c0_54] : memref<2x4x4x128xf32, #tpu.memory_space<vmem>>, vector<2x2x2x128xf32>
    %35 = vector.shape_cast %34 : vector<2x2x2x128xf32> to vector<8x128xf32>
    %c3_55 = arith.constant 3 : index
    %c0_56 = arith.constant 0 : index
    %c0_57 = arith.constant 0 : index
    %36 = vector.load %arg3[%c3_55, %c0_56, %c0_57] : memref<9x128x128xf32, #tpu.memory_space<vmem>>, vector<1x128x128xf32>
    %37 = vector.shape_cast %36 : vector<1x128x128xf32> to vector<128x128xf32>
    %cst_58 = arith.constant dense<0.000000e+00> : vector<8x128xf32>
    %38 = tpu.matmul %35, %37, %cst_58 {dimension_numbers = #tpu.dot_dimension_numbers<[1], [0], [0], [1], [0, 0, 1, 1], [], []>} : vector<8x128xf32>, vector<128x128xf32>, vector<8x128xf32> -> vector<8x128xf32>
    %39 = arith.addf %33, %38 : vector<8x128xf32>
    %c0_59 = arith.constant 0 : index
    %c1_60 = arith.constant 1 : index
    %c1_61 = arith.constant 1 : index
    %c0_62 = arith.constant 0 : index
    %40 = vector.load %arg11[%c0_59, %c1_60, %c1_61, %c0_62] : memref<2x4x4x128xf32, #tpu.memory_space<vmem>>, vector<2x2x2x128xf32>
    %41 = vector.shape_cast %40 : vector<2x2x2x128xf32> to vector<8x128xf32>
    %c4 = arith.constant 4 : index
    %c0_63 = arith.constant 0 : index
    %c0_64 = arith.constant 0 : index
    %42 = vector.load %arg3[%c4, %c0_63, %c0_64] : memref<9x128x128xf32, #tpu.memory_space<vmem>>, vector<1x128x128xf32>
    %43 = vector.shape_cast %42 : vector<1x128x128xf32> to vector<128x128xf32>
    %cst_65 = arith.constant dense<0.000000e+00> : vector<8x128xf32>
    %44 = tpu.matmul %41, %43, %cst_65 {dimension_numbers = #tpu.dot_dimension_numbers<[1], [0], [0], [1], [0, 0, 1, 1], [], []>} : vector<8x128xf32>, vector<128x128xf32>, vector<8x128xf32> -> vector<8x128xf32>
    %45 = arith.addf %39, %44 : vector<8x128xf32>
    %c0_66 = arith.constant 0 : index
    %c1_67 = arith.constant 1 : index
    %c2_68 = arith.constant 2 : index
    %c0_69 = arith.constant 0 : index
    %46 = vector.load %arg11[%c0_66, %c1_67, %c2_68, %c0_69] : memref<2x4x4x128xf32, #tpu.memory_space<vmem>>, vector<2x2x2x128xf32>
    %47 = vector.shape_cast %46 : vector<2x2x2x128xf32> to vector<8x128xf32>
    %c5 = arith.constant 5 : index
    %c0_70 = arith.constant 0 : index
    %c0_71 = arith.constant 0 : index
    %48 = vector.load %arg3[%c5, %c0_70, %c0_71] : memref<9x128x128xf32, #tpu.memory_space<vmem>>, vector<1x128x128xf32>
    %49 = vector.shape_cast %48 : vector<1x128x128xf32> to vector<128x128xf32>
    %cst_72 = arith.constant dense<0.000000e+00> : vector<8x128xf32>
    %50 = tpu.matmul %47, %49, %cst_72 {dimension_numbers = #tpu.dot_dimension_numbers<[1], [0], [0], [1], [0, 0, 1, 1], [], []>} : vector<8x128xf32>, vector<128x128xf32>, vector<8x128xf32> -> vector<8x128xf32>
    %51 = arith.addf %45, %50 : vector<8x128xf32>
    %c0_73 = arith.constant 0 : index
    %c2_74 = arith.constant 2 : index
    %c0_75 = arith.constant 0 : index
    %c0_76 = arith.constant 0 : index
    %52 = vector.load %arg11[%c0_73, %c2_74, %c0_75, %c0_76] : memref<2x4x4x128xf32, #tpu.memory_space<vmem>>, vector<2x2x2x128xf32>
    %53 = vector.shape_cast %52 : vector<2x2x2x128xf32> to vector<8x128xf32>
    %c6 = arith.constant 6 : index
    %c0_77 = arith.constant 0 : index
    %c0_78 = arith.constant 0 : index
    %54 = vector.load %arg3[%c6, %c0_77, %c0_78] : memref<9x128x128xf32, #tpu.memory_space<vmem>>, vector<1x128x128xf32>
    %55 = vector.shape_cast %54 : vector<1x128x128xf32> to vector<128x128xf32>
    %cst_79 = arith.constant dense<0.000000e+00> : vector<8x128xf32>
    %56 = tpu.matmul %53, %55, %cst_79 {dimension_numbers = #tpu.dot_dimension_numbers<[1], [0], [0], [1], [0, 0, 1, 1], [], []>} : vector<8x128xf32>, vector<128x128xf32>, vector<8x128xf32> -> vector<8x128xf32>
    %57 = arith.addf %51, %56 : vector<8x128xf32>
    %c0_80 = arith.constant 0 : index
    %c2_81 = arith.constant 2 : index
    %c1_82 = arith.constant 1 : index
    %c0_83 = arith.constant 0 : index
    %58 = vector.load %arg11[%c0_80, %c2_81, %c1_82, %c0_83] : memref<2x4x4x128xf32, #tpu.memory_space<vmem>>, vector<2x2x2x128xf32>
    %59 = vector.shape_cast %58 : vector<2x2x2x128xf32> to vector<8x128xf32>
    %c7 = arith.constant 7 : index
    %c0_84 = arith.constant 0 : index
    %c0_85 = arith.constant 0 : index
    %60 = vector.load %arg3[%c7, %c0_84, %c0_85] : memref<9x128x128xf32, #tpu.memory_space<vmem>>, vector<1x128x128xf32>
    %61 = vector.shape_cast %60 : vector<1x128x128xf32> to vector<128x128xf32>
    %cst_86 = arith.constant dense<0.000000e+00> : vector<8x128xf32>
    %62 = tpu.matmul %59, %61, %cst_86 {dimension_numbers = #tpu.dot_dimension_numbers<[1], [0], [0], [1], [0, 0, 1, 1], [], []>} : vector<8x128xf32>, vector<128x128xf32>, vector<8x128xf32> -> vector<8x128xf32>
    %63 = arith.addf %57, %62 : vector<8x128xf32>
    %c0_87 = arith.constant 0 : index
    %c2_88 = arith.constant 2 : index
    %c2_89 = arith.constant 2 : index
    %c0_90 = arith.constant 0 : index
    %64 = vector.load %arg11[%c0_87, %c2_88, %c2_89, %c0_90] : memref<2x4x4x128xf32, #tpu.memory_space<vmem>>, vector<2x2x2x128xf32>
    %65 = vector.shape_cast %64 : vector<2x2x2x128xf32> to vector<8x128xf32>
    %c8 = arith.constant 8 : index
    %c0_91 = arith.constant 0 : index
    %c0_92 = arith.constant 0 : index
    %66 = vector.load %arg3[%c8, %c0_91, %c0_92] : memref<9x128x128xf32, #tpu.memory_space<vmem>>, vector<1x128x128xf32>
    %67 = vector.shape_cast %66 : vector<1x128x128xf32> to vector<128x128xf32>
    %cst_93 = arith.constant dense<0.000000e+00> : vector<8x128xf32>
    %68 = tpu.matmul %65, %67, %cst_93 {dimension_numbers = #tpu.dot_dimension_numbers<[1], [0], [0], [1], [0, 0, 1, 1], [], []>} : vector<8x128xf32>, vector<128x128xf32>, vector<8x128xf32> -> vector<8x128xf32>
    %69 = arith.addf %63, %68 : vector<8x128xf32>
    %cst_94 = arith.constant dense<0.000000e+00> : vector<128xf32>
    %70 = vector.multi_reduction <add>, %69, %cst_94 [0] : vector<8x128xf32> to vector<128xf32>
    %71 = vector.shape_cast %70 : vector<128xf32> to vector<1x128xf32>
    %cst_95 = arith.constant 1.250000e-01 : f32
    %72 = vector.broadcast %cst_95 : f32 to vector<1x128xf32>
    %73 = arith.mulf %71, %72 : vector<1x128xf32>
    %74 = arith.mulf %69, %69 : vector<8x128xf32>
    %cst_96 = arith.constant dense<0.000000e+00> : vector<128xf32>
    %75 = vector.multi_reduction <add>, %74, %cst_96 [0] : vector<8x128xf32> to vector<128xf32>
    %76 = vector.shape_cast %75 : vector<128xf32> to vector<1x128xf32>
    %cst_97 = arith.constant 1.250000e-01 : f32
    %77 = vector.broadcast %cst_97 : f32 to vector<1x128xf32>
    %78 = arith.mulf %76, %77 : vector<1x128xf32>
    %79 = arith.mulf %73, %73 : vector<1x128xf32>
    %80 = arith.subf %78, %79 : vector<1x128xf32>
    %c0_98 = arith.constant 0 : index
    %c0_99 = arith.constant 0 : index
    %81 = vector.load %arg6[%c0_98, %c0_99] : memref<3x128xf32, #tpu.memory_space<vmem>>, vector<1x128xf32>
    %cst_100 = arith.constant 9.99999974E-6 : f32
    %82 = vector.broadcast %cst_100 : f32 to vector<1x128xf32>
    %83 = arith.addf %80, %82 : vector<1x128xf32>
    %84 = math.rsqrt %83 : vector<1x128xf32>
    %85 = arith.mulf %81, %84 : vector<1x128xf32>
    %c0_101 = arith.constant 0 : index
    %c0_102 = arith.constant 0 : index
    %86 = vector.load %arg7[%c0_101, %c0_102] : memref<3x128xf32, #tpu.memory_space<vmem>>, vector<1x128xf32>
    %87 = arith.mulf %73, %85 : vector<1x128xf32>
    %88 = arith.subf %86, %87 : vector<1x128xf32>
    %89 = vector.broadcast %85 : vector<1x128xf32> to vector<8x128xf32>
    %90 = arith.mulf %69, %89 : vector<8x128xf32>
    %91 = vector.broadcast %88 : vector<1x128xf32> to vector<8x128xf32>
    %92 = arith.addf %90, %91 : vector<8x128xf32>
    %c0_103 = arith.constant 0 : index
    %c0_104 = arith.constant 0 : index
    %93 = vector.load %arg12[%c0_103, %c0_104] : memref<8x128xf32, #tpu.memory_space<vmem>>, vector<8x128xf32>
    tpu.vector_store %arg12[%c0_103, %c0_104], %92 {strides = array<i32>} : memref<8x128xf32, #tpu.memory_space<vmem>>, vector<8x128xf32>,
    %cst_105 = arith.constant 0.000000e+00 : f32
    %94 = vector.broadcast %cst_105 : f32 to vector<8x128xf32>
    %95 = arith.maximumf %92, %94 : vector<8x128xf32>
    %96 = vector.shape_cast %95 : vector<8x128xf32> to vector<2x2x2x128xf32>
    %c0_106 = arith.constant 0 : index
    %c1_107 = arith.constant 1 : index
    %c1_108 = arith.constant 1 : index
    %c0_109 = arith.constant 0 : index
    %97 = vector.load %arg11[%c0_106, %c1_107, %c1_108, %c0_109] : memref<2x4x4x128xf32, #tpu.memory_space<vmem>>, vector<2x2x2x128xf32>
    tpu.vector_store %arg11[%c0_106, %c1_107, %c1_108, %c0_109], %96 {strides = array<i32>} : memref<2x4x4x128xf32, #tpu.memory_space<vmem>>, vector<2x2x2x128xf32>,
    %c0_110 = arith.constant 0 : index
    %c0_111 = arith.constant 0 : index
    %c0_112 = arith.constant 0 : index
    %c0_113 = arith.constant 0 : index
    %98 = vector.load %arg11[%c0_110, %c0_111, %c0_112, %c0_113] : memref<2x4x4x128xf32, #tpu.memory_space<vmem>>, vector<2x2x2x128xf32>
    %99 = vector.shape_cast %98 : vector<2x2x2x128xf32> to vector<8x128xf32>
    %c0_114 = arith.constant 0 : index
    %c0_115 = arith.constant 0 : index
    %c0_116 = arith.constant 0 : index
    %100 = vector.load %arg4[%c0_114, %c0_115, %c0_116] : memref<9x128x128xf32, #tpu.memory_space<vmem>>, vector<1x128x128xf32>
    %101 = vector.shape_cast %100 : vector<1x128x128xf32> to vector<128x128xf32>
    %cst_117 = arith.constant dense<0.000000e+00> : vector<8x128xf32>
    %102 = tpu.matmul %99, %101, %cst_117 {dimension_numbers = #tpu.dot_dimension_numbers<[1], [0], [0], [1], [0, 0, 1, 1], [], []>} : vector<8x128xf32>, vector<128x128xf32>, vector<8x128xf32> -> vector<8x128xf32>
    %c0_118 = arith.constant 0 : index
    %c0_119 = arith.constant 0 : index
    %c1_120 = arith.constant 1 : index
    %c0_121 = arith.constant 0 : index
    %103 = vector.load %arg11[%c0_118, %c0_119, %c1_120, %c0_121] : memref<2x4x4x128xf32, #tpu.memory_space<vmem>>, vector<2x2x2x128xf32>
    %104 = vector.shape_cast %103 : vector<2x2x2x128xf32> to vector<8x128xf32>
    %c1_122 = arith.constant 1 : index
    %c0_123 = arith.constant 0 : index
    %c0_124 = arith.constant 0 : index
    %105 = vector.load %arg4[%c1_122, %c0_123, %c0_124] : memref<9x128x128xf32, #tpu.memory_space<vmem>>, vector<1x128x128xf32>
    %106 = vector.shape_cast %105 : vector<1x128x128xf32> to vector<128x128xf32>
    %cst_125 = arith.constant dense<0.000000e+00> : vector<8x128xf32>
    %107 = tpu.matmul %104, %106, %cst_125 {dimension_numbers = #tpu.dot_dimension_numbers<[1], [0], [0], [1], [0, 0, 1, 1], [], []>} : vector<8x128xf32>, vector<128x128xf32>, vector<8x128xf32> -> vector<8x128xf32>
    %108 = arith.addf %102, %107 : vector<8x128xf32>
    %c0_126 = arith.constant 0 : index
    %c0_127 = arith.constant 0 : index
    %c2_128 = arith.constant 2 : index
    %c0_129 = arith.constant 0 : index
    %109 = vector.load %arg11[%c0_126, %c0_127, %c2_128, %c0_129] : memref<2x4x4x128xf32, #tpu.memory_space<vmem>>, vector<2x2x2x128xf32>
    %110 = vector.shape_cast %109 : vector<2x2x2x128xf32> to vector<8x128xf32>
    %c2_130 = arith.constant 2 : index
    %c0_131 = arith.constant 0 : index
    %c0_132 = arith.constant 0 : index
    %111 = vector.load %arg4[%c2_130, %c0_131, %c0_132] : memref<9x128x128xf32, #tpu.memory_space<vmem>>, vector<1x128x128xf32>
    %112 = vector.shape_cast %111 : vector<1x128x128xf32> to vector<128x128xf32>
    %cst_133 = arith.constant dense<0.000000e+00> : vector<8x128xf32>
    %113 = tpu.matmul %110, %112, %cst_133 {dimension_numbers = #tpu.dot_dimension_numbers<[1], [0], [0], [1], [0, 0, 1, 1], [], []>} : vector<8x128xf32>, vector<128x128xf32>, vector<8x128xf32> -> vector<8x128xf32>
    %114 = arith.addf %108, %113 : vector<8x128xf32>
    %c0_134 = arith.constant 0 : index
    %c1_135 = arith.constant 1 : index
    %c0_136 = arith.constant 0 : index
    %c0_137 = arith.constant 0 : index
    %115 = vector.load %arg11[%c0_134, %c1_135, %c0_136, %c0_137] : memref<2x4x4x128xf32, #tpu.memory_space<vmem>>, vector<2x2x2x128xf32>
    %116 = vector.shape_cast %115 : vector<2x2x2x128xf32> to vector<8x128xf32>
    %c3_138 = arith.constant 3 : index
    %c0_139 = arith.constant 0 : index
    %c0_140 = arith.constant 0 : index
    %117 = vector.load %arg4[%c3_138, %c0_139, %c0_140] : memref<9x128x128xf32, #tpu.memory_space<vmem>>, vector<1x128x128xf32>
    %118 = vector.shape_cast %117 : vector<1x128x128xf32> to vector<128x128xf32>
    %cst_141 = arith.constant dense<0.000000e+00> : vector<8x128xf32>
    %119 = tpu.matmul %116, %118, %cst_141 {dimension_numbers = #tpu.dot_dimension_numbers<[1], [0], [0], [1], [0, 0, 1, 1], [], []>} : vector<8x128xf32>, vector<128x128xf32>, vector<8x128xf32> -> vector<8x128xf32>
    %120 = arith.addf %114, %119 : vector<8x128xf32>
    %c0_142 = arith.constant 0 : index
    %c1_143 = arith.constant 1 : index
    %c1_144 = arith.constant 1 : index
    %c0_145 = arith.constant 0 : index
    %121 = vector.load %arg11[%c0_142, %c1_143, %c1_144, %c0_145] : memref<2x4x4x128xf32, #tpu.memory_space<vmem>>, vector<2x2x2x128xf32>
    %122 = vector.shape_cast %121 : vector<2x2x2x128xf32> to vector<8x128xf32>
    %c4_146 = arith.constant 4 : index
    %c0_147 = arith.constant 0 : index
    %c0_148 = arith.constant 0 : index
    %123 = vector.load %arg4[%c4_146, %c0_147, %c0_148] : memref<9x128x128xf32, #tpu.memory_space<vmem>>, vector<1x128x128xf32>
    %124 = vector.shape_cast %123 : vector<1x128x128xf32> to vector<128x128xf32>
    %cst_149 = arith.constant dense<0.000000e+00> : vector<8x128xf32>
    %125 = tpu.matmul %122, %124, %cst_149 {dimension_numbers = #tpu.dot_dimension_numbers<[1], [0], [0], [1], [0, 0, 1, 1], [], []>} : vector<8x128xf32>, vector<128x128xf32>, vector<8x128xf32> -> vector<8x128xf32>
    %126 = arith.addf %120, %125 : vector<8x128xf32>
    %c0_150 = arith.constant 0 : index
    %c1_151 = arith.constant 1 : index
    %c2_152 = arith.constant 2 : index
    %c0_153 = arith.constant 0 : index
    %127 = vector.load %arg11[%c0_150, %c1_151, %c2_152, %c0_153] : memref<2x4x4x128xf32, #tpu.memory_space<vmem>>, vector<2x2x2x128xf32>
    %128 = vector.shape_cast %127 : vector<2x2x2x128xf32> to vector<8x128xf32>
    %c5_154 = arith.constant 5 : index
    %c0_155 = arith.constant 0 : index
    %c0_156 = arith.constant 0 : index
    %129 = vector.load %arg4[%c5_154, %c0_155, %c0_156] : memref<9x128x128xf32, #tpu.memory_space<vmem>>, vector<1x128x128xf32>
    %130 = vector.shape_cast %129 : vector<1x128x128xf32> to vector<128x128xf32>
    %cst_157 = arith.constant dense<0.000000e+00> : vector<8x128xf32>
    %131 = tpu.matmul %128, %130, %cst_157 {dimension_numbers = #tpu.dot_dimension_numbers<[1], [0], [0], [1], [0, 0, 1, 1], [], []>} : vector<8x128xf32>, vector<128x128xf32>, vector<8x128xf32> -> vector<8x128xf32>
    %132 = arith.addf %126, %131 : vector<8x128xf32>
    %c0_158 = arith.constant 0 : index
    %c2_159 = arith.constant 2 : index
    %c0_160 = arith.constant 0 : index
    %c0_161 = arith.constant 0 : index
    %133 = vector.load %arg11[%c0_158, %c2_159, %c0_160, %c0_161] : memref<2x4x4x128xf32, #tpu.memory_space<vmem>>, vector<2x2x2x128xf32>
    %134 = vector.shape_cast %133 : vector<2x2x2x128xf32> to vector<8x128xf32>
    %c6_162 = arith.constant 6 : index
    %c0_163 = arith.constant 0 : index
    %c0_164 = arith.constant 0 : index
    %135 = vector.load %arg4[%c6_162, %c0_163, %c0_164] : memref<9x128x128xf32, #tpu.memory_space<vmem>>, vector<1x128x128xf32>
    %136 = vector.shape_cast %135 : vector<1x128x128xf32> to vector<128x128xf32>
    %cst_165 = arith.constant dense<0.000000e+00> : vector<8x128xf32>
    %137 = tpu.matmul %134, %136, %cst_165 {dimension_numbers = #tpu.dot_dimension_numbers<[1], [0], [0], [1], [0, 0, 1, 1], [], []>} : vector<8x128xf32>, vector<128x128xf32>, vector<8x128xf32> -> vector<8x128xf32>
    %138 = arith.addf %132, %137 : vector<8x128xf32>
    %c0_166 = arith.constant 0 : index
    %c2_167 = arith.constant 2 : index
    %c1_168 = arith.constant 1 : index
    %c0_169 = arith.constant 0 : index
    %139 = vector.load %arg11[%c0_166, %c2_167, %c1_168, %c0_169] : memref<2x4x4x128xf32, #tpu.memory_space<vmem>>, vector<2x2x2x128xf32>
    %140 = vector.shape_cast %139 : vector<2x2x2x128xf32> to vector<8x128xf32>
    %c7_170 = arith.constant 7 : index
    %c0_171 = arith.constant 0 : index
    %c0_172 = arith.constant 0 : index
    %141 = vector.load %arg4[%c7_170, %c0_171, %c0_172] : memref<9x128x128xf32, #tpu.memory_space<vmem>>, vector<1x128x128xf32>
    %142 = vector.shape_cast %141 : vector<1x128x128xf32> to vector<128x128xf32>
    %cst_173 = arith.constant dense<0.000000e+00> : vector<8x128xf32>
    %143 = tpu.matmul %140, %142, %cst_173 {dimension_numbers = #tpu.dot_dimension_numbers<[1], [0], [0], [1], [0, 0, 1, 1], [], []>} : vector<8x128xf32>, vector<128x128xf32>, vector<8x128xf32> -> vector<8x128xf32>
    %144 = arith.addf %138, %143 : vector<8x128xf32>
    %c0_174 = arith.constant 0 : index
    %c2_175 = arith.constant 2 : index
    %c2_176 = arith.constant 2 : index
    %c0_177 = arith.constant 0 : index
    %145 = vector.load %arg11[%c0_174, %c2_175, %c2_176, %c0_177] : memref<2x4x4x128xf32, #tpu.memory_space<vmem>>, vector<2x2x2x128xf32>
    %146 = vector.shape_cast %145 : vector<2x2x2x128xf32> to vector<8x128xf32>
    %c8_178 = arith.constant 8 : index
    %c0_179 = arith.constant 0 : index
    %c0_180 = arith.constant 0 : index
    %147 = vector.load %arg4[%c8_178, %c0_179, %c0_180] : memref<9x128x128xf32, #tpu.memory_space<vmem>>, vector<1x128x128xf32>
    %148 = vector.shape_cast %147 : vector<1x128x128xf32> to vector<128x128xf32>
    %cst_181 = arith.constant dense<0.000000e+00> : vector<8x128xf32>
    %149 = tpu.matmul %146, %148, %cst_181 {dimension_numbers = #tpu.dot_dimension_numbers<[1], [0], [0], [1], [0, 0, 1, 1], [], []>} : vector<8x128xf32>, vector<128x128xf32>, vector<8x128xf32> -> vector<8x128xf32>
    %150 = arith.addf %144, %149 : vector<8x128xf32>
    %cst_182 = arith.constant dense<0.000000e+00> : vector<128xf32>
    %151 = vector.multi_reduction <add>, %150, %cst_182 [0] : vector<8x128xf32> to vector<128xf32>
    %152 = vector.shape_cast %151 : vector<128xf32> to vector<1x128xf32>
    %cst_183 = arith.constant 1.250000e-01 : f32
    %153 = vector.broadcast %cst_183 : f32 to vector<1x128xf32>
    %154 = arith.mulf %152, %153 : vector<1x128xf32>
    %155 = arith.mulf %150, %150 : vector<8x128xf32>
    %cst_184 = arith.constant dense<0.000000e+00> : vector<128xf32>
    %156 = vector.multi_reduction <add>, %155, %cst_184 [0] : vector<8x128xf32> to vector<128xf32>
    %157 = vector.shape_cast %156 : vector<128xf32> to vector<1x128xf32>
    %cst_185 = arith.constant 1.250000e-01 : f32
    %158 = vector.broadcast %cst_185 : f32 to vector<1x128xf32>
    %159 = arith.mulf %157, %158 : vector<1x128xf32>
    %160 = arith.mulf %154, %154 : vector<1x128xf32>
    %161 = arith.subf %159, %160 : vector<1x128xf32>
    %c1_186 = arith.constant 1 : index
    %c0_187 = arith.constant 0 : index
    %162 = vector.load %arg6[%c1_186, %c0_187] : memref<3x128xf32, #tpu.memory_space<vmem>>, vector<1x128xf32>
    %cst_188 = arith.constant 9.99999974E-6 : f32
    %163 = vector.broadcast %cst_188 : f32 to vector<1x128xf32>
    %164 = arith.addf %161, %163 : vector<1x128xf32>
    %165 = math.rsqrt %164 : vector<1x128xf32>
    %166 = arith.mulf %162, %165 : vector<1x128xf32>
    %c1_189 = arith.constant 1 : index
    %c0_190 = arith.constant 0 : index
    %167 = vector.load %arg7[%c1_189, %c0_190] : memref<3x128xf32, #tpu.memory_space<vmem>>, vector<1x128xf32>
    %168 = arith.mulf %154, %166 : vector<1x128xf32>
    %169 = arith.subf %167, %168 : vector<1x128xf32>
    %170 = vector.broadcast %166 : vector<1x128xf32> to vector<8x128xf32>
    %171 = arith.mulf %150, %170 : vector<8x128xf32>
    %172 = vector.broadcast %169 : vector<1x128xf32> to vector<8x128xf32>
    %173 = arith.addf %171, %172 : vector<8x128xf32>
    %cst_191 = arith.constant 0.000000e+00 : f32
    %174 = vector.broadcast %cst_191 : f32 to vector<8x128xf32>
    %175 = arith.maximumf %173, %174 : vector<8x128xf32>
    %176 = vector.shape_cast %175 : vector<8x128xf32> to vector<2x2x2x128xf32>
    %c0_192 = arith.constant 0 : index
    %c1_193 = arith.constant 1 : index
    %c1_194 = arith.constant 1 : index
    %c0_195 = arith.constant 0 : index
    %177 = vector.load %arg11[%c0_192, %c1_193, %c1_194, %c0_195] : memref<2x4x4x128xf32, #tpu.memory_space<vmem>>, vector<2x2x2x128xf32>
    tpu.vector_store %arg11[%c0_192, %c1_193, %c1_194, %c0_195], %176 {strides = array<i32>} : memref<2x4x4x128xf32, #tpu.memory_space<vmem>>, vector<2x2x2x128xf32>,
    %c0_196 = arith.constant 0 : index
    %c0_197 = arith.constant 0 : index
    %c0_198 = arith.constant 0 : index
    %c0_199 = arith.constant 0 : index
    %178 = vector.load %arg11[%c0_196, %c0_197, %c0_198, %c0_199] : memref<2x4x4x128xf32, #tpu.memory_space<vmem>>, vector<2x2x2x128xf32>
    %179 = vector.shape_cast %178 : vector<2x2x2x128xf32> to vector<8x128xf32>
    %c0_200 = arith.constant 0 : index
    %c0_201 = arith.constant 0 : index
    %c0_202 = arith.constant 0 : index
    %180 = vector.load %arg5[%c0_200, %c0_201, %c0_202] : memref<9x128x128xf32, #tpu.memory_space<vmem>>, vector<1x128x128xf32>
    %181 = vector.shape_cast %180 : vector<1x128x128xf32> to vector<128x128xf32>
    %cst_203 = arith.constant dense<0.000000e+00> : vector<8x128xf32>
    %182 = tpu.matmul %179, %181, %cst_203 {dimension_numbers = #tpu.dot_dimension_numbers<[1], [0], [0], [1], [0, 0, 1, 1], [], []>} : vector<8x128xf32>, vector<128x128xf32>, vector<8x128xf32> -> vector<8x128xf32>
    %c0_204 = arith.constant 0 : index
    %c0_205 = arith.constant 0 : index
    %c1_206 = arith.constant 1 : index
    %c0_207 = arith.constant 0 : index
    %183 = vector.load %arg11[%c0_204, %c0_205, %c1_206, %c0_207] : memref<2x4x4x128xf32, #tpu.memory_space<vmem>>, vector<2x2x2x128xf32>
    %184 = vector.shape_cast %183 : vector<2x2x2x128xf32> to vector<8x128xf32>
    %c1_208 = arith.constant 1 : index
    %c0_209 = arith.constant 0 : index
    %c0_210 = arith.constant 0 : index
    %185 = vector.load %arg5[%c1_208, %c0_209, %c0_210] : memref<9x128x128xf32, #tpu.memory_space<vmem>>, vector<1x128x128xf32>
    %186 = vector.shape_cast %185 : vector<1x128x128xf32> to vector<128x128xf32>
    %cst_211 = arith.constant dense<0.000000e+00> : vector<8x128xf32>
    %187 = tpu.matmul %184, %186, %cst_211 {dimension_numbers = #tpu.dot_dimension_numbers<[1], [0], [0], [1], [0, 0, 1, 1], [], []>} : vector<8x128xf32>, vector<128x128xf32>, vector<8x128xf32> -> vector<8x128xf32>
    %188 = arith.addf %182, %187 : vector<8x128xf32>
    %c0_212 = arith.constant 0 : index
    %c0_213 = arith.constant 0 : index
    %c2_214 = arith.constant 2 : index
    %c0_215 = arith.constant 0 : index
    %189 = vector.load %arg11[%c0_212, %c0_213, %c2_214, %c0_215] : memref<2x4x4x128xf32, #tpu.memory_space<vmem>>, vector<2x2x2x128xf32>
    %190 = vector.shape_cast %189 : vector<2x2x2x128xf32> to vector<8x128xf32>
    %c2_216 = arith.constant 2 : index
    %c0_217 = arith.constant 0 : index
    %c0_218 = arith.constant 0 : index
    %191 = vector.load %arg5[%c2_216, %c0_217, %c0_218] : memref<9x128x128xf32, #tpu.memory_space<vmem>>, vector<1x128x128xf32>
    %192 = vector.shape_cast %191 : vector<1x128x128xf32> to vector<128x128xf32>
    %cst_219 = arith.constant dense<0.000000e+00> : vector<8x128xf32>
    %193 = tpu.matmul %190, %192, %cst_219 {dimension_numbers = #tpu.dot_dimension_numbers<[1], [0], [0], [1], [0, 0, 1, 1], [], []>} : vector<8x128xf32>, vector<128x128xf32>, vector<8x128xf32> -> vector<8x128xf32>
    %194 = arith.addf %188, %193 : vector<8x128xf32>
    %c0_220 = arith.constant 0 : index
    %c1_221 = arith.constant 1 : index
    %c0_222 = arith.constant 0 : index
    %c0_223 = arith.constant 0 : index
    %195 = vector.load %arg11[%c0_220, %c1_221, %c0_222, %c0_223] : memref<2x4x4x128xf32, #tpu.memory_space<vmem>>, vector<2x2x2x128xf32>
    %196 = vector.shape_cast %195 : vector<2x2x2x128xf32> to vector<8x128xf32>
    %c3_224 = arith.constant 3 : index
    %c0_225 = arith.constant 0 : index
    %c0_226 = arith.constant 0 : index
    %197 = vector.load %arg5[%c3_224, %c0_225, %c0_226] : memref<9x128x128xf32, #tpu.memory_space<vmem>>, vector<1x128x128xf32>
    %198 = vector.shape_cast %197 : vector<1x128x128xf32> to vector<128x128xf32>
    %cst_227 = arith.constant dense<0.000000e+00> : vector<8x128xf32>
    %199 = tpu.matmul %196, %198, %cst_227 {dimension_numbers = #tpu.dot_dimension_numbers<[1], [0], [0], [1], [0, 0, 1, 1], [], []>} : vector<8x128xf32>, vector<128x128xf32>, vector<8x128xf32> -> vector<8x128xf32>
    %200 = arith.addf %194, %199 : vector<8x128xf32>
    %c0_228 = arith.constant 0 : index
    %c1_229 = arith.constant 1 : index
    %c1_230 = arith.constant 1 : index
    %c0_231 = arith.constant 0 : index
    %201 = vector.load %arg11[%c0_228, %c1_229, %c1_230, %c0_231] : memref<2x4x4x128xf32, #tpu.memory_space<vmem>>, vector<2x2x2x128xf32>
    %202 = vector.shape_cast %201 : vector<2x2x2x128xf32> to vector<8x128xf32>
    %c4_232 = arith.constant 4 : index
    %c0_233 = arith.constant 0 : index
    %c0_234 = arith.constant 0 : index
    %203 = vector.load %arg5[%c4_232, %c0_233, %c0_234] : memref<9x128x128xf32, #tpu.memory_space<vmem>>, vector<1x128x128xf32>
    %204 = vector.shape_cast %203 : vector<1x128x128xf32> to vector<128x128xf32>
    %cst_235 = arith.constant dense<0.000000e+00> : vector<8x128xf32>
    %205 = tpu.matmul %202, %204, %cst_235 {dimension_numbers = #tpu.dot_dimension_numbers<[1], [0], [0], [1], [0, 0, 1, 1], [], []>} : vector<8x128xf32>, vector<128x128xf32>, vector<8x128xf32> -> vector<8x128xf32>
    %206 = arith.addf %200, %205 : vector<8x128xf32>
    %c0_236 = arith.constant 0 : index
    %c1_237 = arith.constant 1 : index
    %c2_238 = arith.constant 2 : index
    %c0_239 = arith.constant 0 : index
    %207 = vector.load %arg11[%c0_236, %c1_237, %c2_238, %c0_239] : memref<2x4x4x128xf32, #tpu.memory_space<vmem>>, vector<2x2x2x128xf32>
    %208 = vector.shape_cast %207 : vector<2x2x2x128xf32> to vector<8x128xf32>
    %c5_240 = arith.constant 5 : index
    %c0_241 = arith.constant 0 : index
    %c0_242 = arith.constant 0 : index
    %209 = vector.load %arg5[%c5_240, %c0_241, %c0_242] : memref<9x128x128xf32, #tpu.memory_space<vmem>>, vector<1x128x128xf32>
    %210 = vector.shape_cast %209 : vector<1x128x128xf32> to vector<128x128xf32>
    %cst_243 = arith.constant dense<0.000000e+00> : vector<8x128xf32>
    %211 = tpu.matmul %208, %210, %cst_243 {dimension_numbers = #tpu.dot_dimension_numbers<[1], [0], [0], [1], [0, 0, 1, 1], [], []>} : vector<8x128xf32>, vector<128x128xf32>, vector<8x128xf32> -> vector<8x128xf32>
    %212 = arith.addf %206, %211 : vector<8x128xf32>
    %c0_244 = arith.constant 0 : index
    %c2_245 = arith.constant 2 : index
    %c0_246 = arith.constant 0 : index
    %c0_247 = arith.constant 0 : index
    %213 = vector.load %arg11[%c0_244, %c2_245, %c0_246, %c0_247] : memref<2x4x4x128xf32, #tpu.memory_space<vmem>>, vector<2x2x2x128xf32>
    %214 = vector.shape_cast %213 : vector<2x2x2x128xf32> to vector<8x128xf32>
    %c6_248 = arith.constant 6 : index
    %c0_249 = arith.constant 0 : index
    %c0_250 = arith.constant 0 : index
    %215 = vector.load %arg5[%c6_248, %c0_249, %c0_250] : memref<9x128x128xf32, #tpu.memory_space<vmem>>, vector<1x128x128xf32>
    %216 = vector.shape_cast %215 : vector<1x128x128xf32> to vector<128x128xf32>
    %cst_251 = arith.constant dense<0.000000e+00> : vector<8x128xf32>
    %217 = tpu.matmul %214, %216, %cst_251 {dimension_numbers = #tpu.dot_dimension_numbers<[1], [0], [0], [1], [0, 0, 1, 1], [], []>} : vector<8x128xf32>, vector<128x128xf32>, vector<8x128xf32> -> vector<8x128xf32>
    %218 = arith.addf %212, %217 : vector<8x128xf32>
    %c0_252 = arith.constant 0 : index
    %c2_253 = arith.constant 2 : index
    %c1_254 = arith.constant 1 : index
    %c0_255 = arith.constant 0 : index
    %219 = vector.load %arg11[%c0_252, %c2_253, %c1_254, %c0_255] : memref<2x4x4x128xf32, #tpu.memory_space<vmem>>, vector<2x2x2x128xf32>
    %220 = vector.shape_cast %219 : vector<2x2x2x128xf32> to vector<8x128xf32>
    %c7_256 = arith.constant 7 : index
    %c0_257 = arith.constant 0 : index
    %c0_258 = arith.constant 0 : index
    %221 = vector.load %arg5[%c7_256, %c0_257, %c0_258] : memref<9x128x128xf32, #tpu.memory_space<vmem>>, vector<1x128x128xf32>
    %222 = vector.shape_cast %221 : vector<1x128x128xf32> to vector<128x128xf32>
    %cst_259 = arith.constant dense<0.000000e+00> : vector<8x128xf32>
    %223 = tpu.matmul %220, %222, %cst_259 {dimension_numbers = #tpu.dot_dimension_numbers<[1], [0], [0], [1], [0, 0, 1, 1], [], []>} : vector<8x128xf32>, vector<128x128xf32>, vector<8x128xf32> -> vector<8x128xf32>
    %224 = arith.addf %218, %223 : vector<8x128xf32>
    %c0_260 = arith.constant 0 : index
    %c2_261 = arith.constant 2 : index
    %c2_262 = arith.constant 2 : index
    %c0_263 = arith.constant 0 : index
    %225 = vector.load %arg11[%c0_260, %c2_261, %c2_262, %c0_263] : memref<2x4x4x128xf32, #tpu.memory_space<vmem>>, vector<2x2x2x128xf32>
    %226 = vector.shape_cast %225 : vector<2x2x2x128xf32> to vector<8x128xf32>
    %c8_264 = arith.constant 8 : index
    %c0_265 = arith.constant 0 : index
    %c0_266 = arith.constant 0 : index
    %227 = vector.load %arg5[%c8_264, %c0_265, %c0_266] : memref<9x128x128xf32, #tpu.memory_space<vmem>>, vector<1x128x128xf32>
    %228 = vector.shape_cast %227 : vector<1x128x128xf32> to vector<128x128xf32>
    %cst_267 = arith.constant dense<0.000000e+00> : vector<8x128xf32>
    %229 = tpu.matmul %226, %228, %cst_267 {dimension_numbers = #tpu.dot_dimension_numbers<[1], [0], [0], [1], [0, 0, 1, 1], [], []>} : vector<8x128xf32>, vector<128x128xf32>, vector<8x128xf32> -> vector<8x128xf32>
    %230 = arith.addf %224, %229 : vector<8x128xf32>
    %cst_268 = arith.constant dense<0.000000e+00> : vector<128xf32>
    %231 = vector.multi_reduction <add>, %230, %cst_268 [0] : vector<8x128xf32> to vector<128xf32>
    %232 = vector.shape_cast %231 : vector<128xf32> to vector<1x128xf32>
    %cst_269 = arith.constant 1.250000e-01 : f32
    %233 = vector.broadcast %cst_269 : f32 to vector<1x128xf32>
    %234 = arith.mulf %232, %233 : vector<1x128xf32>
    %235 = arith.mulf %230, %230 : vector<8x128xf32>
    %cst_270 = arith.constant dense<0.000000e+00> : vector<128xf32>
    %236 = vector.multi_reduction <add>, %235, %cst_270 [0] : vector<8x128xf32> to vector<128xf32>
    %237 = vector.shape_cast %236 : vector<128xf32> to vector<1x128xf32>
    %cst_271 = arith.constant 1.250000e-01 : f32
    %238 = vector.broadcast %cst_271 : f32 to vector<1x128xf32>
    %239 = arith.mulf %237, %238 : vector<1x128xf32>
    %240 = arith.mulf %234, %234 : vector<1x128xf32>
    %241 = arith.subf %239, %240 : vector<1x128xf32>
    %c2_272 = arith.constant 2 : index
    %c0_273 = arith.constant 0 : index
    %242 = vector.load %arg6[%c2_272, %c0_273] : memref<3x128xf32, #tpu.memory_space<vmem>>, vector<1x128xf32>
    %cst_274 = arith.constant 9.99999974E-6 : f32
    %243 = vector.broadcast %cst_274 : f32 to vector<1x128xf32>
    %244 = arith.addf %241, %243 : vector<1x128xf32>
    %245 = math.rsqrt %244 : vector<1x128xf32>
    %246 = arith.mulf %242, %245 : vector<1x128xf32>
    %c2_275 = arith.constant 2 : index
    %c0_276 = arith.constant 0 : index
    %247 = vector.load %arg7[%c2_275, %c0_276] : memref<3x128xf32, #tpu.memory_space<vmem>>, vector<1x128xf32>
    %248 = arith.mulf %234, %246 : vector<1x128xf32>
    %249 = arith.subf %247, %248 : vector<1x128xf32>
    %250 = vector.broadcast %246 : vector<1x128xf32> to vector<8x128xf32>
    %251 = arith.mulf %230, %250 : vector<8x128xf32>
    %252 = vector.broadcast %249 : vector<1x128xf32> to vector<8x128xf32>
    %253 = arith.addf %251, %252 : vector<8x128xf32>
    %c0_277 = arith.constant 0 : index
    %c0_278 = arith.constant 0 : index
    %254 = vector.load %arg12[%c0_277, %c0_278] : memref<8x128xf32, #tpu.memory_space<vmem>>, vector<8x128xf32>
    %255 = arith.addf %253, %254 : vector<8x128xf32>
    %cst_279 = arith.constant 0.000000e+00 : f32
    %256 = vector.broadcast %cst_279 : f32 to vector<8x128xf32>
    %257 = arith.maximumf %255, %256 : vector<8x128xf32>
    %c0_280 = arith.constant 0 : index
    %c0_281 = arith.constant 0 : index
    %258 = vector.load %arg8[%c0_280, %c0_281] : memref<128x128xf32, #tpu.memory_space<vmem>>, vector<128x128xf32>
    %cst_282 = arith.constant dense<0.000000e+00> : vector<8x128xf32>
    %259 = tpu.matmul %257, %258, %cst_282 {dimension_numbers = #tpu.dot_dimension_numbers<[1], [0], [0], [1], [0, 0, 1, 1], [], []>} : vector<8x128xf32>, vector<128x128xf32>, vector<8x128xf32> -> vector<8x128xf32>
    %c0_283 = arith.constant 0 : index
    %c0_284 = arith.constant 0 : index
    %260 = vector.load %arg9[%c0_283, %c0_284] : memref<8x128xf32, #tpu.memory_space<vmem>>, vector<8x128xf32>
    %261 = arith.addf %259, %260 : vector<8x128xf32>
    %c0_285 = arith.constant 0 : index
    %c0_286 = arith.constant 0 : index
    %262 = vector.load %arg10[%c0_285, %c0_286] : memref<8x128xf32, #tpu.memory_space<vmem>>, vector<8x128xf32>
    tpu.vector_store %arg10[%c0_285, %c0_286], %261 {strides = array<i32>} : memref<8x128xf32, #tpu.memory_space<vmem>>, vector<8x128xf32>,
    return
  }
}

</mosaic_0001>

<bundles_post_ra>
// kernel: tpu_custom_call.1
= control target key start
LH: loop header
LB: loop body
LE: loop exit
PB: predicated region body
PF: predicated region fallthrough
CT: control target
= control target key end

     0   :  { %15 = vsyncpa [#allocation5], 0  ;;  %s6079_s0 = inlined_call_operand.hbm [shape: f32[2,2,2,3], index: 0, kind: input, shape index: {}]   ;;  %s6080_s1 = inlined_call_operand.hbm [shape: f32[3,128], index: 1, kind: input, shape index: {}]   ;;  %s6081_s2 = inlined_call_operand.hbm [shape: f32[1,128], index: 2, kind: input, shape index: {}]   ;;  %s6082_s3 = inlined_call_operand.hbm [shape: f32[9,128,128], index: 3, kind: input, shape index: {}]   ;;  %s6083_s4 = inlined_call_operand.hbm [shape: f32[9,128,128], index: 4, kind: input, shape index: {}]   ;;  %s6084_s5 = inlined_call_operand.hbm [shape: f32[9,128,128], index: 5, kind: input, shape index: {}]   ;;  %s6085_s6 = inlined_call_operand.vmem [shape: f32[3,128], index: 6, kind: input, shape index: {}]   ;;  %s6086_s7 = inlined_call_operand.vmem [shape: f32[3,128], index: 7, kind: input, shape index: {}]   ;;  %s6087_s8 = inlined_call_operand.hbm [shape: f32[128,128], index: 8, kind: input, shape index: {}]   ;;  %s6088_s9 = inlined_call_operand.vmem [shape: f32[8,128], index: 9, kind: input, shape index: {}]   ;;  %s6089_s10 = inlined_call_operand.hbm [shape: f32[8,128], index: 10, kind: output, shape index: {}]  }
   0x1   :  { %16 = vsyncpa [#allocation8], 0 }
   0x2   :  { %17 = vsyncpa [#allocation11], 0 }
   0x3   :  { %18 = vsyncpa [#allocation14], 0 }
   0x4   :  { %19 = vsyncpa [#allocation6], 0  ;;  %s5393_s13 = smov [#allocation7]   ;;  %s5394_s15 = smov [#allocation10]  }
   0x5   :  { %s38_s14 = sshll.u32 %s5393_s13, 4  ;;  %s57_s16 = sshll.u32 %s5394_s15, 4  ;;  %s39_s14 = int_to_ptr.vmem [resolvable:$true] %s38_s14  ;;  %s58_s16 = int_to_ptr.vmem [resolvable:$true] %s57_s16 }
   0x6   :  { %s5231_s17 = scalar_lea.vmem %s39_s14, 64  ;;  %p5236_p1 = scmp.lt.s32.totalorder %s39_s14, %s39_s14 }
   0x7   :  { %p5232_p0 = scmp.ne.s32.totalorder %s39_s14, %s5231_s17  ;;  %p5237_p2 = scmp.lt.s32.totalorder %s5231_s17, %s5231_s17 }
   0x9   :  { %p5238_p3 = por %p5237_p2, %p5236_p1 }
   0xb   :  { %p5239_p4 = pnand %p5238_p3, %p5232_p0 }
   0xd   :  { %5242 = shalt.err (!%p5239_p4)
}
   0xe   :  { %41 = dma.hbm_to_vmem [thread:$0]  %s6080_s1, 64, %s39_s14, [#allocation8]  }
   0xf   :  { %s5251_s20 = scalar_lea.vmem %s58_s16, 18432  ;;  %p5256_p6 = scmp.lt.s32.totalorder %s58_s16, %s58_s16 }
  0x10   :  { %p5252_p5 = scmp.ne.s32.totalorder %s58_s16, %s5251_s20  ;;  %p5257_p7 = scmp.lt.s32.totalorder %s5251_s20, %s5251_s20 }
  0x12   :  { %p5258_p8 = por %p5257_p7, %p5256_p6 }
  0x14   :  { %p5259_p9 = pnand %p5258_p8, %p5252_p5 }
  0x16   :  { %5262 = shalt.err (!%p5259_p9)
}
  0x17   :  { %s5395_s21 = smov 128   ;;  %s5396_s22 = smov 8  }
  0x18   :  { %63 = dma.hbm_to_vmem [thread:$0]  %s6082_s3, 18432, %s58_s16, [#allocation11], %s5395_s21, %s5395_s21, %s5396_s22  }
  0x19   :  { %s5397_s25 = smov [#allocation13]   ;;  %s5398_s27 = smov [#allocation4]  }
  0x1a   :  { %s81_s26 = sshll.u32 %s5397_s25, 4  ;;  %s25_s1 = sshll.u32 %s5398_s27, 4  ;;  %s82_s26 = int_to_ptr.vmem [resolvable:$true] %s81_s26  ;;  %s26_s1 = int_to_ptr.vmem [resolvable:$true] %s25_s1 }
  0x1b   :  { %s5271_s28 = scalar_lea.vmem %s82_s26, 18432  ;;  %p5276_p11 = scmp.lt.s32.totalorder %s82_s26, %s82_s26 }
  0x1c   :  { %p5272_p10 = scmp.ne.s32.totalorder %s82_s26, %s5271_s28  ;;  %p5277_p12 = scmp.lt.s32.totalorder %s5271_s28, %s5271_s28 }
  0x1e   :  { %p5278_p13 = por %p5277_p12, %p5276_p11 }
  0x20   :  { %p5279_p0 = pnand %p5278_p13, %p5272_p10 }
  0x22   :  { %5282 = shalt.err (!%p5279_p0)
}
  0x23   :  { %87 = dma.hbm_to_vmem [thread:$0]  %s6084_s5, 18432, %s82_s26, [#allocation14], %s5395_s21, %s5395_s21, %s5396_s22  }
  0x24   :  { %s5291_s3 = scalar_lea.vmem %s26_s1, 128  ;;  %p5296_p2 = scmp.lt.s32.totalorder %s26_s1, %s26_s1 }
  0x25   :  { %p5292_p1 = scmp.ne.s32.totalorder %s26_s1, %s5291_s3  ;;  %p5297_p3 = scmp.lt.s32.totalorder %s5291_s3, %s5291_s3 }
  0x27   :  { %p5298_p4 = por %p5297_p3, %p5296_p2 }
  0x29   :  { %p5299_p5 = pnand %p5298_p4, %p5292_p1 }
  0x2b   :  { %5302 = shalt.err (!%p5299_p5)
}
  0x2c   :  { %s5399_s11 = smov 32   ;;  %s5400_s12 = smov 2  }
  0x2d   :  { %31 = dma.hbm_to_vmem [thread:$0]  %s6079_s0, 128, %s26_s1, [#allocation5], %s5399_s11, %s5399_s11, %s5400_s12  }
  0x2e   :  { %s5401_s15 = smov [#allocation9]   ;;  %s5402_s17 = smov [#allocation12]  }
  0x2f   :  { %s48_s16 = sshll.u32 %s5401_s15, 4  ;;  %s69_s18 = sshll.u32 %s5402_s17, 4  ;;  %s49_s16 = int_to_ptr.vmem [resolvable:$true] %s48_s16  ;;  %s70_s18 = int_to_ptr.vmem [resolvable:$true] %s69_s18 }
  0x30   :  { %s5311_s5 = scalar_lea.vmem %s49_s16, 16  ;;  %s5315_s19 = scalar_lea.vmem %s49_s16, 32 }
  0x31   :  { %p5312_p6 = scmp.ne.s32.totalorder %s49_s16, %s5311_s5  ;;  %p5316_p7 = scmp.lt.s32.totalorder %s49_s16, %s49_s16 }
  0x32   :  { %p5317_p8 = scmp.lt.s32.totalorder %s5315_s19, %s5311_s5 }
  0x34   :  { %p5318_p9 = por %p5317_p8, %p5316_p7 }
  0x36   :  { %p5319_p10 = pnand %p5318_p9, %p5312_p6 }
  0x38   :  { %5322 = shalt.err (!%p5319_p10)
}
  0x39   :  { %51 = dma.hbm_to_vmem [thread:$0]  %s6081_s2, 16, %s49_s16, [#allocation8]  }
  0x3a   :  { %s5331_s24 = scalar_lea.vmem %s70_s18, 18432  ;;  %p5336_p12 = scmp.lt.s32.totalorder %s70_s18, %s70_s18 }
  0x3b   :  { %p5332_p11 = scmp.ne.s32.totalorder %s70_s18, %s5331_s24  ;;  %p5337_p13 = scmp.lt.s32.totalorder %s5331_s24, %s5331_s24 }
  0x3d   :  { %p5338_p0 = por %p5337_p13, %p5336_p12 }
  0x3f   :  { %p5339_p1 = pnand %p5338_p0, %p5332_p11 }
  0x41   :  { %5342 = shalt.err (!%p5339_p1)
}
  0x42   :  { %75 = dma.hbm_to_vmem [thread:$0]  %s6083_s4, 18432, %s70_s18, [#allocation11], %s5395_s21, %s5395_s21, %s5396_s22  }
  0x43   :  { %s5403_s26 = smov [#allocation15]  }
  0x44   :  { %s97_s27 = sshll.u32 %s5403_s26, 4  ;;  %s98_s27 = int_to_ptr.vmem [resolvable:$true] %s97_s27 }
  0x45   :  { %s5351_s1 = scalar_lea.vmem %s98_s27, 2048  ;;  %p5356_p3 = scmp.lt.s32.totalorder %s98_s27, %s98_s27 }
  0x46   :  { %p5352_p2 = scmp.ne.s32.totalorder %s98_s27, %s5351_s1  ;;  %p5357_p4 = scmp.lt.s32.totalorder %s5351_s1, %s5351_s1 }
  0x48   :  { %p5358_p5 = por %p5357_p4, %p5356_p3 }
  0x4a   :  { %p5359_p6 = pnand %p5358_p5, %p5352_p2 }
  0x4c   :  { %5362 = shalt.err (!%p5359_p6)
}
  0x4d   :  { %103 = dma.hbm_to_vmem [thread:$0]  %s6087_s8, 2048, %s98_s27, [#allocation14], %s5395_s21, %s5395_s21, %s5396_s22  }
  0x4e   :  { %5383 = dma.done.wait [#allocation5], 128  }
  0x4f   :  { %5384 = vsyncadd [#allocation5], 4294967168 }
  0x50   :  { %5385 = dma.done.wait [#allocation8], 80  }
  0x51   :  { %5386 = vsyncadd [#allocation8], 4294967216 }
  0x52   :  { %5387 = dma.done.wait [#allocation11], 36864  }
  0x53   :  { %5388 = vsyncadd [#allocation11], 4294930432 }
  0x54   :  { %5389 = dma.done.wait [#allocation14], 20480  }
  0x55   :  { %5390 = vsyncadd [#allocation14], 4294946816  ;;  %v148_v0 = vlaneseq  ;;  %v5404_v1 = vmov 0.0   ;;  %vm5405_vm0 = vmmov 0   ;;  %v5406_v2 = vmov 1983009808  }
  0x56   :  { %4109 = vmatprep.subr.mxu0 %v5404_v1  ;;  %237 = vst [vmem:[#allocation2] sm:$0xf] %v5404_v1  ;;  %238 = vst [vmem:[#allocation2 + $0x10] sm:$0xf] %v5404_v1  ;;  %4111 = vmatprep.mubr.msk.f32.mxu0 %vm5405_vm0, %v5404_v1  ;;  %v146_v3 = vunpack.c.l.s4 %v5406_v2  ;;  %vm163_vm1 = vcmask 1042432   ;;  %v326_v13 = vld [vmem:[#allocation10 + $0xf8] sm:$0xff] }
  0x57   :  { %240 = vst [vmem:[#allocation2 + $0xc] sm:$0xf] %v5404_v1  ;;  %241 = vst [vmem:[#allocation2 + $0x1c] sm:$0xf] %v5404_v1  ;;  %v5519_v4 = vshrl.u32 %v148_v0, 7  ;;  %4114 = vmatprep.subr.mxu1 %v5404_v1  ;;  %4146 = vmatprep.mubr.msk.f32.mxu1 %vm5405_vm0, %v5404_v1  ;;  %v325_v15 = vld [vmem:[#allocation10 + $0xf0] sm:$0xff] }
  0x58   :  { %243 = vst [vmem:[#allocation2 + $0x4] sm:$0x1] %v5404_v1  ;;  %244 = vst [vmem:[#allocation2 + $0x8] sm:$0x1] %v5404_v1  ;;  %v147_v5 = vunpack.c.0.s8 %v146_v3  ;;  %v131_v7 = vld [vmem:[#allocation7] sm:$0x7]  ;;  %4115 = vmatpush3.msra.mxu1 %v326_v13 }
  0x59   :  { %247 = vst [vmem:[#allocation2 + $0x14] sm:$0x1] %v5404_v1  ;;  %248 = vst [vmem:[#allocation2 + $0x18] sm:$0x1] %v5404_v1  ;;  %v127_v8 = vld [vmem:[#allocation4] sm:$0x3]  ;;  %4110 = vmatpush3.msk.msra.mxu0 %vm163_vm1, %v131_v7  ;;  %4116 = vmatprep.subr.mxu1 %v5404_v1 }
  0x5a   :  { %251 = vst [vmem:[#allocation2 + $0x7] sm:$0x1] %v5404_v1  ;;  %252 = vst [vmem:[#allocation2 + $0xb] sm:$0x1] %v5404_v1  ;;  %v5525_v6 = vsub.s32 %v147_v5, %v5519_v4  ;;  %v128_v9 = vld [vmem:[#allocation4 + $0x2] sm:$0x3]  ;;  %4149 = vmatprep.subr.mxu0 %v5404_v1  ;;  %4117 = vmatpush3.msra.mxu1 %v325_v15 }
  0x5b   :  { %255 = vst [vmem:[#allocation2 + $0x17] sm:$0x1] %v5404_v1  ;;  %256 = vst [vmem:[#allocation2 + $0x1b] sm:$0x1] %v5404_v1  ;;  %v129_v10 = vld [vmem:[#allocation4 + $0x4] sm:$0x3]  ;;  %v143_v12 = vcombine.low %v127_v8, %v128_v9  ;;  %4118 = vmatprep.subr.mxu1 %v5404_v1 }
  0x5c   :  { %242 = vst [vmem:[#allocation2] sm:$0x1] %v5404_v1  ;;  %245 = vst [vmem:[#allocation2 + $0xc] sm:$0x1] %v5404_v1  ;;  %v130_v11 = vld [vmem:[#allocation4 + $0x6] sm:$0x3] }
  0x5d   :  { %246 = vst [vmem:[#allocation2 + $0x10] sm:$0x1] %v5404_v1  ;;  %249 = vst [vmem:[#allocation2 + $0x1c] sm:$0x1] %v5404_v1  ;;  %v144_v14 = vcombine.low %v129_v10, %v130_v11  ;;  %v151_v16 = vrot.slane %v143_v12, %v5525_v6  ;;  %v324_v17 = vld [vmem:[#allocation10 + $0xe8] sm:$0xff]  ;;  %vm160_vm2 = vcmask 23552  }
  0x5e   :  { %250 = vst [vmem:[#allocation2 + $0x3] sm:$0x1] %v5404_v1  ;;  %253 = vst [vmem:[#allocation2 + $0xf] sm:$0x1] %v5404_v1  ;;  %v305_v19 = vld [vmem:[#allocation10 + $0x78] sm:$0xff]  ;;  %v323_v20 = vld [vmem:[#allocation10 + $0xe0] sm:$0xff]  ;;  %4119 = vmatpush3.msra.mxu1 %v324_v17 }
  0x5f   :  { %254 = vst [vmem:[#allocation2 + $0x13] sm:$0x1] %v5404_v1  ;;  %257 = vst [vmem:[#allocation2 + $0x1f] sm:$0x1] %v5404_v1  ;;  %v158_v18 = vrot.slane %v144_v14, %v5525_v6  ;;  %v322_v21 = vld [vmem:[#allocation10 + $0xd8] sm:$0xff]  ;;  %v304_v23 = vld [vmem:[#allocation10 + $0x70] sm:$0xff]  ;;  %4120 = vmatprep.subr.mxu1 %v5404_v1 }
  0x60   :  { %v321_v24 = vld [vmem:[#allocation10 + $0xd0] sm:$0xff]  ;;  %v303_v25 = vld [vmem:[#allocation10 + $0x68] sm:$0xff]  ;;  %4121 = vmatpush3.msra.mxu1 %v323_v20  ;;  %v302_v26 = vld [vmem:[#allocation10 + $0x60] sm:$0xff]  ;;  %s5407_s17 = smov [#allocation16]  }
  0x61   :  { %v159_v22 = vcombine.low %v151_v16, %v158_v18  ;;  %4122 = vmatprep.subr.mxu1 %v5404_v1  ;;  %v301_v27 = vld [vmem:[#allocation10 + $0x58] sm:$0xff]  ;;  %v300_v28 = vld [vmem:[#allocation10 + $0x50] sm:$0xff]  ;;  %v320_v29 = vld [vmem:[#allocation10 + $0xc8] sm:$0xff]  ;;  %s3610_s18 = sshll.u32 %s5407_s17, 4  ;;  %s3611_s18 = int_to_ptr.vmem [resolvable:$true] %s3610_s18 }
  0x62   :  { %4123 = vmatpush3.msra.mxu1 %v322_v21  ;;  %v299_v30 = vld [vmem:[#allocation10 + $0x48] sm:$0xff]  ;;  %v319_v31 = vld [vmem:[#allocation10 + $0xc0] sm:$0xff]  ;;  %v318_v33 = vld [vmem:[#allocation10 + $0xb8] sm:$0xff]  ;;  %p5368_p8 = scmp.lt.s32.totalorder %s3611_s18, %s3611_s18 }
  0x63   :  { %4112 = vmatmul.mubr.msk.f32.vlgmr.msra.gmra.mxu0 %vm160_vm2, %v159_v22  ;;  %4124 = vmatprep.subr.mxu1 %v5404_v1  ;;  %v298_v32 = vld [vmem:[#allocation10 + $0x40] sm:$0xff]  ;;  %v297_v34 = vld [vmem:[#allocation10 + $0x38] sm:$0xff]  ;;  %v317_v35 = vld [vmem:[#allocation10 + $0xb0] sm:$0xff] }
  0x64   :  { %4150 = vmatpush3.msra.mxu0 %v305_v19  ;;  %4125 = vmatpush3.msra.mxu1 %v321_v24  ;;  %v296_v36 = vld [vmem:[#allocation10 + $0x30] sm:$0xff]  ;;  %v316_v37 = vld [vmem:[#allocation10 + $0xa8] sm:$0xff]  ;;  %v315_v39 = vld [vmem:[#allocation10 + $0xa0] sm:$0xff] }
  0x65   :  { %4151 = vmatprep.subr.mxu0 %v5404_v1  ;;  %4126 = vmatprep.subr.mxu1 %v5404_v1  ;;  %v295_v38 = vld [vmem:[#allocation10 + $0x28] sm:$0xff]  ;;  %v294_v40 = vld [vmem:[#allocation10 + $0x20] sm:$0xff]  ;;  %v314_v41 = vld [vmem:[#allocation10 + $0x98] sm:$0xff] }
  0x66   :  { %4152 = vmatpush3.msra.mxu0 %v304_v23  ;;  %4181 = vmatprep.mubr.msk.f32.mxu0 %vm5405_vm0, %v5404_v1  ;;  %v293_v42 = vld [vmem:[#allocation10 + $0x18] sm:$0xff]  ;;  %v313_v43 = vld [vmem:[#allocation10 + $0x90] sm:$0xff]  ;;  %v312_v45 = vld [vmem:[#allocation10 + $0x88] sm:$0xff] }
  0x67   :  { %4153 = vmatprep.subr.mxu0 %v5404_v1  ;;  %4127 = vmatpush3.msra.mxu1 %v320_v29  ;;  %v292_v44 = vld [vmem:[#allocation10 + $0x10] sm:$0xff]  ;;  %v291_v46 = vld [vmem:[#allocation10 + $0x8] sm:$0xff]  ;;  %v311_v47 = vld [vmem:[#allocation10 + $0x80] sm:$0xff] }
  0x68   :  { %4154 = vmatpush3.msra.mxu0 %v303_v25  ;;  %4128 = vmatprep.subr.mxu1 %v5404_v1  ;;  %v290_v48 = vld [vmem:[#allocation10] sm:$0xff]  ;;  %v3622_v49 = vld [vmem:[#allocation9] ss:$0 sm:$0xff]  ;;  %v530_v5 = vld [vmem:[#allocation10 + $0x170] sm:$0xff] }
  0x69   :  { %4155 = vmatprep.subr.mxu0 %v5404_v1  ;;  %4129 = vmatpush3.msra.mxu1 %v319_v31  ;;  %v531_v0 = vld [vmem:[#allocation10 + $0x178] sm:$0xff]  ;;  %v644_v7 = vld [vmem:[#allocation10 + $0x1f0] sm:$0xff]  ;;  %v529_v8 = vld [vmem:[#allocation10 + $0x168] sm:$0xff] }
  0x6a   :  { %4156 = vmatpush3.msra.mxu0 %v302_v26  ;;  %4130 = vmatprep.subr.mxu1 %v5404_v1  ;;  %v645_v3 = vld [vmem:[#allocation10 + $0x1f8] sm:$0xff]  ;;  %v643_v9 = vld [vmem:[#allocation10 + $0x1e8] sm:$0xff]  ;;  %v528_v10 = vld [vmem:[#allocation10 + $0x160] sm:$0xff] }
  0x6b   :  { %4157 = vmatprep.subr.mxu0 %v5404_v1  ;;  %4131 = vmatpush3.msra.mxu1 %v318_v33  ;;  %v642_v11 = vld [vmem:[#allocation10 + $0x1e0] sm:$0xff]  ;;  %v527_v12 = vld [vmem:[#allocation10 + $0x158] sm:$0xff]  ;;  %v526_v14 = vld [vmem:[#allocation10 + $0x150] sm:$0xff] }
  0x6c   :  { %4158 = vmatpush3.msra.mxu0 %v301_v27  ;;  %4132 = vmatprep.subr.mxu1 %v5404_v1  ;;  %v641_v13 = vld [vmem:[#allocation10 + $0x1d8] sm:$0xff]  ;;  %v640_v15 = vld [vmem:[#allocation10 + $0x1d0] sm:$0xff]  ;;  %v525_v16 = vld [vmem:[#allocation10 + $0x148] sm:$0xff] }
  0x6d   :  { %4159 = vmatprep.subr.mxu0 %v5404_v1  ;;  %4133 = vmatpush3.msra.mxu1 %v317_v35  ;;  %v639_v17 = vld [vmem:[#allocation10 + $0x1c8] sm:$0xff]  ;;  %v524_v18 = vld [vmem:[#allocation10 + $0x140] sm:$0xff]  ;;  %v523_v20 = vld [vmem:[#allocation10 + $0x138] sm:$0xff] }
  0x6e   :  { %4160 = vmatpush3.msra.mxu0 %v300_v28  ;;  %4134 = vmatprep.subr.mxu1 %v5404_v1  ;;  %v638_v19 = vld [vmem:[#allocation10 + $0x1c0] sm:$0xff]  ;;  %v637_v21 = vld [vmem:[#allocation10 + $0x1b8] sm:$0xff]  ;;  %v522_v22 = vld [vmem:[#allocation10 + $0x130] sm:$0xff] }
  0x6f   :  { %4161 = vmatprep.subr.mxu0 %v5404_v1  ;;  %4135 = vmatpush3.msra.mxu1 %v316_v37  ;;  %v636_v23 = vld [vmem:[#allocation10 + $0x1b0] sm:$0xff]  ;;  %v521_v24 = vld [vmem:[#allocation10 + $0x128] sm:$0xff]  ;;  %v520_v26 = vld [vmem:[#allocation10 + $0x120] sm:$0xff] }
  0x70   :  { %4162 = vmatpush3.msra.mxu0 %v299_v30  ;;  %4136 = vmatprep.subr.mxu1 %v5404_v1  ;;  %v635_v25 = vld [vmem:[#allocation10 + $0x1a8] sm:$0xff]  ;;  %v634_v27 = vld [vmem:[#allocation10 + $0x1a0] sm:$0xff]  ;;  %v519_v28 = vld [vmem:[#allocation10 + $0x118] sm:$0xff] }
  0x71   :  { %4163 = vmatprep.subr.mxu0 %v5404_v1  ;;  %4137 = vmatpush3.msra.mxu1 %v315_v39  ;;  %v633_v29 = vld [vmem:[#allocation10 + $0x198] sm:$0xff]  ;;  %v518_v31 = vld [vmem:[#allocation10 + $0x110] sm:$0xff]  ;;  %v517_v35 = vld [vmem:[#allocation10 + $0x108] sm:$0xff] }
  0x72   :  { %4164 = vmatpush3.msra.mxu0 %v298_v32  ;;  %4138 = vmatprep.subr.mxu1 %v5404_v1  ;;  %v632_v33 = vld [vmem:[#allocation10 + $0x190] sm:$0xff]  ;;  %v631_v37 = vld [vmem:[#allocation10 + $0x188] sm:$0xff]  ;;  %v630_v39 = vld [vmem:[#allocation10 + $0x180] sm:$0xff] }
  0x73   :  { %4165 = vmatprep.subr.mxu0 %v5404_v1  ;;  %4139 = vmatpush3.msra.mxu1 %v314_v41 }
  0x74   :  { %4166 = vmatpush3.msra.mxu0 %v297_v34  ;;  %4140 = vmatprep.subr.mxu1 %v5404_v1 }
  0x75   :  { %4167 = vmatprep.subr.mxu0 %v5404_v1  ;;  %4141 = vmatpush3.msra.mxu1 %v313_v43  ;;  %v873_v43 = vld [vmem:[#allocation10 + $0x2f8] sm:$0xff] }
  0x76   :  { %4168 = vmatpush3.msra.mxu0 %v296_v36  ;;  %4142 = vmatprep.subr.mxu1 %v5404_v1 }
  0x77   :  { %4169 = vmatprep.subr.mxu0 %v5404_v1  ;;  %4143 = vmatpush3.msra.mxu1 %v312_v45  ;;  %v872_v45 = vld [vmem:[#allocation10 + $0x2f0] sm:$0xff] }
  0x78   :  { %4170 = vmatpush3.msra.mxu0 %v295_v38  ;;  %4144 = vmatprep.subr.mxu1 %v5404_v1  ;;  %v516_v38 = vld [vmem:[#allocation10 + $0x100] sm:$0xff] }
  0x79   :  { %4171 = vmatprep.subr.mxu0 %v5404_v1  ;;  %4145 = vmatpush3.msra.mxu1 %v311_v47  ;;  %v871_v47 = vld [vmem:[#allocation10 + $0x2e8] sm:$0xff] }
  0x7a   :  { %4172 = vmatpush3.msra.mxu0 %v294_v40  ;;  %4184 = vmatprep.subr.mxu1 %v5404_v1 }
  0x7b   :  { %4173 = vmatprep.subr.mxu0 %v5404_v1 }
  0x7c   :  { %4174 = vmatpush3.msra.mxu0 %v293_v42  ;;  %v759_v42 = vld [vmem:[#allocation10 + $0x278] sm:$0xff] }
  0x7d   :  { %4175 = vmatprep.subr.mxu0 %v5404_v1 }
  0x7e   :  { %4176 = vmatpush3.msra.mxu0 %v292_v44  ;;  %v758_v44 = vld [vmem:[#allocation10 + $0x270] sm:$0xff] }
  0x7f   :  { %4177 = vmatprep.subr.mxu0 %v5404_v1 }
  0x80   :  { %4178 = vmatpush3.msra.mxu0 %v291_v46  ;;  %v757_v46 = vld [vmem:[#allocation10 + $0x268] sm:$0xff] }
  0x81   :  { %4179 = vmatprep.subr.mxu0 %v5404_v1 }
  0x82   :  { %4180 = vmatpush3.msra.mxu0 %v290_v48  ;;  %v756_v48 = vld [vmem:[#allocation10 + $0x260] sm:$0xff] }
  0x83   :  { %4219 = vmatprep.subr.mxu0 %v5404_v1 }
 0x123   :  { %v233_v50 = vpop.f32.mrf.mxu0 }
 0x124   :  { %v234_v51 = vadd.f32 %v3622_v49, %v233_v50  ;;  %v870_v49 = vld [vmem:[#allocation10 + $0x2e0] sm:$0xff]  ;;  %v755_v50 = vld [vmem:[#allocation10 + $0x258] sm:$0xff] }
 0x125   :  { %v4113_v52 = vpop.f32.mrf.mxu0 }
 0x126   :  { %v258_v53 = vmax.f32 %v234_v51, 0.0  ;;  %v869_v51 = vld [vmem:[#allocation10 + $0x2d8] sm:$0xff]  ;;  %v754_v52 = vld [vmem:[#allocation10 + $0x250] sm:$0xff] }
 0x128   :  { %v260_v54 = vcombine.high %v258_v53, %v258_v53  ;;  %v267_v55 = vrot.slane %v258_v53, %v5525_v6  ;;  %3625 = vst.sshfl [vmem:[#allocation2 + $0x5] sm:$0x3 pattern:$0x76325410] %v258_v53  ;;  %v868_v53 = vld [vmem:[#allocation10 + $0x2d0] sm:$0xff] }
 0x12a   :  { %v274_v56 = vrot.slane %v260_v54, %v5525_v6  ;;  %v275_v57 = vcombine.high %v267_v55, %v267_v55  ;;  %3626 = vst.sshfl [vmem:[#allocation2 + $0x15] sm:$0x3 pattern:$0x76325410] %v260_v54  ;;  %v753_v54 = vld [vmem:[#allocation10 + $0x248] sm:$0xff] }
 0x12b   :  { %v867_v55 = vld [vmem:[#allocation10 + $0x2c8] sm:$0xff] }
 0x12c   :  { %v276_v58 = vcombine.high %v274_v56, %v274_v56  ;;  %283 = vst [vmem:[#allocation2 + $0x9] sm:$0x3] %v275_v57  ;;  %v752_v56 = vld [vmem:[#allocation10 + $0x240] sm:$0xff] }
 0x12d   :  { %v866_v57 = vld [vmem:[#allocation10 + $0x2c0] sm:$0xff] }
 0x12e   :  { %285 = vst [vmem:[#allocation2 + $0x19] sm:$0x3] %v276_v58  ;;  %v751_v58 = vld [vmem:[#allocation10 + $0x238] sm:$0xff] }
 0x12f   :  { %v5169_v59 = vld.sshfl [vmem:[#allocation2 + $0x1] sm:$0xf pattern:$0x76325410] }
 0x130   :  { %v5171_v60 = vld.sshfl [vmem:[#allocation2] sm:$0xf pattern:$0x76325410] }
 0x131   :  { %v5170_v61 = vld.sshfl [vmem:[#allocation2 + $0x11] sm:$0xf pattern:$0x76325410] }
 0x132   :  { %v5172_v62 = vld.sshfl [vmem:[#allocation2 + $0x10] sm:$0xf pattern:$0x76325410]  ;;  %v347_v63 = vcombine.low %v5169_v59, %v5170_v61  ;;  %v865_v59 = vld [vmem:[#allocation10 + $0x2b8] sm:$0xff]  ;;  %v864_v61 = vld [vmem:[#allocation10 + $0x2b0] sm:$0xff] }
 0x133   :  { %v439_v2 = vcombine.low %v5171_v60, %v5172_v62  ;;  %v5173_v30 = vld.sshfl [vmem:[#allocation2 + $0x12] sm:$0xf pattern:$0x76325410]  ;;  %v750_v60 = vld [vmem:[#allocation10 + $0x230] sm:$0xff] }
 0x134   :  { %4147 = vmatmul.mubr.f32.vlgmr.msra.gmra.mxu1 %v347_v63  ;;  %v5175_v34 = vld.sshfl [vmem:[#allocation2 + $0x2] sm:$0xf pattern:$0x76325410]  ;;  %v749_v62 = vld [vmem:[#allocation10 + $0x228] sm:$0xff] }
 0x135   :  { %4182 = vmatmul.mubr.f32.vlgmr.msra.gmra.mxu0 %v439_v2  ;;  %4185 = vmatpush3.msra.mxu1 %v531_v0  ;;  %v5174_v32 = vld.sshfl [vmem:[#allocation2 + $0x14] sm:$0xf pattern:$0x76325410]  ;;  %v552_v40 = vcombine.low %v5175_v34, %v5173_v30  ;;  %v1097_v30 = vld [vmem:[#allocation10 + $0x3d0] sm:$0xff] }
 0x136   :  { %4220 = vmatpush3.msra.mxu0 %v645_v3  ;;  %4186 = vmatprep.subr.mxu1 %v5404_v1  ;;  %v5176_v36 = vld.sshfl [vmem:[#allocation2 + $0x4] sm:$0xf pattern:$0x76325410]  ;;  %v863_v63 = vld [vmem:[#allocation10 + $0x2a8] sm:$0xff]  ;;  %v748_v0 = vld [vmem:[#allocation10 + $0x220] sm:$0xff] }
 0x137   :  { %4221 = vmatprep.subr.mxu0 %v5404_v1  ;;  %4187 = vmatpush3.msra.mxu1 %v530_v5  ;;  %v666_v41 = vcombine.low %v5176_v36, %v5174_v32  ;;  %v862_v2 = vld [vmem:[#allocation10 + $0x2a0] sm:$0xff]  ;;  %v747_v3 = vld [vmem:[#allocation10 + $0x218] sm:$0xff]  ;;  %v1096_v32 = vld [vmem:[#allocation10 + $0x3c8] sm:$0xff] }
 0x138   :  { %4222 = vmatpush3.msra.mxu0 %v644_v7  ;;  %4188 = vmatprep.subr.mxu1 %v5404_v1  ;;  %v861_v5 = vld [vmem:[#allocation10 + $0x298] sm:$0xff]  ;;  %v5177_v7 = vld.sshfl [vmem:[#allocation2 + $0x15] sm:$0xf pattern:$0x76325410] }
 0x139   :  { %4223 = vmatprep.subr.mxu0 %v5404_v1  ;;  %4189 = vmatpush3.msra.mxu1 %v529_v8  ;;  %v746_v8 = vld [vmem:[#allocation10 + $0x210] sm:$0xff]  ;;  %v1095_v34 = vld [vmem:[#allocation10 + $0x3c0] sm:$0xff]  ;;  %v1094_v36 = vld [vmem:[#allocation10 + $0x3b8] sm:$0xff] }
 0x13a   :  { %4224 = vmatpush3.msra.mxu0 %v643_v9  ;;  %4190 = vmatprep.subr.mxu1 %v5404_v1  ;;  %v5178_v9 = vld.sshfl [vmem:[#allocation2 + $0x16] sm:$0xf pattern:$0x76325410] }
 0x13b   :  { %4225 = vmatprep.subr.mxu0 %v5404_v1  ;;  %4191 = vmatpush3.msra.mxu1 %v528_v10  ;;  %v860_v10 = vld [vmem:[#allocation10 + $0x290] sm:$0xff] }
 0x13c   :  { %4226 = vmatpush3.msra.mxu0 %v642_v11  ;;  %4192 = vmatprep.subr.mxu1 %v5404_v1  ;;  %v5179_v11 = vld.sshfl [vmem:[#allocation2 + $0x5] sm:$0xf pattern:$0x76325410] }
 0x13d   :  { %4227 = vmatprep.subr.mxu0 %v5404_v1  ;;  %4193 = vmatpush3.msra.mxu1 %v527_v12  ;;  %v745_v12 = vld [vmem:[#allocation10 + $0x208] sm:$0xff] }
 0x13e   :  { %4228 = vmatpush3.msra.mxu0 %v641_v13  ;;  %4194 = vmatprep.subr.mxu1 %v5404_v1  ;;  %v5180_v13 = vld.sshfl [vmem:[#allocation2 + $0x6] sm:$0xf pattern:$0x76325410] }
 0x13f   :  { %4229 = vmatprep.subr.mxu0 %v5404_v1  ;;  %4195 = vmatpush3.msra.mxu1 %v526_v14  ;;  %v859_v14 = vld [vmem:[#allocation10 + $0x288] sm:$0xff] }
 0x140   :  { %4230 = vmatpush3.msra.mxu0 %v640_v15  ;;  %4196 = vmatprep.subr.mxu1 %v5404_v1  ;;  %v744_v15 = vld [vmem:[#allocation10 + $0x200] sm:$0xff] }
 0x141   :  { %4231 = vmatprep.subr.mxu0 %v5404_v1  ;;  %4197 = vmatpush3.msra.mxu1 %v525_v16  ;;  %v858_v16 = vld [vmem:[#allocation10 + $0x280] sm:$0xff] }
 0x142   :  { %4232 = vmatpush3.msra.mxu0 %v639_v17  ;;  %4198 = vmatprep.subr.mxu1 %v5404_v1  ;;  %v780_v17 = vcombine.low %v5179_v11, %v5177_v7  ;;  %v1205_v7 = vld [vmem:[#allocation10 + $0x420] sm:$0xff] }
 0x143   :  { %4233 = vmatprep.subr.mxu0 %v5404_v1  ;;  %4199 = vmatpush3.msra.mxu1 %v524_v18  ;;  %v894_v18 = vcombine.low %v5180_v13, %v5178_v9  ;;  %v5185_v9 = vld.sshfl [vmem:[#allocation2 + $0x1a] sm:$0xf pattern:$0x76325410]  ;;  %v1201_v13 = vld [vmem:[#allocation10 + $0x400] sm:$0xff] }
 0x144   :  { %4234 = vmatpush3.msra.mxu0 %v638_v19  ;;  %4200 = vmatprep.subr.mxu1 %v5404_v1  ;;  %v988_v19 = vld [vmem:[#allocation10 + $0x378] sm:$0xff] }
 0x145   :  { %4235 = vmatprep.subr.mxu0 %v5404_v1  ;;  %4201 = vmatpush3.msra.mxu1 %v523_v20  ;;  %v1102_v20 = vld [vmem:[#allocation10 + $0x3f8] sm:$0xff] }
 0x146   :  { %4236 = vmatpush3.msra.mxu0 %v637_v21  ;;  %4202 = vmatprep.subr.mxu1 %v5404_v1  ;;  %v987_v21 = vld [vmem:[#allocation10 + $0x370] sm:$0xff]  ;;  %v5186_v11 = vld.sshfl [vmem:[#allocation2 + $0xa] sm:$0xf pattern:$0x76325410] }
 0x147   :  { %4237 = vmatprep.subr.mxu0 %v5404_v1  ;;  %4203 = vmatpush3.msra.mxu1 %v522_v22  ;;  %v1101_v22 = vld [vmem:[#allocation10 + $0x3f0] sm:$0xff] }
 0x148   :  { %4238 = vmatpush3.msra.mxu0 %v636_v23  ;;  %4204 = vmatprep.subr.mxu1 %v5404_v1  ;;  %v986_v23 = vld [vmem:[#allocation10 + $0x368] sm:$0xff] }
 0x149   :  { %4239 = vmatprep.subr.mxu0 %v5404_v1  ;;  %4205 = vmatpush3.msra.mxu1 %v521_v24  ;;  %v1100_v24 = vld [vmem:[#allocation10 + $0x3e8] sm:$0xff] }
 0x14a   :  { %4240 = vmatpush3.msra.mxu0 %v635_v25  ;;  %4206 = vmatprep.subr.mxu1 %v5404_v1  ;;  %v985_v25 = vld [vmem:[#allocation10 + $0x360] sm:$0xff] }
 0x14b   :  { %4241 = vmatprep.subr.mxu0 %v5404_v1  ;;  %4207 = vmatpush3.msra.mxu1 %v520_v26  ;;  %v1099_v26 = vld [vmem:[#allocation10 + $0x3e0] sm:$0xff] }
 0x14c   :  { %4242 = vmatpush3.msra.mxu0 %v634_v27  ;;  %4208 = vmatprep.subr.mxu1 %v5404_v1  ;;  %v984_v27 = vld [vmem:[#allocation10 + $0x358] sm:$0xff] }
 0x14d   :  { %4243 = vmatprep.subr.mxu0 %v5404_v1  ;;  %4209 = vmatpush3.msra.mxu1 %v519_v28  ;;  %v1098_v28 = vld [vmem:[#allocation10 + $0x3d8] sm:$0xff] }
 0x14e   :  { %4244 = vmatpush3.msra.mxu0 %v633_v29  ;;  %4210 = vmatprep.subr.mxu1 %v5404_v1  ;;  %v983_v29 = vld [vmem:[#allocation10 + $0x350] sm:$0xff] }
 0x14f   :  { %4245 = vmatprep.subr.mxu0 %v5404_v1  ;;  %4211 = vmatpush3.msra.mxu1 %v518_v31  ;;  %v982_v31 = vld [vmem:[#allocation10 + $0x348] sm:$0xff] }
 0x150   :  { %4246 = vmatpush3.msra.mxu0 %v632_v33  ;;  %4212 = vmatprep.subr.mxu1 %v5404_v1  ;;  %v981_v33 = vld [vmem:[#allocation10 + $0x340] sm:$0xff] }
 0x151   :  { %4247 = vmatprep.subr.mxu0 %v5404_v1  ;;  %4213 = vmatpush3.msra.mxu1 %v517_v35  ;;  %v980_v35 = vld [vmem:[#allocation10 + $0x338] sm:$0xff] }
 0x152   :  { %4248 = vmatpush3.msra.mxu0 %v631_v37  ;;  %4214 = vmatprep.subr.mxu1 %v5404_v1  ;;  %v979_v37 = vld [vmem:[#allocation10 + $0x330] sm:$0xff] }
 0x153   :  { %4249 = vmatprep.subr.mxu0 %v5404_v1  ;;  %4215 = vmatpush3.msra.mxu1 %v516_v38  ;;  %v1093_v38 = vld [vmem:[#allocation10 + $0x3b0] sm:$0xff] }
 0x154   :  { %4216 = vmatprep.mubr.msk.f32.mxu1 %vm5405_vm0, %v5404_v1  ;;  %4250 = vmatpush3.msra.mxu0 %v630_v39  ;;  %v978_v39 = vld [vmem:[#allocation10 + $0x328] sm:$0xff] }
 0x155   :  { %4251 = vmatprep.mubr.msk.f32.mxu0 %vm5405_vm0, %v5404_v1  ;;  %4217 = vmatmul.mubr.f32.vlgmr.msra.gmra.mxu1 %v552_v40  ;;  %v1092_v40 = vld [vmem:[#allocation10 + $0x3a8] sm:$0xff] }
 0x156   :  { %4252 = vmatmul.mubr.f32.vlgmr.msra.gmra.mxu0 %v666_v41  ;;  %4254 = vmatprep.subr.mxu1 %v5404_v1  ;;  %v977_v41 = vld [vmem:[#allocation10 + $0x320] sm:$0xff] }
 0x157   :  { %4289 = vmatprep.subr.mxu0 %v5404_v1  ;;  %4255 = vmatpush3.msra.mxu1 %v759_v42  ;;  %v1091_v42 = vld [vmem:[#allocation10 + $0x3a0] sm:$0xff] }
 0x158   :  { %4290 = vmatpush3.msra.mxu0 %v873_v43  ;;  %4256 = vmatprep.subr.mxu1 %v5404_v1  ;;  %v976_v43 = vld [vmem:[#allocation10 + $0x318] sm:$0xff] }
 0x159   :  { %4291 = vmatprep.subr.mxu0 %v5404_v1  ;;  %4257 = vmatpush3.msra.mxu1 %v758_v44  ;;  %v1090_v44 = vld [vmem:[#allocation10 + $0x398] sm:$0xff] }
 0x15a   :  { %4292 = vmatpush3.msra.mxu0 %v872_v45  ;;  %4258 = vmatprep.subr.mxu1 %v5404_v1  ;;  %v5181_v45 = vld.sshfl [vmem:[#allocation2 + $0x18] sm:$0xf pattern:$0x76325410] }
 0x15b   :  { %4293 = vmatprep.subr.mxu0 %v5404_v1  ;;  %4259 = vmatpush3.msra.mxu1 %v757_v46  ;;  %v975_v46 = vld [vmem:[#allocation10 + $0x310] sm:$0xff] }
 0x15c   :  { %4294 = vmatpush3.msra.mxu0 %v871_v47  ;;  %4260 = vmatprep.subr.mxu1 %v5404_v1  ;;  %v5182_v47 = vld.sshfl [vmem:[#allocation2 + $0x19] sm:$0xf pattern:$0x76325410] }
 0x15d   :  { %4295 = vmatprep.subr.mxu0 %v5404_v1  ;;  %4261 = vmatpush3.msra.mxu1 %v756_v48  ;;  %v1089_v48 = vld [vmem:[#allocation10 + $0x390] sm:$0xff] }
 0x15e   :  { %4296 = vmatpush3.msra.mxu0 %v870_v49  ;;  %4262 = vmatprep.subr.mxu1 %v5404_v1  ;;  %v5183_v49 = vld.sshfl [vmem:[#allocation2 + $0x8] sm:$0xf pattern:$0x76325410] }
 0x15f   :  { %4297 = vmatprep.subr.mxu0 %v5404_v1  ;;  %4263 = vmatpush3.msra.mxu1 %v755_v50  ;;  %v974_v50 = vld [vmem:[#allocation10 + $0x308] sm:$0xff] }
 0x160   :  { %4298 = vmatpush3.msra.mxu0 %v869_v51  ;;  %4264 = vmatprep.subr.mxu1 %v5404_v1  ;;  %v5184_v51 = vld.sshfl [vmem:[#allocation2 + $0x9] sm:$0xf pattern:$0x76325410] }
 0x161   :  { %4299 = vmatprep.subr.mxu0 %v5404_v1  ;;  %4265 = vmatpush3.msra.mxu1 %v754_v52  ;;  %v1088_v52 = vld [vmem:[#allocation10 + $0x388] sm:$0xff] }
 0x162   :  { %4300 = vmatpush3.msra.mxu0 %v868_v53  ;;  %4266 = vmatprep.subr.mxu1 %v5404_v1  ;;  %v973_v53 = vld [vmem:[#allocation10 + $0x300] sm:$0xff] }
 0x163   :  { %4301 = vmatprep.subr.mxu0 %v5404_v1  ;;  %4267 = vmatpush3.msra.mxu1 %v753_v54  ;;  %v1087_v54 = vld [vmem:[#allocation10 + $0x380] sm:$0xff] }
 0x164   :  { %4302 = vmatpush3.msra.mxu0 %v867_v55  ;;  %4268 = vmatprep.subr.mxu1 %v5404_v1  ;;  %v1009_v55 = vcombine.low %v5183_v49, %v5181_v45  ;;  %v1382_v45 = vld [vmem:[#allocation12 + $0x30] sm:$0xff]  ;;  %v1380_v49 = vld [vmem:[#allocation12 + $0x20] sm:$0xff] }
 0x165   :  { %4303 = vmatprep.subr.mxu0 %v5404_v1  ;;  %4269 = vmatpush3.msra.mxu1 %v752_v56  ;;  %v1123_v56 = vcombine.low %v5184_v51, %v5182_v47  ;;  %v1381_v47 = vld [vmem:[#allocation12 + $0x28] sm:$0xff]  ;;  %v1379_v51 = vld [vmem:[#allocation12 + $0x18] sm:$0xff] }
 0x166   :  { %4304 = vmatpush3.msra.mxu0 %v866_v57  ;;  %4270 = vmatprep.subr.mxu1 %v5404_v1  ;;  %v1216_v57 = vld [vmem:[#allocation10 + $0x478] sm:$0xff] }
 0x167   :  { %4305 = vmatprep.subr.mxu0 %v5404_v1  ;;  %4271 = vmatpush3.msra.mxu1 %v751_v58  ;;  %v1215_v58 = vld [vmem:[#allocation10 + $0x470] sm:$0xff] }
 0x168   :  { %4306 = vmatpush3.msra.mxu0 %v865_v59  ;;  %4272 = vmatprep.subr.mxu1 %v5404_v1  ;;  %v1214_v59 = vld [vmem:[#allocation10 + $0x468] sm:$0xff] }
 0x169   :  { %4307 = vmatprep.subr.mxu0 %v5404_v1  ;;  %4273 = vmatpush3.msra.mxu1 %v750_v60  ;;  %v1213_v60 = vld [vmem:[#allocation10 + $0x460] sm:$0xff] }
 0x16a   :  { %4308 = vmatpush3.msra.mxu0 %v864_v61  ;;  %4274 = vmatprep.subr.mxu1 %v5404_v1  ;;  %v1212_v61 = vld [vmem:[#allocation10 + $0x458] sm:$0xff] }
 0x16b   :  { %4309 = vmatprep.subr.mxu0 %v5404_v1  ;;  %4275 = vmatpush3.msra.mxu1 %v749_v62  ;;  %v1211_v62 = vld [vmem:[#allocation10 + $0x450] sm:$0xff] }
 0x16c   :  { %4310 = vmatpush3.msra.mxu0 %v863_v63  ;;  %4276 = vmatprep.subr.mxu1 %v5404_v1  ;;  %v1210_v63 = vld [vmem:[#allocation10 + $0x448] sm:$0xff] }
 0x16d   :  { %4311 = vmatprep.subr.mxu0 %v5404_v1  ;;  %4277 = vmatpush3.msra.mxu1 %v748_v0  ;;  %v1209_v0 = vld [vmem:[#allocation10 + $0x440] sm:$0xff] }
 0x16e   :  { %4312 = vmatpush3.msra.mxu0 %v862_v2  ;;  %4278 = vmatprep.subr.mxu1 %v5404_v1  ;;  %v1208_v2 = vld [vmem:[#allocation10 + $0x438] sm:$0xff] }
 0x16f   :  { %4313 = vmatprep.subr.mxu0 %v5404_v1  ;;  %4279 = vmatpush3.msra.mxu1 %v747_v3  ;;  %v1207_v3 = vld [vmem:[#allocation10 + $0x430] sm:$0xff] }
 0x170   :  { %4314 = vmatpush3.msra.mxu0 %v861_v5  ;;  %4280 = vmatprep.subr.mxu1 %v5404_v1  ;;  %v1206_v5 = vld [vmem:[#allocation10 + $0x428] sm:$0xff] }
 0x171   :  { %4315 = vmatprep.subr.mxu0 %v5404_v1  ;;  %4281 = vmatpush3.msra.mxu1 %v746_v8  ;;  %v1204_v8 = vld [vmem:[#allocation10 + $0x418] sm:$0xff] }
 0x172   :  { %4316 = vmatpush3.msra.mxu0 %v860_v10  ;;  %4282 = vmatprep.subr.mxu1 %v5404_v1  ;;  %v1203_v10 = vld [vmem:[#allocation10 + $0x410] sm:$0xff] }
 0x173   :  { %4317 = vmatprep.subr.mxu0 %v5404_v1  ;;  %4283 = vmatpush3.msra.mxu1 %v745_v12  ;;  %v1202_v12 = vld [vmem:[#allocation10 + $0x408] sm:$0xff] }
 0x174   :  { %4318 = vmatpush3.msra.mxu0 %v859_v14  ;;  %4284 = vmatprep.subr.mxu1 %v5404_v1  ;;  %v1237_v14 = vcombine.low %v5186_v11, %v5185_v9 }
 0x175   :  { %4319 = vmatprep.subr.mxu0 %v5404_v1  ;;  %4285 = vmatpush3.msra.mxu1 %v744_v15 }
 0x176   :  { %4286 = vmatprep.mubr.msk.f32.mxu1 %vm5405_vm0, %v5404_v1  ;;  %4320 = vmatpush3.msra.mxu0 %v858_v16 }
 0x177   :  { %4321 = vmatprep.mubr.msk.f32.mxu0 %vm5405_vm0, %v5404_v1  ;;  %4287 = vmatmul.mubr.f32.vlgmr.msra.gmra.mxu1 %v780_v17 }
 0x178   :  { %4322 = vmatmul.mubr.f32.vlgmr.msra.gmra.mxu0 %v894_v18  ;;  %4324 = vmatprep.subr.mxu1 %v5404_v1 }
 0x179   :  { %4359 = vmatprep.subr.mxu0 %v5404_v1  ;;  %4325 = vmatpush3.msra.mxu1 %v988_v19 }
 0x17a   :  { %4360 = vmatpush3.msra.mxu0 %v1102_v20  ;;  %4326 = vmatprep.subr.mxu1 %v5404_v1 }
 0x17b   :  { %4361 = vmatprep.subr.mxu0 %v5404_v1  ;;  %4327 = vmatpush3.msra.mxu1 %v987_v21 }
 0x17c   :  { %4362 = vmatpush3.msra.mxu0 %v1101_v22  ;;  %4328 = vmatprep.subr.mxu1 %v5404_v1 }
 0x17d   :  { %4363 = vmatprep.subr.mxu0 %v5404_v1  ;;  %4329 = vmatpush3.msra.mxu1 %v986_v23 }
 0x17e   :  { %4364 = vmatpush3.msra.mxu0 %v1100_v24  ;;  %4330 = vmatprep.subr.mxu1 %v5404_v1 }
 0x17f   :  { %4365 = vmatprep.subr.mxu0 %v5404_v1  ;;  %4331 = vmatpush3.msra.mxu1 %v985_v25 }
 0x180   :  { %4366 = vmatpush3.msra.mxu0 %v1099_v26  ;;  %4332 = vmatprep.subr.mxu1 %v5404_v1  ;;  %v1412_v26 = vld [vmem:[#allocation12 + $0xf8] sm:$0xff] }
 0x181   :  { %4367 = vmatprep.subr.mxu0 %v5404_v1  ;;  %4333 = vmatpush3.msra.mxu1 %v984_v27  ;;  %v1391_v27 = vld [vmem:[#allocation12 + $0x78] sm:$0xff] }
 0x182   :  { %4368 = vmatpush3.msra.mxu0 %v1098_v28  ;;  %4334 = vmatprep.subr.mxu1 %v5404_v1  ;;  %v1411_v28 = vld [vmem:[#allocation12 + $0xf0] sm:$0xff] }
 0x183   :  { %4369 = vmatprep.subr.mxu0 %v5404_v1  ;;  %4335 = vmatpush3.msra.mxu1 %v983_v29  ;;  %v1390_v29 = vld [vmem:[#allocation12 + $0x70] sm:$0xff] }
 0x184   :  { %4370 = vmatpush3.msra.mxu0 %v1097_v30  ;;  %4336 = vmatprep.subr.mxu1 %v5404_v1  ;;  %v1410_v30 = vld [vmem:[#allocation12 + $0xe8] sm:$0xff] }
 0x185   :  { %4371 = vmatprep.subr.mxu0 %v5404_v1  ;;  %4337 = vmatpush3.msra.mxu1 %v982_v31  ;;  %v1389_v31 = vld [vmem:[#allocation12 + $0x68] sm:$0xff] }
 0x186   :  { %4372 = vmatpush3.msra.mxu0 %v1096_v32  ;;  %4338 = vmatprep.subr.mxu1 %v5404_v1  ;;  %v1409_v32 = vld [vmem:[#allocation12 + $0xe0] sm:$0xff] }
 0x187   :  { %4373 = vmatprep.subr.mxu0 %v5404_v1  ;;  %4339 = vmatpush3.msra.mxu1 %v981_v33  ;;  %v1388_v33 = vld [vmem:[#allocation12 + $0x60] sm:$0xff] }
 0x188   :  { %4374 = vmatpush3.msra.mxu0 %v1095_v34  ;;  %4340 = vmatprep.subr.mxu1 %v5404_v1  ;;  %v1408_v34 = vld [vmem:[#allocation12 + $0xd8] sm:$0xff] }
 0x189   :  { %4375 = vmatprep.subr.mxu0 %v5404_v1  ;;  %4341 = vmatpush3.msra.mxu1 %v980_v35  ;;  %v1387_v35 = vld [vmem:[#allocation12 + $0x58] sm:$0xff] }
 0x18a   :  { %4376 = vmatpush3.msra.mxu0 %v1094_v36  ;;  %4342 = vmatprep.subr.mxu1 %v5404_v1  ;;  %v1407_v36 = vld [vmem:[#allocation12 + $0xd0] sm:$0xff] }
 0x18b   :  { %4377 = vmatprep.subr.mxu0 %v5404_v1  ;;  %4343 = vmatpush3.msra.mxu1 %v979_v37  ;;  %v1386_v37 = vld [vmem:[#allocation12 + $0x50] sm:$0xff] }
 0x18c   :  { %4378 = vmatpush3.msra.mxu0 %v1093_v38  ;;  %4344 = vmatprep.subr.mxu1 %v5404_v1  ;;  %v1406_v38 = vld [vmem:[#allocation12 + $0xc8] sm:$0xff] }
 0x18d   :  { %4379 = vmatprep.subr.mxu0 %v5404_v1  ;;  %4345 = vmatpush3.msra.mxu1 %v978_v39  ;;  %v1385_v39 = vld [vmem:[#allocation12 + $0x48] sm:$0xff] }
 0x18e   :  { %4380 = vmatpush3.msra.mxu0 %v1092_v40  ;;  %4346 = vmatprep.subr.mxu1 %v5404_v1  ;;  %v1405_v40 = vld [vmem:[#allocation12 + $0xc0] sm:$0xff] }
 0x18f   :  { %4381 = vmatprep.subr.mxu0 %v5404_v1  ;;  %4347 = vmatpush3.msra.mxu1 %v977_v41  ;;  %v1384_v41 = vld [vmem:[#allocation12 + $0x40] sm:$0xff] }
 0x190   :  { %4382 = vmatpush3.msra.mxu0 %v1091_v42  ;;  %4348 = vmatprep.subr.mxu1 %v5404_v1  ;;  %v1404_v42 = vld [vmem:[#allocation12 + $0xb8] sm:$0xff] }
 0x191   :  { %4383 = vmatprep.subr.mxu0 %v5404_v1  ;;  %4349 = vmatpush3.msra.mxu1 %v976_v43  ;;  %v1383_v43 = vld [vmem:[#allocation12 + $0x38] sm:$0xff] }
 0x192   :  { %4384 = vmatpush3.msra.mxu0 %v1090_v44  ;;  %4350 = vmatprep.subr.mxu1 %v5404_v1  ;;  %v1403_v44 = vld [vmem:[#allocation12 + $0xb0] sm:$0xff] }
 0x193   :  { %4385 = vmatprep.subr.mxu0 %v5404_v1  ;;  %4351 = vmatpush3.msra.mxu1 %v975_v46  ;;  %v1402_v46 = vld [vmem:[#allocation12 + $0xa8] sm:$0xff] }
 0x194   :  { %4386 = vmatpush3.msra.mxu0 %v1089_v48  ;;  %4352 = vmatprep.subr.mxu1 %v5404_v1  ;;  %v1401_v48 = vld [vmem:[#allocation12 + $0xa0] sm:$0xff] }
 0x195   :  { %4387 = vmatprep.subr.mxu0 %v5404_v1  ;;  %4353 = vmatpush3.msra.mxu1 %v974_v50  ;;  %v1400_v50 = vld [vmem:[#allocation12 + $0x98] sm:$0xff] }
 0x196   :  { %4388 = vmatpush3.msra.mxu0 %v1088_v52  ;;  %4354 = vmatprep.subr.mxu1 %v5404_v1  ;;  %v1399_v52 = vld [vmem:[#allocation12 + $0x90] sm:$0xff] }
 0x197   :  { %4389 = vmatprep.subr.mxu0 %v5404_v1  ;;  %4355 = vmatpush3.msra.mxu1 %v973_v53  ;;  %v1378_v53 = vld [vmem:[#allocation12 + $0x10] sm:$0xff] }
 0x198   :  { %4356 = vmatprep.mubr.msk.f32.mxu1 %vm5405_vm0, %v5404_v1  ;;  %4390 = vmatpush3.msra.mxu0 %v1087_v54 }
 0x199   :  { %4391 = vmatprep.mubr.msk.f32.mxu0 %vm5405_vm0, %v5404_v1  ;;  %4357 = vmatmul.mubr.f32.vlgmr.msra.gmra.mxu1 %v1009_v55  ;;  %v1398_v55 = vld [vmem:[#allocation12 + $0x88] sm:$0xff] }
 0x19a   :  { %4392 = vmatmul.mubr.f32.vlgmr.msra.gmra.mxu0 %v1123_v56  ;;  %4394 = vmatprep.subr.mxu1 %v5404_v1  ;;  %v1377_v56 = vld [vmem:[#allocation12 + $0x8] sm:$0xff] }
 0x19b   :  { %4395 = vmatpush3.msra.mxu1 %v1216_v57  ;;  %4426 = vmatprep.mubr.msk.f32.mxu1 %vm5405_vm0, %v5404_v1 }
 0x19c   :  { %4396 = vmatprep.subr.mxu1 %v5404_v1  ;;  %4429 = vmatprep.subr.mxu0 %v5404_v1 }
 0x19d   :  { %4397 = vmatpush3.msra.mxu1 %v1215_v58  ;;  %4461 = vmatprep.mubr.msk.f32.mxu0 %vm5405_vm0, %v5404_v1 }
 0x19e   :  { %4398 = vmatprep.subr.mxu1 %v5404_v1  ;;  %4430 = vmatpush3.msra.mxu0 %v1412_v26 }
 0x19f   :  { %4399 = vmatpush3.msra.mxu1 %v1214_v59  ;;  %4431 = vmatprep.subr.mxu0 %v5404_v1  ;;  %v1397_v59 = vld [vmem:[#allocation12 + $0x80] sm:$0xff] }
 0x1a0   :  { %4400 = vmatprep.subr.mxu1 %v5404_v1  ;;  %4432 = vmatpush3.msra.mxu0 %v1411_v28 }
 0x1a1   :  { %4401 = vmatpush3.msra.mxu1 %v1213_v60  ;;  %4433 = vmatprep.subr.mxu0 %v5404_v1  ;;  %v1376_v60 = vld [vmem:[#allocation12] sm:$0xff] }
 0x1a2   :  { %4402 = vmatprep.subr.mxu1 %v5404_v1  ;;  %4434 = vmatpush3.msra.mxu0 %v1410_v30  ;;  %v1327_v30 = vld [vmem:[%s6085_s6] sm:$0x1] }
 0x1a3   :  { %4403 = vmatpush3.msra.mxu1 %v1212_v61  ;;  %4435 = vmatprep.subr.mxu0 %v5404_v1 }
 0x1a4   :  { %4404 = vmatprep.subr.mxu1 %v5404_v1  ;;  %4436 = vmatpush3.msra.mxu0 %v1409_v32 }
 0x1a5   :  { %4405 = vmatpush3.msra.mxu1 %v1211_v62  ;;  %4437 = vmatprep.subr.mxu0 %v5404_v1 }
 0x1a6   :  { %4406 = vmatprep.subr.mxu1 %v5404_v1  ;;  %4438 = vmatpush3.msra.mxu0 %v1408_v34  ;;  %v1331_v34 = vld [vmem:[%s6086_s7] sm:$0x1] }
 0x1a7   :  { %4407 = vmatpush3.msra.mxu1 %v1210_v63  ;;  %4439 = vmatprep.subr.mxu0 %v5404_v1 }
 0x1a8   :  { %4408 = vmatprep.subr.mxu1 %v5404_v1  ;;  %4440 = vmatpush3.msra.mxu0 %v1407_v36 }
 0x1a9   :  { %4409 = vmatpush3.msra.mxu1 %v1209_v0  ;;  %4441 = vmatprep.subr.mxu0 %v5404_v1 }
 0x1aa   :  { %4410 = vmatprep.subr.mxu1 %v5404_v1  ;;  %4442 = vmatpush3.msra.mxu0 %v1406_v38 }
 0x1ab   :  { %4411 = vmatpush3.msra.mxu1 %v1208_v2  ;;  %4443 = vmatprep.subr.mxu0 %v5404_v1 }
 0x1ac   :  { %4412 = vmatprep.subr.mxu1 %v5404_v1  ;;  %4444 = vmatpush3.msra.mxu0 %v1405_v40 }
 0x1ad   :  { %4413 = vmatpush3.msra.mxu1 %v1207_v3  ;;  %4445 = vmatprep.subr.mxu0 %v5404_v1 }
 0x1ae   :  { %4414 = vmatprep.subr.mxu1 %v5404_v1  ;;  %4446 = vmatpush3.msra.mxu0 %v1404_v42 }
 0x1af   :  { %4415 = vmatpush3.msra.mxu1 %v1206_v5  ;;  %4447 = vmatprep.subr.mxu0 %v5404_v1 }
 0x1b0   :  { %4416 = vmatprep.subr.mxu1 %v5404_v1  ;;  %4448 = vmatpush3.msra.mxu0 %v1403_v44 }
 0x1b1   :  { %4417 = vmatpush3.msra.mxu1 %v1205_v7  ;;  %4449 = vmatprep.subr.mxu0 %v5404_v1 }
 0x1b2   :  { %4418 = vmatprep.subr.mxu1 %v5404_v1  ;;  %4450 = vmatpush3.msra.mxu0 %v1402_v46 }
 0x1b3   :  { %4419 = vmatpush3.msra.mxu1 %v1204_v8  ;;  %4451 = vmatprep.subr.mxu0 %v5404_v1 }
 0x1b4   :  { %4420 = vmatprep.subr.mxu1 %v5404_v1  ;;  %4452 = vmatpush3.msra.mxu0 %v1401_v48 }
 0x1b5   :  { %4421 = vmatpush3.msra.mxu1 %v1203_v10  ;;  %4453 = vmatprep.subr.mxu0 %v5404_v1 }
 0x1b6   :  { %4422 = vmatprep.subr.mxu1 %v5404_v1  ;;  %4454 = vmatpush3.msra.mxu0 %v1400_v50 }
 0x1b7   :  { %4423 = vmatpush3.msra.mxu1 %v1202_v12  ;;  %4455 = vmatprep.subr.mxu0 %v5404_v1 }
 0x1b8   :  { %4424 = vmatprep.subr.mxu1 %v5404_v1  ;;  %4456 = vmatpush3.msra.mxu0 %v1399_v52 }
 0x1b9   :  { %4425 = vmatpush3.msra.mxu1 %v1201_v13  ;;  %4457 = vmatprep.subr.mxu0 %v5404_v1 }
 0x1ba   :  { %4427 = vmatmul.mubr.f32.vlgmr.msra.gmra.mxu1 %v1237_v14  ;;  %4464 = vmatprep.subr.mxu1 %v5404_v1 }
 0x1bb   :  { %4496 = vmatprep.mubr.msk.f32.mxu1 %vm5405_vm0, %v5404_v1  ;;  %4465 = vmatpush3.msra.mxu1 %v1391_v27 }
 0x1bc   :  { %4466 = vmatprep.subr.mxu1 %v5404_v1  ;;  %4458 = vmatpush3.msra.mxu0 %v1398_v55  ;;  %v1730_v55 = vld [vmem:[#allocation12 + $0x1f0] sm:$0xff] }
 0x1bd   :  { %4467 = vmatpush3.msra.mxu1 %v1390_v29  ;;  %4459 = vmatprep.subr.mxu0 %v5404_v1 }
 0x1be   :  { %4468 = vmatprep.subr.mxu1 %v5404_v1  ;;  %4460 = vmatpush3.msra.mxu0 %v1397_v59  ;;  %v1728_v59 = vld [vmem:[#allocation12 + $0x1e0] sm:$0xff] }
 0x1bf   :  { %4469 = vmatpush3.msra.mxu1 %v1389_v31  ;;  %4499 = vmatprep.subr.mxu0 %v5404_v1  ;;  %v5735_v31 = vsub.s32 0, %v5519_v4 }
 0x1c0   :  { %4470 = vmatprep.subr.mxu1 %v5404_v1 }
 0x1c1   :  { %4471 = vmatpush3.msra.mxu1 %v1388_v33 }
 0x1c2   :  { %4472 = vmatprep.subr.mxu1 %v5404_v1 }
 0x1c3   :  { %4473 = vmatpush3.msra.mxu1 %v1387_v35 }
 0x1c4   :  { %4474 = vmatprep.subr.mxu1 %v5404_v1 }
 0x1c5   :  { %4475 = vmatpush3.msra.mxu1 %v1386_v37 }
 0x1c6   :  { %4476 = vmatprep.subr.mxu1 %v5404_v1 }
 0x1c7   :  { %4477 = vmatpush3.msra.mxu1 %v1385_v39 }
 0x1c8   :  { %4478 = vmatprep.subr.mxu1 %v5404_v1 }
 0x1c9   :  { %4479 = vmatpush3.msra.mxu1 %v1384_v41 }
 0x1ca   :  { %4480 = vmatprep.subr.mxu1 %v5404_v1 }
 0x1cb   :  { %4481 = vmatpush3.msra.mxu1 %v1383_v43 }
 0x1cc   :  { %4482 = vmatprep.subr.mxu1 %v5404_v1 }
 0x1cd   :  { %4483 = vmatpush3.msra.mxu1 %v1382_v45 }
 0x1ce   :  { %4484 = vmatprep.subr.mxu1 %v5404_v1 }
 0x1cf   :  { %4485 = vmatpush3.msra.mxu1 %v1381_v47 }
 0x1d0   :  { %4486 = vmatprep.subr.mxu1 %v5404_v1 }
 0x1d1   :  { %4487 = vmatpush3.msra.mxu1 %v1380_v49 }
 0x1d2   :  { %4488 = vmatprep.subr.mxu1 %v5404_v1 }
 0x1d3   :  { %4489 = vmatpush3.msra.mxu1 %v1379_v51  ;;  %v1617_v51 = vld [vmem:[#allocation12 + $0x178] sm:$0xff] }
 0x1d4   :  { %4490 = vmatprep.subr.mxu1 %v5404_v1 }
 0x1d5   :  { %4491 = vmatpush3.msra.mxu1 %v1378_v53  ;;  %v1731_v53 = vld [vmem:[#allocation12 + $0x1f8] sm:$0xff] }
 0x1d6   :  { %4492 = vmatprep.subr.mxu1 %v5404_v1 }
 0x1d7   :  { %4493 = vmatpush3.msra.mxu1 %v1377_v56  ;;  %v1615_v56 = vld [vmem:[#allocation12 + $0x168] sm:$0xff] }
 0x1d8   :  { %4494 = vmatprep.subr.mxu1 %v5404_v1 }
 0x1d9   :  { %4495 = vmatpush3.msra.mxu1 %v1376_v60  ;;  %v1613_v60 = vld [vmem:[#allocation12 + $0x158] sm:$0xff] }
 0x1da   :  { %4534 = vmatprep.subr.mxu1 %v5404_v1 }
 0x1f4   :  { %v415_v15 = vpop.f32.mrf.mxu1 }
 0x1f5   :  { %v507_v16 = vpop.f32.mrf.mxu0 }
 0x1f6   :  { %v508_v17 = vadd.f32 %v507_v16, %v415_v15  ;;  %v4148_v18 = vpop.f32.mrf.mxu1 }
 0x1f7   :  { %v4183_v19 = vpop.f32.mrf.mxu0 }
 0x215   :  { %v620_v20 = vpop.f32.mrf.mxu1 }
 0x216   :  { %v624_v21 = vadd.f32 %v620_v20, %v508_v17  ;;  %v734_v22 = vpop.f32.mrf.mxu0 }
 0x217   :  { %v4218_v23 = vpop.f32.mrf.mxu1 }
 0x218   :  { %v5696_v24 = vadd.f32 %v734_v22, %v624_v21  ;;  %v4253_v25 = vpop.f32.mrf.mxu0 }
 0x237   :  { %v848_v54 = vpop.f32.mrf.mxu1 }
 0x238   :  { %v962_v57 = vpop.f32.mrf.mxu0  ;;  %v852_v3 = vadd.f32 %v848_v54, %v5696_v24  ;;  %v1616_v54 = vld [vmem:[#allocation12 + $0x170] sm:$0xff] }
 0x239   :  { %v4288_v58 = vpop.f32.mrf.mxu1 }
 0x23a   :  { %v4323_v61 = vpop.f32.mrf.mxu0  ;;  %v966_v5 = vadd.f32 %v962_v57, %v852_v3  ;;  %v1729_v57 = vld [vmem:[#allocation12 + $0x1e8] sm:$0xff]  ;;  %v1614_v58 = vld [vmem:[#allocation12 + $0x160] sm:$0xff] }
 0x23b   :  { %v1727_v61 = vld [vmem:[#allocation12 + $0x1d8] sm:$0xff]  ;;  %v1610_v3 = vld [vmem:[#allocation12 + $0x140] sm:$0xff] }
 0x259   :  { %v1077_v62 = vpop.f32.mrf.mxu1 }
 0x25a   :  { %v1191_v63 = vpop.f32.mrf.mxu0  ;;  %v1081_v7 = vadd.f32 %v1077_v62, %v966_v5  ;;  %v1612_v62 = vld [vmem:[#allocation12 + $0x150] sm:$0xff]  ;;  %v1724_v5 = vld [vmem:[#allocation12 + $0x1c0] sm:$0xff] }
 0x25b   :  { %v4358_v0 = vpop.f32.mrf.mxu1 }
 0x25c   :  { %v4393_v2 = vpop.f32.mrf.mxu0  ;;  %v1195_v8 = vadd.f32 %v1191_v63, %v1081_v7  ;;  %v1726_v63 = vld [vmem:[#allocation12 + $0x1d0] sm:$0xff]  ;;  %v1611_v0 = vld [vmem:[#allocation12 + $0x148] sm:$0xff]  ;;  %v1609_v7 = vld [vmem:[#allocation12 + $0x138] sm:$0xff] }
 0x25d   :  { %v1725_v2 = vld [vmem:[#allocation12 + $0x1c8] sm:$0xff] }
 0x27a   :  { %v1305_v9 = vpop.f32.mrf.mxu1 }
 0x27b   :  { %v1309_v10 = vadd.f32 %v1305_v9, %v1195_v8  ;;  %v1723_v8 = vld [vmem:[#allocation12 + $0x1b8] sm:$0xff]  ;;  %v1608_v9 = vld [vmem:[#allocation12 + $0x130] sm:$0xff] }
 0x27c   :  { %v4428_v11 = vpop.f32.mrf.mxu1 }
 0x27d   :  { %v1310_v12 = vrot.slane %v1309_v10, 4  ;;  %v1317_v13 = vmul.f32 %v1309_v10, %v1309_v10  ;;  %v1607_v11 = vld [vmem:[#allocation12 + $0x128] sm:$0xff] }
 0x27f   :  { %v1311_v14 = vadd.f32 %v1310_v12, %v1309_v10  ;;  %v1318_v15 = vrot.slane %v1317_v13, 4  ;;  %v1721_v12 = vld [vmem:[#allocation12 + $0x1a8] sm:$0xff] }
 0x281   :  { %v1312_v16 = vrot.slane %v1311_v14, 2  ;;  %v1319_v17 = vadd.f32 %v1318_v15, %v1317_v13  ;;  %v1606_v13 = vld [vmem:[#allocation12 + $0x120] sm:$0xff]  ;;  %v1605_v15 = vld [vmem:[#allocation12 + $0x118] sm:$0xff] }
 0x283   :  { %v1313_v18 = vadd.f32 %v1312_v16, %v1311_v14  ;;  %v1320_v19 = vrot.slane %v1319_v17, 2  ;;  %v1720_v14 = vld [vmem:[#allocation12 + $0x1a0] sm:$0xff]  ;;  %v1719_v16 = vld [vmem:[#allocation12 + $0x198] sm:$0xff] }
 0x285   :  { %v1314_v20 = vrot.slane %v1313_v18, 1  ;;  %v1321_v21 = vadd.f32 %v1320_v19, %v1319_v17 }
 0x287   :  { %v1315_v22 = vadd.f32 %v1314_v20, %v1313_v18  ;;  %v1322_v23 = vrot.slane %v1321_v21, 1  ;;  %v1604_v18 = vld [vmem:[#allocation12 + $0x110] sm:$0xff] }
 0x288   :  { %v1718_v20 = vld [vmem:[#allocation12 + $0x190] sm:$0xff] }
 0x289   :  { %v1316_v25 = vmul.f32 0.125, %v1315_v22  ;;  %v1323_v24 = vadd.f32 %v1322_v23, %v1321_v21  ;;  %v1603_v22 = vld [vmem:[#allocation12 + $0x108] sm:$0xff] }
 0x28b   :  { %v1324_v26 = vmul.f32 0.125, %v1323_v24  ;;  %v1325_v27 = vmul.f32 %v1316_v25, %v1316_v25  ;;  %v1602_v24 = vld [vmem:[#allocation12 + $0x100] sm:$0xff] }
 0x28d   :  { %v1326_v28 = vsub.f32 %v1324_v26, %v1325_v27  ;;  %v1716_v26 = vld [vmem:[#allocation12 + $0x180] sm:$0xff] }
 0x28f   :  { %v1328_v29 = vadd.f32 1e-05, %v1326_v28 }
 0x291   :  { %5163 = vrsqrt.f32 %v1328_v29  ;;  %v1845_v29 = vld [vmem:[#allocation12 + $0x278] sm:$0xff] }
 0x29e   :  { %v5164_v32 = vpop.eup %5163 }
 0x29f   :  { %v1330_v33 = vmul.f32 %v5164_v32, %v1327_v30  ;;  %v1959_v30 = vld [vmem:[#allocation12 + $0x2f8] sm:$0xff]  ;;  %v1844_v32 = vld [vmem:[#allocation12 + $0x270] sm:$0xff] }
 0x2a1   :  { %v1332_v35 = vmul.f32 %v1330_v33, %v1316_v25  ;;  %v1337_v36 = vrot.slane %v1330_v33, %v5735_v31  ;;  %v1717_v25 = vld [vmem:[#allocation12 + $0x188] sm:$0xff]  ;;  %v1958_v33 = vld [vmem:[#allocation12 + $0x2f0] sm:$0xff] }
 0x2a3   :  { %v1333_v37 = vsub.f32 %v1331_v34, %v1332_v35  ;;  %v1338_v38 = vmul.f32 %v1337_v36, %v1309_v10  ;;  %v1722_v10 = vld [vmem:[#allocation12 + $0x1b0] sm:$0xff]  ;;  %v1843_v34 = vld [vmem:[#allocation12 + $0x268] sm:$0xff]  ;;  %v1842_v36 = vld [vmem:[#allocation12 + $0x260] sm:$0xff] }
 0x2a4   :  { %v1957_v35 = vld [vmem:[#allocation12 + $0x2e8] sm:$0xff] }
 0x2a5   :  { %v1342_v39 = vrot.slane %v1333_v37, %v5735_v31  ;;  %v1956_v37 = vld [vmem:[#allocation12 + $0x2e0] sm:$0xff] }
 0x2a7   :  { %v5742_v40 = vadd.f32 %v1342_v39, %v1338_v38  ;;  %v1841_v38 = vld [vmem:[#allocation12 + $0x258] sm:$0xff] }
 0x2a8   :  { %v1955_v39 = vld [vmem:[#allocation12 + $0x2d8] sm:$0xff] }
 0x2a9   :  { %v1345_v41 = vmax.f32 %v5742_v40, 0.0 }
 0x2ab   :  { %v1347_v42 = vcombine.high %v1345_v41, %v1345_v41  ;;  %v1354_v4 = vrot.slane %v1345_v41, %v5525_v6  ;;  %3627 = vst.sshfl [vmem:[#allocation2 + $0x5] sm:$0x3 pattern:$0x76325410] %v1345_v41  ;;  %v1840_v41 = vld [vmem:[#allocation12 + $0x250] sm:$0xff] }
 0x2ad   :  { %v1361_v43 = vrot.slane %v1347_v42, %v5525_v6  ;;  %v1362_v44 = vcombine.high %v1354_v4, %v1354_v4  ;;  %3628 = vst.sshfl [vmem:[#allocation2 + $0x15] sm:$0x3 pattern:$0x76325410] %v1347_v42  ;;  %v1954_v42 = vld [vmem:[#allocation12 + $0x2d0] sm:$0xff]  ;;  %v1839_v4 = vld [vmem:[#allocation12 + $0x248] sm:$0xff] }
 0x2af   :  { %v1363_v45 = vcombine.high %v1361_v43, %v1361_v43  ;;  %1369 = vst [vmem:[#allocation2 + $0x9] sm:$0x3] %v1362_v44  ;;  %v1953_v43 = vld [vmem:[#allocation12 + $0x2c8] sm:$0xff]  ;;  %v1838_v44 = vld [vmem:[#allocation12 + $0x240] sm:$0xff] }
 0x2b1   :  { %1371 = vst [vmem:[#allocation2 + $0x19] sm:$0x3] %v1363_v45  ;;  %v1952_v45 = vld [vmem:[#allocation12 + $0x2c0] sm:$0xff] }
 0x2b2   :  { %v5187_v46 = vld.sshfl [vmem:[#allocation2 + $0x1] sm:$0xf pattern:$0x76325410] }
 0x2b3   :  { %v5189_v47 = vld.sshfl [vmem:[#allocation2] sm:$0xf pattern:$0x76325410] }
 0x2b4   :  { %v5188_v48 = vld.sshfl [vmem:[#allocation2 + $0x11] sm:$0xf pattern:$0x76325410] }
 0x2b5   :  { %v5190_v49 = vld.sshfl [vmem:[#allocation2 + $0x10] sm:$0xf pattern:$0x76325410]  ;;  %v1433_v50 = vcombine.low %v5187_v46, %v5188_v48  ;;  %v1837_v46 = vld [vmem:[#allocation12 + $0x238] sm:$0xff]  ;;  %v1836_v48 = vld [vmem:[#allocation12 + $0x230] sm:$0xff] }
 0x2b6   :  { %v1525_v52 = vcombine.low %v5189_v47, %v5190_v49  ;;  %v5191_v17 = vld.sshfl [vmem:[#allocation2 + $0x12] sm:$0xf pattern:$0x76325410]  ;;  %v1951_v47 = vld [vmem:[#allocation12 + $0x2b8] sm:$0xff]  ;;  %v1950_v49 = vld [vmem:[#allocation12 + $0x2b0] sm:$0xff] }
 0x2b7   :  { %4462 = vmatmul.mubr.f32.vlgmr.msra.gmra.mxu0 %v1433_v50  ;;  %v5193_v21 = vld.sshfl [vmem:[#allocation2 + $0x2] sm:$0xf pattern:$0x76325410]  ;;  %v1835_v50 = vld [vmem:[#allocation12 + $0x228] sm:$0xff] }
 0x2b8   :  { %4497 = vmatmul.mubr.f32.vlgmr.msra.gmra.mxu1 %v1525_v52  ;;  %4500 = vmatpush3.msra.mxu0 %v1617_v51  ;;  %v5192_v19 = vld.sshfl [vmem:[#allocation2 + $0x14] sm:$0xf pattern:$0x76325410]  ;;  %v1638_v27 = vcombine.low %v5193_v21, %v5191_v17  ;;  %v2068_v17 = vld [vmem:[#allocation12 + $0x350] sm:$0xff] }
 0x2b9   :  { %4535 = vmatpush3.msra.mxu1 %v1731_v53  ;;  %4501 = vmatprep.subr.mxu0 %v5404_v1  ;;  %v5194_v23 = vld.sshfl [vmem:[#allocation2 + $0x4] sm:$0xf pattern:$0x76325410]  ;;  %v1949_v51 = vld [vmem:[#allocation12 + $0x2a8] sm:$0xff]  ;;  %v1834_v52 = vld [vmem:[#allocation12 + $0x220] sm:$0xff] }
 0x2ba   :  { %4536 = vmatprep.subr.mxu1 %v5404_v1  ;;  %4502 = vmatpush3.msra.mxu0 %v1616_v54  ;;  %v1752_v28 = vcombine.low %v5194_v23, %v5192_v19  ;;  %v1948_v53 = vld [vmem:[#allocation12 + $0x2a0] sm:$0xff]  ;;  %v1833_v54 = vld [vmem:[#allocation12 + $0x218] sm:$0xff]  ;;  %v2067_v19 = vld [vmem:[#allocation12 + $0x348] sm:$0xff] }
 0x2bb   :  { %4537 = vmatpush3.msra.mxu1 %v1730_v55  ;;  %4503 = vmatprep.subr.mxu0 %v5404_v1  ;;  %v1947_v55 = vld [vmem:[#allocation12 + $0x298] sm:$0xff]  ;;  %v2066_v21 = vld [vmem:[#allocation12 + $0x340] sm:$0xff] }
 0x2bc   :  { %4538 = vmatprep.subr.mxu1 %v5404_v1  ;;  %4504 = vmatpush3.msra.mxu0 %v1615_v56  ;;  %v5195_v56 = vld.sshfl [vmem:[#allocation2 + $0x15] sm:$0xf pattern:$0x76325410]  ;;  %v2065_v23 = vld [vmem:[#allocation12 + $0x338] sm:$0xff] }
 0x2bd   :  { %4539 = vmatpush3.msra.mxu1 %v1729_v57  ;;  %4505 = vmatprep.subr.mxu0 %v5404_v1  ;;  %v1832_v57 = vld [vmem:[#allocation12 + $0x210] sm:$0xff] }
 0x2be   :  { %4540 = vmatprep.subr.mxu1 %v5404_v1  ;;  %4506 = vmatpush3.msra.mxu0 %v1614_v58  ;;  %v5196_v58 = vld.sshfl [vmem:[#allocation2 + $0x16] sm:$0xf pattern:$0x76325410] }
 0x2bf   :  { %4541 = vmatpush3.msra.mxu1 %v1728_v59  ;;  %4507 = vmatprep.subr.mxu0 %v5404_v1  ;;  %v1946_v59 = vld [vmem:[#allocation12 + $0x290] sm:$0xff] }
 0x2c0   :  { %4542 = vmatprep.subr.mxu1 %v5404_v1  ;;  %4508 = vmatpush3.msra.mxu0 %v1613_v60  ;;  %v5197_v60 = vld.sshfl [vmem:[#allocation2 + $0x5] sm:$0xf pattern:$0x76325410] }
 0x2c1   :  { %4543 = vmatpush3.msra.mxu1 %v1727_v61  ;;  %4509 = vmatprep.subr.mxu0 %v5404_v1  ;;  %v1831_v61 = vld [vmem:[#allocation12 + $0x208] sm:$0xff] }
 0x2c2   :  { %4544 = vmatprep.subr.mxu1 %v5404_v1  ;;  %4510 = vmatpush3.msra.mxu0 %v1612_v62  ;;  %v5198_v62 = vld.sshfl [vmem:[#allocation2 + $0x6] sm:$0xf pattern:$0x76325410] }
 0x2c3   :  { %4545 = vmatpush3.msra.mxu1 %v1726_v63  ;;  %4511 = vmatprep.subr.mxu0 %v5404_v1  ;;  %v1945_v63 = vld [vmem:[#allocation12 + $0x288] sm:$0xff] }
 0x2c4   :  { %4546 = vmatprep.subr.mxu1 %v5404_v1  ;;  %4512 = vmatpush3.msra.mxu0 %v1611_v0  ;;  %v1830_v0 = vld [vmem:[#allocation12 + $0x200] sm:$0xff] }
 0x2c5   :  { %4547 = vmatpush3.msra.mxu1 %v1725_v2  ;;  %4513 = vmatprep.subr.mxu0 %v5404_v1  ;;  %v1944_v2 = vld [vmem:[#allocation12 + $0x280] sm:$0xff] }
 0x2c6   :  { %4548 = vmatprep.subr.mxu1 %v5404_v1  ;;  %4514 = vmatpush3.msra.mxu0 %v1610_v3  ;;  %v1866_v3 = vcombine.low %v5197_v60, %v5195_v56  ;;  %v2291_v56 = vld [vmem:[#allocation12 + $0x428] sm:$0xff]  ;;  %v2288_v60 = vld [vmem:[#allocation12 + $0x410] sm:$0xff] }
 0x2c7   :  { %4549 = vmatpush3.msra.mxu1 %v1724_v5  ;;  %4515 = vmatprep.subr.mxu0 %v5404_v1  ;;  %v1980_v5 = vcombine.low %v5198_v62, %v5196_v58  ;;  %v2289_v58 = vld [vmem:[#allocation12 + $0x418] sm:$0xff]  ;;  %v2287_v62 = vld [vmem:[#allocation12 + $0x408] sm:$0xff] }
 0x2c8   :  { %4550 = vmatprep.subr.mxu1 %v5404_v1  ;;  %4516 = vmatpush3.msra.mxu0 %v1609_v7  ;;  %v2073_v7 = vld [vmem:[#allocation12 + $0x378] sm:$0xff] }
 0x2c9   :  { %4551 = vmatpush3.msra.mxu1 %v1723_v8  ;;  %4517 = vmatprep.subr.mxu0 %v5404_v1  ;;  %v2187_v8 = vld [vmem:[#allocation12 + $0x3f8] sm:$0xff] }
 0x2ca   :  { %4552 = vmatprep.subr.mxu1 %v5404_v1  ;;  %4518 = vmatpush3.msra.mxu0 %v1608_v9  ;;  %v2072_v9 = vld [vmem:[#allocation12 + $0x370] sm:$0xff] }
 0x2cb   :  { %4553 = vmatpush3.msra.mxu1 %v1722_v10  ;;  %4519 = vmatprep.subr.mxu0 %v5404_v1  ;;  %v2186_v10 = vld [vmem:[#allocation12 + $0x3f0] sm:$0xff] }
 0x2cc   :  { %4554 = vmatprep.subr.mxu1 %v5404_v1  ;;  %4520 = vmatpush3.msra.mxu0 %v1607_v11  ;;  %v2071_v11 = vld [vmem:[#allocation12 + $0x368] sm:$0xff] }
 0x2cd   :  { %4555 = vmatpush3.msra.mxu1 %v1721_v12  ;;  %4521 = vmatprep.subr.mxu0 %v5404_v1  ;;  %v2185_v12 = vld [vmem:[#allocation12 + $0x3e8] sm:$0xff] }
 0x2ce   :  { %4556 = vmatprep.subr.mxu1 %v5404_v1  ;;  %4522 = vmatpush3.msra.mxu0 %v1606_v13  ;;  %v2070_v13 = vld [vmem:[#allocation12 + $0x360] sm:$0xff] }
 0x2cf   :  { %4557 = vmatpush3.msra.mxu1 %v1720_v14  ;;  %4523 = vmatprep.subr.mxu0 %v5404_v1  ;;  %v2184_v14 = vld [vmem:[#allocation12 + $0x3e0] sm:$0xff] }
 0x2d0   :  { %4558 = vmatprep.subr.mxu1 %v5404_v1  ;;  %4524 = vmatpush3.msra.mxu0 %v1605_v15  ;;  %v2069_v15 = vld [vmem:[#allocation12 + $0x358] sm:$0xff] }
 0x2d1   :  { %4559 = vmatpush3.msra.mxu1 %v1719_v16  ;;  %4525 = vmatprep.subr.mxu0 %v5404_v1  ;;  %v2183_v16 = vld [vmem:[#allocation12 + $0x3d8] sm:$0xff] }
 0x2d2   :  { %4560 = vmatprep.subr.mxu1 %v5404_v1  ;;  %4526 = vmatpush3.msra.mxu0 %v1604_v18  ;;  %v2182_v18 = vld [vmem:[#allocation12 + $0x3d0] sm:$0xff] }
 0x2d3   :  { %4561 = vmatpush3.msra.mxu1 %v1718_v20  ;;  %4527 = vmatprep.subr.mxu0 %v5404_v1  ;;  %v2181_v20 = vld [vmem:[#allocation12 + $0x3c8] sm:$0xff] }
 0x2d4   :  { %4562 = vmatprep.subr.mxu1 %v5404_v1  ;;  %4528 = vmatpush3.msra.mxu0 %v1603_v22  ;;  %v2180_v22 = vld [vmem:[#allocation12 + $0x3c0] sm:$0xff] }
 0x2d5   :  { %4563 = vmatpush3.msra.mxu1 %v1717_v25  ;;  %4529 = vmatprep.subr.mxu0 %v5404_v1  ;;  %v2179_v25 = vld [vmem:[#allocation12 + $0x3b8] sm:$0xff] }
 0x2d6   :  { %4564 = vmatprep.subr.mxu1 %v5404_v1  ;;  %4530 = vmatpush3.msra.mxu0 %v1602_v24  ;;  %v2064_v24 = vld [vmem:[#allocation12 + $0x330] sm:$0xff] }
 0x2d7   :  { %4531 = vmatprep.mubr.msk.f32.mxu0 %vm5405_vm0, %v5404_v1  ;;  %4565 = vmatpush3.msra.mxu1 %v1716_v26  ;;  %v2178_v26 = vld [vmem:[#allocation12 + $0x3b0] sm:$0xff] }
 0x2d8   :  { %4566 = vmatprep.mubr.msk.f32.mxu1 %vm5405_vm0, %v5404_v1  ;;  %4532 = vmatmul.mubr.f32.vlgmr.msra.gmra.mxu0 %v1638_v27  ;;  %v2063_v27 = vld [vmem:[#allocation12 + $0x328] sm:$0xff] }
 0x2d9   :  { %4567 = vmatmul.mubr.f32.vlgmr.msra.gmra.mxu1 %v1752_v28  ;;  %4569 = vmatprep.subr.mxu0 %v5404_v1  ;;  %v2177_v28 = vld [vmem:[#allocation12 + $0x3a8] sm:$0xff] }
 0x2da   :  { %4604 = vmatprep.subr.mxu1 %v5404_v1  ;;  %4570 = vmatpush3.msra.mxu0 %v1845_v29  ;;  %v2062_v29 = vld [vmem:[#allocation12 + $0x320] sm:$0xff] }
 0x2db   :  { %4605 = vmatpush3.msra.mxu1 %v1959_v30  ;;  %4571 = vmatprep.subr.mxu0 %v5404_v1  ;;  %v2176_v30 = vld [vmem:[#allocation12 + $0x3a0] sm:$0xff] }
 0x2dc   :  { %4606 = vmatprep.subr.mxu1 %v5404_v1  ;;  %4572 = vmatpush3.msra.mxu0 %v1844_v32  ;;  %v2061_v32 = vld [vmem:[#allocation12 + $0x318] sm:$0xff] }
 0x2dd   :  { %4607 = vmatpush3.msra.mxu1 %v1958_v33  ;;  %4573 = vmatprep.subr.mxu0 %v5404_v1  ;;  %v2175_v33 = vld [vmem:[#allocation12 + $0x398] sm:$0xff] }
 0x2de   :  { %4608 = vmatprep.subr.mxu1 %v5404_v1  ;;  %4574 = vmatpush3.msra.mxu0 %v1843_v34  ;;  %v5199_v34 = vld.sshfl [vmem:[#allocation2 + $0x18] sm:$0xf pattern:$0x76325410] }
 0x2df   :  { %4609 = vmatpush3.msra.mxu1 %v1957_v35  ;;  %4575 = vmatprep.subr.mxu0 %v5404_v1  ;;  %v2060_v35 = vld [vmem:[#allocation12 + $0x310] sm:$0xff] }
 0x2e0   :  { %4610 = vmatprep.subr.mxu1 %v5404_v1  ;;  %4576 = vmatpush3.msra.mxu0 %v1842_v36  ;;  %v5200_v36 = vld.sshfl [vmem:[#allocation2 + $0x19] sm:$0xf pattern:$0x76325410] }
 0x2e1   :  { %4611 = vmatpush3.msra.mxu1 %v1956_v37  ;;  %4577 = vmatprep.subr.mxu0 %v5404_v1  ;;  %v2174_v37 = vld [vmem:[#allocation12 + $0x390] sm:$0xff] }
 0x2e2   :  { %4612 = vmatprep.subr.mxu1 %v5404_v1  ;;  %4578 = vmatpush3.msra.mxu0 %v1841_v38  ;;  %v5201_v38 = vld.sshfl [vmem:[#allocation2 + $0x8] sm:$0xf pattern:$0x76325410] }
 0x2e3   :  { %4613 = vmatpush3.msra.mxu1 %v1955_v39  ;;  %4579 = vmatprep.subr.mxu0 %v5404_v1  ;;  %v2059_v39 = vld [vmem:[#allocation12 + $0x308] sm:$0xff] }
 0x2e4   :  { %4614 = vmatprep.subr.mxu1 %v5404_v1  ;;  %4580 = vmatpush3.msra.mxu0 %v1840_v41  ;;  %v5202_v41 = vld.sshfl [vmem:[#allocation2 + $0x9] sm:$0xf pattern:$0x76325410] }
 0x2e5   :  { %4615 = vmatpush3.msra.mxu1 %v1954_v42  ;;  %4581 = vmatprep.subr.mxu0 %v5404_v1  ;;  %v2173_v42 = vld [vmem:[#allocation12 + $0x388] sm:$0xff] }
 0x2e6   :  { %4616 = vmatprep.subr.mxu1 %v5404_v1  ;;  %4582 = vmatpush3.msra.mxu0 %v1839_v4  ;;  %v2058_v4 = vld [vmem:[#allocation12 + $0x300] sm:$0xff] }
 0x2e7   :  { %4617 = vmatpush3.msra.mxu1 %v1953_v43  ;;  %4583 = vmatprep.subr.mxu0 %v5404_v1  ;;  %v2172_v43 = vld [vmem:[#allocation12 + $0x380] sm:$0xff] }
 0x2e8   :  { %4618 = vmatprep.subr.mxu1 %v5404_v1  ;;  %4584 = vmatpush3.msra.mxu0 %v1838_v44  ;;  %v2094_v44 = vcombine.low %v5201_v38, %v5199_v34  ;;  %v2487_v34 = vld [vmem:[#allocation13 + $0xb0] sm:$0xff]  ;;  %v2485_v38 = vld [vmem:[#allocation13 + $0xa0] sm:$0xff] }
 0x2e9   :  { %4619 = vmatpush3.msra.mxu1 %v1952_v45  ;;  %4585 = vmatprep.subr.mxu0 %v5404_v1  ;;  %v2208_v45 = vcombine.low %v5202_v41, %v5200_v36  ;;  %v2486_v36 = vld [vmem:[#allocation13 + $0xa8] sm:$0xff]  ;;  %v2484_v41 = vld [vmem:[#allocation13 + $0x98] sm:$0xff] }
 0x2ea   :  { %4620 = vmatprep.subr.mxu1 %v5404_v1  ;;  %4586 = vmatpush3.msra.mxu0 %v1837_v46  ;;  %v2301_v46 = vld [vmem:[#allocation12 + $0x478] sm:$0xff] }
 0x2eb   :  { %4621 = vmatpush3.msra.mxu1 %v1951_v47  ;;  %4587 = vmatprep.subr.mxu0 %v5404_v1  ;;  %v2300_v47 = vld [vmem:[#allocation12 + $0x470] sm:$0xff] }
 0x2ec   :  { %4622 = vmatprep.subr.mxu1 %v5404_v1  ;;  %4588 = vmatpush3.msra.mxu0 %v1836_v48  ;;  %v2299_v48 = vld [vmem:[#allocation12 + $0x468] sm:$0xff] }
 0x2ed   :  { %4623 = vmatpush3.msra.mxu1 %v1950_v49  ;;  %4589 = vmatprep.subr.mxu0 %v5404_v1  ;;  %v2298_v49 = vld [vmem:[#allocation12 + $0x460] sm:$0xff] }
 0x2ee   :  { %4624 = vmatprep.subr.mxu1 %v5404_v1  ;;  %4590 = vmatpush3.msra.mxu0 %v1835_v50  ;;  %v2297_v50 = vld [vmem:[#allocation12 + $0x458] sm:$0xff] }
 0x2ef   :  { %4625 = vmatpush3.msra.mxu1 %v1949_v51  ;;  %4591 = vmatprep.subr.mxu0 %v5404_v1  ;;  %v2296_v51 = vld [vmem:[#allocation12 + $0x450] sm:$0xff] }
 0x2f0   :  { %4626 = vmatprep.subr.mxu1 %v5404_v1  ;;  %4592 = vmatpush3.msra.mxu0 %v1834_v52  ;;  %v2295_v52 = vld [vmem:[#allocation12 + $0x448] sm:$0xff] }
 0x2f1   :  { %4627 = vmatpush3.msra.mxu1 %v1948_v53  ;;  %4593 = vmatprep.subr.mxu0 %v5404_v1  ;;  %v2294_v53 = vld [vmem:[#allocation12 + $0x440] sm:$0xff] }
 0x2f2   :  { %4628 = vmatprep.subr.mxu1 %v5404_v1  ;;  %4594 = vmatpush3.msra.mxu0 %v1833_v54  ;;  %v2293_v54 = vld [vmem:[#allocation12 + $0x438] sm:$0xff] }
 0x2f3   :  { %4629 = vmatpush3.msra.mxu1 %v1947_v55  ;;  %4595 = vmatprep.subr.mxu0 %v5404_v1  ;;  %v2292_v55 = vld [vmem:[#allocation12 + $0x430] sm:$0xff] }
 0x2f4   :  { %4630 = vmatprep.subr.mxu1 %v5404_v1  ;;  %4596 = vmatpush3.msra.mxu0 %v1832_v57  ;;  %v2290_v57 = vld [vmem:[#allocation12 + $0x420] sm:$0xff] }
 0x2f5   :  { %4631 = vmatpush3.msra.mxu1 %v1946_v59  ;;  %4597 = vmatprep.subr.mxu0 %v5404_v1  ;;  %v5203_v59 = vld.sshfl [vmem:[#allocation2 + $0x1a] sm:$0xf pattern:$0x76325410] }
 0x2f6   :  { %4632 = vmatprep.subr.mxu1 %v5404_v1  ;;  %4598 = vmatpush3.msra.mxu0 %v1831_v61  ;;  %v5204_v61 = vld.sshfl [vmem:[#allocation2 + $0xa] sm:$0xf pattern:$0x76325410] }
 0x2f7   :  { %4633 = vmatpush3.msra.mxu1 %v1945_v63  ;;  %4599 = vmatprep.subr.mxu0 %v5404_v1  ;;  %v2286_v63 = vld [vmem:[#allocation12 + $0x400] sm:$0xff] }
 0x2f8   :  { %4634 = vmatprep.subr.mxu1 %v5404_v1  ;;  %4600 = vmatpush3.msra.mxu0 %v1830_v0  ;;  %v2322_v0 = vcombine.low %v5204_v61, %v5203_v59 }
 0x2f9   :  { %4601 = vmatprep.mubr.msk.f32.mxu0 %vm5405_vm0, %v5404_v1  ;;  %4635 = vmatpush3.msra.mxu1 %v1944_v2 }
 0x2fa   :  { %4636 = vmatprep.mubr.msk.f32.mxu1 %vm5405_vm0, %v5404_v1  ;;  %4602 = vmatmul.mubr.f32.vlgmr.msra.gmra.mxu0 %v1866_v3 }
 0x2fb   :  { %4637 = vmatmul.mubr.f32.vlgmr.msra.gmra.mxu1 %v1980_v5  ;;  %4639 = vmatprep.subr.mxu0 %v5404_v1 }
 0x2fc   :  { %4674 = vmatprep.subr.mxu1 %v5404_v1  ;;  %4640 = vmatpush3.msra.mxu0 %v2073_v7 }
 0x2fd   :  { %4675 = vmatpush3.msra.mxu1 %v2187_v8  ;;  %4641 = vmatprep.subr.mxu0 %v5404_v1 }
 0x2fe   :  { %4676 = vmatprep.subr.mxu1 %v5404_v1  ;;  %4642 = vmatpush3.msra.mxu0 %v2072_v9 }
 0x2ff   :  { %4677 = vmatpush3.msra.mxu1 %v2186_v10  ;;  %4643 = vmatprep.subr.mxu0 %v5404_v1 }
 0x300   :  { %4678 = vmatprep.subr.mxu1 %v5404_v1  ;;  %4644 = vmatpush3.msra.mxu0 %v2071_v11 }
 0x301   :  { %4679 = vmatpush3.msra.mxu1 %v2185_v12  ;;  %4645 = vmatprep.subr.mxu0 %v5404_v1 }
 0x302   :  { %4680 = vmatprep.subr.mxu1 %v5404_v1  ;;  %4646 = vmatpush3.msra.mxu0 %v2070_v13 }
 0x303   :  { %4681 = vmatpush3.msra.mxu1 %v2184_v14  ;;  %4647 = vmatprep.subr.mxu0 %v5404_v1 }
 0x304   :  { %4682 = vmatprep.subr.mxu1 %v5404_v1  ;;  %4648 = vmatpush3.msra.mxu0 %v2069_v15  ;;  %v2496_v15 = vld [vmem:[#allocation13 + $0xf8] sm:$0xff] }
 0x305   :  { %4683 = vmatpush3.msra.mxu1 %v2183_v16  ;;  %4649 = vmatprep.subr.mxu0 %v5404_v1  ;;  %v2475_v16 = vld [vmem:[#allocation13 + $0x78] sm:$0xff] }
 0x306   :  { %4684 = vmatprep.subr.mxu1 %v5404_v1  ;;  %4650 = vmatpush3.msra.mxu0 %v2068_v17  ;;  %v2495_v17 = vld [vmem:[#allocation13 + $0xf0] sm:$0xff] }
 0x307   :  { %4685 = vmatpush3.msra.mxu1 %v2182_v18  ;;  %4651 = vmatprep.subr.mxu0 %v5404_v1  ;;  %v2474_v18 = vld [vmem:[#allocation13 + $0x70] sm:$0xff] }
 0x308   :  { %4686 = vmatprep.subr.mxu1 %v5404_v1  ;;  %4652 = vmatpush3.msra.mxu0 %v2067_v19  ;;  %v2494_v19 = vld [vmem:[#allocation13 + $0xe8] sm:$0xff] }
 0x309   :  { %4687 = vmatpush3.msra.mxu1 %v2181_v20  ;;  %4653 = vmatprep.subr.mxu0 %v5404_v1  ;;  %v2473_v20 = vld [vmem:[#allocation13 + $0x68] sm:$0xff] }
 0x30a   :  { %4688 = vmatprep.subr.mxu1 %v5404_v1  ;;  %4654 = vmatpush3.msra.mxu0 %v2066_v21  ;;  %v2493_v21 = vld [vmem:[#allocation13 + $0xe0] sm:$0xff] }
 0x30b   :  { %4689 = vmatpush3.msra.mxu1 %v2180_v22  ;;  %4655 = vmatprep.subr.mxu0 %v5404_v1  ;;  %v2472_v22 = vld [vmem:[#allocation13 + $0x60] sm:$0xff] }
 0x30c   :  { %4690 = vmatprep.subr.mxu1 %v5404_v1  ;;  %4656 = vmatpush3.msra.mxu0 %v2065_v23  ;;  %v2492_v23 = vld [vmem:[#allocation13 + $0xd8] sm:$0xff] }
 0x30d   :  { %4691 = vmatpush3.msra.mxu1 %v2179_v25  ;;  %4657 = vmatprep.subr.mxu0 %v5404_v1  ;;  %v2471_v25 = vld [vmem:[#allocation13 + $0x58] sm:$0xff] }
 0x30e   :  { %4692 = vmatprep.subr.mxu1 %v5404_v1  ;;  %4658 = vmatpush3.msra.mxu0 %v2064_v24  ;;  %v2491_v24 = vld [vmem:[#allocation13 + $0xd0] sm:$0xff] }
 0x30f   :  { %4693 = vmatpush3.msra.mxu1 %v2178_v26  ;;  %4659 = vmatprep.subr.mxu0 %v5404_v1  ;;  %v2470_v26 = vld [vmem:[#allocation13 + $0x50] sm:$0xff] }
 0x310   :  { %4694 = vmatprep.subr.mxu1 %v5404_v1  ;;  %4660 = vmatpush3.msra.mxu0 %v2063_v27  ;;  %v2490_v27 = vld [vmem:[#allocation13 + $0xc8] sm:$0xff] }
 0x311   :  { %4695 = vmatpush3.msra.mxu1 %v2177_v28  ;;  %4661 = vmatprep.subr.mxu0 %v5404_v1  ;;  %v2469_v28 = vld [vmem:[#allocation13 + $0x48] sm:$0xff] }
 0x312   :  { %4696 = vmatprep.subr.mxu1 %v5404_v1  ;;  %4662 = vmatpush3.msra.mxu0 %v2062_v29  ;;  %v2489_v29 = vld [vmem:[#allocation13 + $0xc0] sm:$0xff] }
 0x313   :  { %4697 = vmatpush3.msra.mxu1 %v2176_v30  ;;  %4663 = vmatprep.subr.mxu0 %v5404_v1  ;;  %v2468_v30 = vld [vmem:[#allocation13 + $0x40] sm:$0xff] }
 0x314   :  { %4698 = vmatprep.subr.mxu1 %v5404_v1  ;;  %4664 = vmatpush3.msra.mxu0 %v2061_v32  ;;  %v2488_v32 = vld [vmem:[#allocation13 + $0xb8] sm:$0xff] }
 0x315   :  { %4699 = vmatpush3.msra.mxu1 %v2175_v33  ;;  %4665 = vmatprep.subr.mxu0 %v5404_v1  ;;  %v2467_v33 = vld [vmem:[#allocation13 + $0x38] sm:$0xff] }
 0x316   :  { %4700 = vmatprep.subr.mxu1 %v5404_v1  ;;  %4666 = vmatpush3.msra.mxu0 %v2060_v35  ;;  %v2466_v35 = vld [vmem:[#allocation13 + $0x30] sm:$0xff] }
 0x317   :  { %4701 = vmatpush3.msra.mxu1 %v2174_v37  ;;  %4667 = vmatprep.subr.mxu0 %v5404_v1  ;;  %v2465_v37 = vld [vmem:[#allocation13 + $0x28] sm:$0xff] }
 0x318   :  { %4702 = vmatprep.subr.mxu1 %v5404_v1  ;;  %4668 = vmatpush3.msra.mxu0 %v2059_v39  ;;  %v2464_v39 = vld [vmem:[#allocation13 + $0x20] sm:$0xff] }
 0x319   :  { %4703 = vmatpush3.msra.mxu1 %v2173_v42  ;;  %4669 = vmatprep.subr.mxu0 %v5404_v1  ;;  %v2463_v42 = vld [vmem:[#allocation13 + $0x18] sm:$0xff] }
 0x31a   :  { %4704 = vmatprep.subr.mxu1 %v5404_v1  ;;  %4670 = vmatpush3.msra.mxu0 %v2058_v4  ;;  %v2483_v4 = vld [vmem:[#allocation13 + $0x90] sm:$0xff] }
 0x31b   :  { %4671 = vmatprep.mubr.msk.f32.mxu0 %vm5405_vm0, %v5404_v1  ;;  %4705 = vmatpush3.msra.mxu1 %v2172_v43  ;;  %v2462_v43 = vld [vmem:[#allocation13 + $0x10] sm:$0xff] }
 0x31c   :  { %4706 = vmatprep.mubr.msk.f32.mxu1 %vm5405_vm0, %v5404_v1  ;;  %4672 = vmatmul.mubr.f32.vlgmr.msra.gmra.mxu0 %v2094_v44 }
 0x31d   :  { %4707 = vmatmul.mubr.f32.vlgmr.msra.gmra.mxu1 %v2208_v45  ;;  %4709 = vmatprep.subr.mxu0 %v5404_v1  ;;  %v2482_v45 = vld [vmem:[#allocation13 + $0x88] sm:$0xff] }
 0x31e   :  { %4710 = vmatpush3.msra.mxu0 %v2301_v46  ;;  %4741 = vmatprep.mubr.msk.f32.mxu0 %vm5405_vm0, %v5404_v1  ;;  %v2461_v46 = vld [vmem:[#allocation13 + $0x8] sm:$0xff] }
 0x31f   :  { %4711 = vmatprep.subr.mxu0 %v5404_v1  ;;  %4744 = vmatprep.subr.mxu1 %v5404_v1 }
 0x320   :  { %4712 = vmatpush3.msra.mxu0 %v2300_v47  ;;  %4776 = vmatprep.mubr.msk.f32.mxu1 %vm5405_vm0, %v5404_v1 }
 0x321   :  { %4713 = vmatprep.subr.mxu0 %v5404_v1  ;;  %4745 = vmatpush3.msra.mxu1 %v2496_v15 }
 0x322   :  { %4714 = vmatpush3.msra.mxu0 %v2299_v48  ;;  %4746 = vmatprep.subr.mxu1 %v5404_v1 }
 0x323   :  { %4715 = vmatprep.subr.mxu0 %v5404_v1  ;;  %4747 = vmatpush3.msra.mxu1 %v2495_v17 }
 0x324   :  { %4716 = vmatpush3.msra.mxu0 %v2298_v49  ;;  %4748 = vmatprep.subr.mxu1 %v5404_v1  ;;  %v2481_v49 = vld [vmem:[#allocation13 + $0x80] sm:$0xff] }
 0x325   :  { %4717 = vmatprep.subr.mxu0 %v5404_v1  ;;  %4749 = vmatpush3.msra.mxu1 %v2494_v19 }
 0x326   :  { %4718 = vmatpush3.msra.mxu0 %v2297_v50  ;;  %4750 = vmatprep.subr.mxu1 %v5404_v1  ;;  %v2460_v50 = vld [vmem:[#allocation13] sm:$0xff] }
 0x327   :  { %4719 = vmatprep.subr.mxu0 %v5404_v1  ;;  %4751 = vmatpush3.msra.mxu1 %v2493_v21 }
 0x328   :  { %4720 = vmatpush3.msra.mxu0 %v2296_v51  ;;  %4752 = vmatprep.subr.mxu1 %v5404_v1 }
 0x329   :  { %4721 = vmatprep.subr.mxu0 %v5404_v1  ;;  %4753 = vmatpush3.msra.mxu1 %v2492_v23  ;;  %v2416_v23 = vld [vmem:[%s6086_s7 + $0x1] sm:$0x1] }
 0x32a   :  { %4722 = vmatpush3.msra.mxu0 %v2295_v52  ;;  %4754 = vmatprep.subr.mxu1 %v5404_v1 }
 0x32b   :  { %4723 = vmatprep.subr.mxu0 %v5404_v1  ;;  %4755 = vmatpush3.msra.mxu1 %v2491_v24 }
 0x32c   :  { %4724 = vmatpush3.msra.mxu0 %v2294_v53  ;;  %4756 = vmatprep.subr.mxu1 %v5404_v1 }
 0x32d   :  { %4725 = vmatprep.subr.mxu0 %v5404_v1  ;;  %4757 = vmatpush3.msra.mxu1 %v2490_v27 }
 0x32e   :  { %4726 = vmatpush3.msra.mxu0 %v2293_v54  ;;  %4758 = vmatprep.subr.mxu1 %v5404_v1 }
 0x32f   :  { %4727 = vmatprep.subr.mxu0 %v5404_v1  ;;  %4759 = vmatpush3.msra.mxu1 %v2489_v29 }
 0x330   :  { %4728 = vmatpush3.msra.mxu0 %v2292_v55  ;;  %4760 = vmatprep.subr.mxu1 %v5404_v1 }
 0x331   :  { %4729 = vmatprep.subr.mxu0 %v5404_v1  ;;  %4761 = vmatpush3.msra.mxu1 %v2488_v32 }
 0x332   :  { %4730 = vmatpush3.msra.mxu0 %v2291_v56  ;;  %4762 = vmatprep.subr.mxu1 %v5404_v1 }
 0x333   :  { %4731 = vmatprep.subr.mxu0 %v5404_v1  ;;  %4763 = vmatpush3.msra.mxu1 %v2487_v34 }
 0x334   :  { %4732 = vmatpush3.msra.mxu0 %v2290_v57  ;;  %4764 = vmatprep.subr.mxu1 %v5404_v1 }
 0x335   :  { %4733 = vmatprep.subr.mxu0 %v5404_v1  ;;  %4765 = vmatpush3.msra.mxu1 %v2486_v36 }
 0x336   :  { %4734 = vmatpush3.msra.mxu0 %v2289_v58  ;;  %4766 = vmatprep.subr.mxu1 %v5404_v1 }
 0x337   :  { %4735 = vmatprep.subr.mxu0 %v5404_v1  ;;  %4767 = vmatpush3.msra.mxu1 %v2485_v38 }
 0x338   :  { %4736 = vmatpush3.msra.mxu0 %v2288_v60  ;;  %4768 = vmatprep.subr.mxu1 %v5404_v1 }
 0x339   :  { %4737 = vmatprep.subr.mxu0 %v5404_v1  ;;  %4769 = vmatpush3.msra.mxu1 %v2484_v41 }
 0x33a   :  { %4738 = vmatpush3.msra.mxu0 %v2287_v62  ;;  %4770 = vmatprep.subr.mxu1 %v5404_v1 }
 0x33b   :  { %4739 = vmatprep.subr.mxu0 %v5404_v1  ;;  %4771 = vmatpush3.msra.mxu1 %v2483_v4  ;;  %v2701_v4 = vld [vmem:[#allocation13 + $0x178] sm:$0xff] }
 0x33c   :  { %4740 = vmatpush3.msra.mxu0 %v2286_v63  ;;  %4772 = vmatprep.subr.mxu1 %v5404_v1 }
 0x33d   :  { %4742 = vmatmul.mubr.f32.vlgmr.msra.gmra.mxu0 %v2322_v0  ;;  %4779 = vmatprep.subr.mxu0 %v5404_v1 }
 0x33e   :  { %4811 = vmatprep.mubr.msk.f32.mxu0 %vm5405_vm0, %v5404_v1  ;;  %4780 = vmatpush3.msra.mxu0 %v2475_v16 }
 0x33f   :  { %4781 = vmatprep.subr.mxu0 %v5404_v1  ;;  %4773 = vmatpush3.msra.mxu1 %v2482_v45  ;;  %v2700_v45 = vld [vmem:[#allocation13 + $0x170] sm:$0xff] }
 0x340   :  { %4782 = vmatpush3.msra.mxu0 %v2474_v18  ;;  %4774 = vmatprep.subr.mxu1 %v5404_v1 }
 0x341   :  { %4783 = vmatprep.subr.mxu0 %v5404_v1  ;;  %4775 = vmatpush3.msra.mxu1 %v2481_v49  ;;  %v2812_v49 = vld [vmem:[#allocation13 + $0x1e0] sm:$0xff] }
 0x342   :  { %4784 = vmatpush3.msra.mxu0 %v2473_v20  ;;  %4814 = vmatprep.subr.mxu1 %v5404_v1  ;;  %v2412_v20 = vld [vmem:[%s6085_s6 + $0x1] sm:$0x1] }
 0x343   :  { %4785 = vmatprep.subr.mxu0 %v5404_v1 }
 0x344   :  { %4786 = vmatpush3.msra.mxu0 %v2472_v22 }
 0x345   :  { %4787 = vmatprep.subr.mxu0 %v5404_v1 }
 0x346   :  { %4788 = vmatpush3.msra.mxu0 %v2471_v25 }
 0x347   :  { %4789 = vmatprep.subr.mxu0 %v5404_v1 }
 0x348   :  { %4790 = vmatpush3.msra.mxu0 %v2470_v26 }
 0x349   :  { %4791 = vmatprep.subr.mxu0 %v5404_v1 }
 0x34a   :  { %4792 = vmatpush3.msra.mxu0 %v2469_v28 }
 0x34b   :  { %4793 = vmatprep.subr.mxu0 %v5404_v1 }
 0x34c   :  { %4794 = vmatpush3.msra.mxu0 %v2468_v30 }
 0x34d   :  { %4795 = vmatprep.subr.mxu0 %v5404_v1 }
 0x34e   :  { %4796 = vmatpush3.msra.mxu0 %v2467_v33 }
 0x34f   :  { %4797 = vmatprep.subr.mxu0 %v5404_v1 }
 0x350   :  { %4798 = vmatpush3.msra.mxu0 %v2466_v35 }
 0x351   :  { %4799 = vmatprep.subr.mxu0 %v5404_v1 }
 0x352   :  { %4800 = vmatpush3.msra.mxu0 %v2465_v37 }
 0x353   :  { %4801 = vmatprep.subr.mxu0 %v5404_v1 }
 0x354   :  { %4802 = vmatpush3.msra.mxu0 %v2464_v39 }
 0x355   :  { %4803 = vmatprep.subr.mxu0 %v5404_v1 }
 0x356   :  { %4804 = vmatpush3.msra.mxu0 %v2463_v42 }
 0x357   :  { %4805 = vmatprep.subr.mxu0 %v5404_v1 }
 0x358   :  { %4806 = vmatpush3.msra.mxu0 %v2462_v43 }
 0x359   :  { %4807 = vmatprep.subr.mxu0 %v5404_v1 }
 0x35a   :  { %4808 = vmatpush3.msra.mxu0 %v2461_v46  ;;  %v2814_v46 = vld [vmem:[#allocation13 + $0x1f0] sm:$0xff] }
 0x35b   :  { %4809 = vmatprep.subr.mxu0 %v5404_v1 }
 0x35c   :  { %4810 = vmatpush3.msra.mxu0 %v2460_v50  ;;  %v2697_v50 = vld [vmem:[#allocation13 + $0x158] sm:$0xff] }
 0x35d   :  { %4849 = vmatprep.subr.mxu0 %v5404_v1 }
 0x377   :  { %v1501_v2 = vpop.f32.mrf.mxu0 }
 0x378   :  { %v1593_v3 = vpop.f32.mrf.mxu1 }
 0x379   :  { %v1594_v5 = vadd.f32 %v1593_v3, %v1501_v2  ;;  %v4463_v7 = vpop.f32.mrf.mxu0 }
 0x37a   :  { %v4498_v8 = vpop.f32.mrf.mxu1 }
 0x398   :  { %v1706_v9 = vpop.f32.mrf.mxu0 }
 0x399   :  { %v1710_v10 = vadd.f32 %v1706_v9, %v1594_v5  ;;  %v1820_v11 = vpop.f32.mrf.mxu1 }
 0x39a   :  { %v4533_v12 = vpop.f32.mrf.mxu0 }
 0x39b   :  { %v5877_v13 = vadd.f32 %v1820_v11, %v1710_v10  ;;  %v4568_v14 = vpop.f32.mrf.mxu1 }
 0x3ba   :  { %v1934_v44 = vpop.f32.mrf.mxu0 }
 0x3bb   :  { %v2048_v47 = vpop.f32.mrf.mxu1  ;;  %v1938_v56 = vadd.f32 %v1934_v44, %v5877_v13  ;;  %v2815_v44 = vld [vmem:[#allocation13 + $0x1f8] sm:$0xff] }
 0x3bc   :  { %v4603_v48 = vpop.f32.mrf.mxu0 }
 0x3bd   :  { %v4638_v51 = vpop.f32.mrf.mxu1  ;;  %v2052_v57 = vadd.f32 %v2048_v47, %v1938_v56  ;;  %v2813_v47 = vld [vmem:[#allocation13 + $0x1e8] sm:$0xff]  ;;  %v2698_v48 = vld [vmem:[#allocation13 + $0x160] sm:$0xff] }
 0x3be   :  { %v2811_v51 = vld [vmem:[#allocation13 + $0x1d8] sm:$0xff]  ;;  %v2694_v56 = vld [vmem:[#allocation13 + $0x140] sm:$0xff] }
 0x3dc   :  { %v2162_v52 = vpop.f32.mrf.mxu0 }
 0x3dd   :  { %v2276_v53 = vpop.f32.mrf.mxu1  ;;  %v2166_v58 = vadd.f32 %v2162_v52, %v2052_v57  ;;  %v2696_v52 = vld [vmem:[#allocation13 + $0x150] sm:$0xff]  ;;  %v2808_v57 = vld [vmem:[#allocation13 + $0x1c0] sm:$0xff] }
 0x3de   :  { %v4673_v54 = vpop.f32.mrf.mxu0 }
 0x3df   :  { %v4708_v55 = vpop.f32.mrf.mxu1  ;;  %v2280_v59 = vadd.f32 %v2276_v53, %v2166_v58  ;;  %v2810_v53 = vld [vmem:[#allocation13 + $0x1d0] sm:$0xff]  ;;  %v2695_v54 = vld [vmem:[#allocation13 + $0x148] sm:$0xff]  ;;  %v2693_v58 = vld [vmem:[#allocation13 + $0x138] sm:$0xff] }
 0x3e0   :  { %v2809_v55 = vld [vmem:[#allocation13 + $0x1c8] sm:$0xff] }
 0x3fd   :  { %v2390_v60 = vpop.f32.mrf.mxu0 }
 0x3fe   :  { %v2394_v61 = vadd.f32 %v2390_v60, %v2280_v59  ;;  %v2807_v59 = vld [vmem:[#allocation13 + $0x1b8] sm:$0xff]  ;;  %v2692_v60 = vld [vmem:[#allocation13 + $0x130] sm:$0xff] }
 0x3ff   :  { %v4743_v62 = vpop.f32.mrf.mxu0 }
 0x400   :  { %v2395_v63 = vrot.slane %v2394_v61, 4  ;;  %v2402_v0 = vmul.f32 %v2394_v61, %v2394_v61  ;;  %v2691_v62 = vld [vmem:[#allocation13 + $0x128] sm:$0xff] }
 0x402   :  { %v2396_v2 = vadd.f32 %v2395_v63, %v2394_v61  ;;  %v2403_v3 = vrot.slane %v2402_v0, 4  ;;  %v2805_v63 = vld [vmem:[#allocation13 + $0x1a8] sm:$0xff] }
 0x404   :  { %v2397_v5 = vrot.slane %v2396_v2, 2  ;;  %v2404_v7 = vadd.f32 %v2403_v3, %v2402_v0  ;;  %v2690_v0 = vld [vmem:[#allocation13 + $0x120] sm:$0xff]  ;;  %v2689_v3 = vld [vmem:[#allocation13 + $0x118] sm:$0xff] }
 0x406   :  { %v2398_v8 = vadd.f32 %v2397_v5, %v2396_v2  ;;  %v2405_v9 = vrot.slane %v2404_v7, 2  ;;  %v2804_v2 = vld [vmem:[#allocation13 + $0x1a0] sm:$0xff]  ;;  %v2803_v5 = vld [vmem:[#allocation13 + $0x198] sm:$0xff] }
 0x408   :  { %v2399_v10 = vrot.slane %v2398_v8, 1  ;;  %v2406_v11 = vadd.f32 %v2405_v9, %v2404_v7 }
 0x40a   :  { %v2400_v12 = vadd.f32 %v2399_v10, %v2398_v8  ;;  %v2407_v14 = vrot.slane %v2406_v11, 1  ;;  %v2688_v8 = vld [vmem:[#allocation13 + $0x110] sm:$0xff] }
 0x40b   :  { %v2802_v10 = vld [vmem:[#allocation13 + $0x190] sm:$0xff] }
 0x40c   :  { %v2401_v15 = vmul.f32 0.125, %v2400_v12  ;;  %v2408_v13 = vadd.f32 %v2407_v14, %v2406_v11  ;;  %v2687_v12 = vld [vmem:[#allocation13 + $0x108] sm:$0xff] }
 0x40e   :  { %v2409_v16 = vmul.f32 0.125, %v2408_v13  ;;  %v2410_v17 = vmul.f32 %v2401_v15, %v2401_v15  ;;  %v2686_v13 = vld [vmem:[#allocation13 + $0x100] sm:$0xff] }
 0x410   :  { %v2411_v18 = vsub.f32 %v2409_v16, %v2410_v17  ;;  %v2800_v16 = vld [vmem:[#allocation13 + $0x180] sm:$0xff] }
 0x412   :  { %v2413_v19 = vadd.f32 1e-05, %v2411_v18 }
 0x414   :  { %5165 = vrsqrt.f32 %v2413_v19  ;;  %v2929_v19 = vld [vmem:[#allocation13 + $0x278] sm:$0xff] }
 0x421   :  { %v5166_v21 = vpop.eup %5165 }
 0x422   :  { %v2415_v22 = vmul.f32 %v5166_v21, %v2412_v20  ;;  %v3043_v20 = vld [vmem:[#allocation13 + $0x2f8] sm:$0xff]  ;;  %v2928_v21 = vld [vmem:[#allocation13 + $0x270] sm:$0xff] }
 0x424   :  { %v2417_v25 = vmul.f32 %v2415_v22, %v2401_v15  ;;  %v2422_v24 = vrot.slane %v2415_v22, %v5735_v31  ;;  %v2801_v15 = vld [vmem:[#allocation13 + $0x188] sm:$0xff]  ;;  %v3042_v22 = vld [vmem:[#allocation13 + $0x2f0] sm:$0xff] }
 0x426   :  { %v2418_v26 = vsub.f32 %v2416_v23, %v2417_v25  ;;  %v2423_v27 = vmul.f32 %v2422_v24, %v2394_v61  ;;  %v2806_v61 = vld [vmem:[#allocation13 + $0x1b0] sm:$0xff]  ;;  %v2927_v23 = vld [vmem:[#allocation13 + $0x268] sm:$0xff]  ;;  %v2926_v24 = vld [vmem:[#allocation13 + $0x260] sm:$0xff] }
 0x427   :  { %v3041_v25 = vld [vmem:[#allocation13 + $0x2e8] sm:$0xff] }
 0x428   :  { %v2427_v28 = vrot.slane %v2418_v26, %v5735_v31  ;;  %v3040_v26 = vld [vmem:[#allocation13 + $0x2e0] sm:$0xff] }
 0x42a   :  { %v2428_v29 = vadd.f32 %v2427_v28, %v2423_v27  ;;  %v2925_v27 = vld [vmem:[#allocation13 + $0x258] sm:$0xff] }
 0x42b   :  { %v3039_v28 = vld [vmem:[#allocation13 + $0x2d8] sm:$0xff] }
 0x42c   :  { %v2429_v30 = vmax.f32 %v2428_v29, 0.0  ;;  %v2924_v29 = vld [vmem:[#allocation13 + $0x250] sm:$0xff] }
 0x42e   :  { %v2431_v32 = vcombine.high %v2429_v30, %v2429_v30  ;;  %v2438_v33 = vrot.slane %v2429_v30, %v5525_v6  ;;  %3629 = vst.sshfl [vmem:[#allocation2 + $0x5] sm:$0x3 pattern:$0x76325410] %v2429_v30  ;;  %v3038_v30 = vld [vmem:[#allocation13 + $0x2d0] sm:$0xff] }
 0x430   :  { %v2445_v34 = vrot.slane %v2431_v32, %v5525_v6  ;;  %v2446_v35 = vcombine.high %v2438_v33, %v2438_v33  ;;  %3630 = vst.sshfl [vmem:[#allocation2 + $0x15] sm:$0x3 pattern:$0x76325410] %v2431_v32  ;;  %v2699_v6 = vld [vmem:[#allocation13 + $0x168] sm:$0xff] }
 0x431   :  { %v2923_v32 = vld [vmem:[#allocation13 + $0x248] sm:$0xff] }
 0x432   :  { %v2447_v36 = vcombine.high %v2445_v34, %v2445_v34  ;;  %2453 = vst [vmem:[#allocation2 + $0x9] sm:$0x3] %v2446_v35  ;;  %v3037_v33 = vld [vmem:[#allocation13 + $0x2c8] sm:$0xff]  ;;  %v2922_v34 = vld [vmem:[#allocation13 + $0x240] sm:$0xff] }
 0x433   :  { %v3036_v35 = vld [vmem:[#allocation13 + $0x2c0] sm:$0xff] }
 0x434   :  { %2455 = vst [vmem:[#allocation2 + $0x19] sm:$0x3] %v2447_v36  ;;  %v2921_v36 = vld [vmem:[#allocation13 + $0x238] sm:$0xff] }
 0x435   :  { %v5205_v37 = vld.sshfl [vmem:[#allocation2 + $0x1] sm:$0xf pattern:$0x76325410] }
 0x436   :  { %v5207_v38 = vld.sshfl [vmem:[#allocation2] sm:$0xf pattern:$0x76325410] }
 0x437   :  { %v5206_v39 = vld.sshfl [vmem:[#allocation2 + $0x11] sm:$0xf pattern:$0x76325410] }
 0x438   :  { %v5208_v41 = vld.sshfl [vmem:[#allocation2 + $0x10] sm:$0xf pattern:$0x76325410]  ;;  %v2517_v42 = vcombine.low %v5205_v37, %v5206_v39  ;;  %v3035_v37 = vld [vmem:[#allocation13 + $0x2b8] sm:$0xff]  ;;  %v3034_v39 = vld [vmem:[#allocation13 + $0x2b0] sm:$0xff] }
 0x439   :  { %v2609_v43 = vcombine.low %v5207_v38, %v5208_v41  ;;  %v5209_v7 = vld.sshfl [vmem:[#allocation2 + $0x12] sm:$0xf pattern:$0x76325410]  ;;  %v2920_v38 = vld [vmem:[#allocation13 + $0x230] sm:$0xff] }
 0x43a   :  { %4777 = vmatmul.mubr.f32.vlgmr.msra.gmra.mxu1 %v2517_v42  ;;  %v5211_v11 = vld.sshfl [vmem:[#allocation2 + $0x2] sm:$0xf pattern:$0x76325410]  ;;  %v2919_v41 = vld [vmem:[#allocation13 + $0x228] sm:$0xff] }
 0x43b   :  { %4812 = vmatmul.mubr.f32.vlgmr.msra.gmra.mxu0 %v2609_v43  ;;  %4815 = vmatpush3.msra.mxu1 %v2701_v4  ;;  %v5210_v9 = vld.sshfl [vmem:[#allocation2 + $0x14] sm:$0xf pattern:$0x76325410]  ;;  %v2722_v17 = vcombine.low %v5211_v11, %v5209_v7  ;;  %v3266_v7 = vld [vmem:[#allocation13 + $0x3d0] sm:$0xff] }
 0x43c   :  { %4850 = vmatpush3.msra.mxu0 %v2815_v44  ;;  %4816 = vmatprep.subr.mxu1 %v5404_v1  ;;  %v5212_v14 = vld.sshfl [vmem:[#allocation2 + $0x4] sm:$0xf pattern:$0x76325410]  ;;  %v3033_v42 = vld [vmem:[#allocation13 + $0x2a8] sm:$0xff]  ;;  %v2918_v4 = vld [vmem:[#allocation13 + $0x220] sm:$0xff] }
 0x43d   :  { %4851 = vmatprep.subr.mxu0 %v5404_v1  ;;  %4817 = vmatpush3.msra.mxu1 %v2700_v45  ;;  %v2836_v18 = vcombine.low %v5212_v14, %v5210_v9  ;;  %v3032_v43 = vld [vmem:[#allocation13 + $0x2a0] sm:$0xff]  ;;  %v2917_v44 = vld [vmem:[#allocation13 + $0x218] sm:$0xff]  ;;  %v3265_v9 = vld [vmem:[#allocation13 + $0x3c8] sm:$0xff] }
 0x43e   :  { %4852 = vmatpush3.msra.mxu0 %v2814_v46  ;;  %4818 = vmatprep.subr.mxu1 %v5404_v1  ;;  %v3031_v45 = vld [vmem:[#allocation13 + $0x298] sm:$0xff]  ;;  %v5213_v46 = vld.sshfl [vmem:[#allocation2 + $0x15] sm:$0xf pattern:$0x76325410] }
 0x43f   :  { %4853 = vmatprep.subr.mxu0 %v5404_v1  ;;  %4819 = vmatpush3.msra.mxu1 %v2699_v6  ;;  %v2916_v6 = vld [vmem:[#allocation13 + $0x210] sm:$0xff]  ;;  %v3264_v11 = vld [vmem:[#allocation13 + $0x3c0] sm:$0xff]  ;;  %v3263_v14 = vld [vmem:[#allocation13 + $0x3b8] sm:$0xff] }
 0x440   :  { %4854 = vmatpush3.msra.mxu0 %v2813_v47  ;;  %4820 = vmatprep.subr.mxu1 %v5404_v1  ;;  %v5214_v47 = vld.sshfl [vmem:[#allocation2 + $0x16] sm:$0xf pattern:$0x76325410] }
 0x441   :  { %4855 = vmatprep.subr.mxu0 %v5404_v1  ;;  %4821 = vmatpush3.msra.mxu1 %v2698_v48  ;;  %v3030_v48 = vld [vmem:[#allocation13 + $0x290] sm:$0xff] }
 0x442   :  { %4856 = vmatpush3.msra.mxu0 %v2812_v49  ;;  %4822 = vmatprep.subr.mxu1 %v5404_v1  ;;  %v5215_v49 = vld.sshfl [vmem:[#allocation2 + $0x5] sm:$0xf pattern:$0x76325410] }
 0x443   :  { %4857 = vmatprep.subr.mxu0 %v5404_v1  ;;  %4823 = vmatpush3.msra.mxu1 %v2697_v50  ;;  %v2915_v50 = vld [vmem:[#allocation13 + $0x208] sm:$0xff] }
 0x444   :  { %4858 = vmatpush3.msra.mxu0 %v2811_v51  ;;  %4824 = vmatprep.subr.mxu1 %v5404_v1  ;;  %v5216_v51 = vld.sshfl [vmem:[#allocation2 + $0x6] sm:$0xf pattern:$0x76325410] }
 0x445   :  { %4859 = vmatprep.subr.mxu0 %v5404_v1  ;;  %4825 = vmatpush3.msra.mxu1 %v2696_v52  ;;  %v3029_v52 = vld [vmem:[#allocation13 + $0x288] sm:$0xff] }
 0x446   :  { %4860 = vmatpush3.msra.mxu0 %v2810_v53  ;;  %4826 = vmatprep.subr.mxu1 %v5404_v1  ;;  %v2914_v53 = vld [vmem:[#allocation13 + $0x200] sm:$0xff] }
 0x447   :  { %4861 = vmatprep.subr.mxu0 %v5404_v1  ;;  %4827 = vmatpush3.msra.mxu1 %v2695_v54  ;;  %v3028_v54 = vld [vmem:[#allocation13 + $0x280] sm:$0xff] }
 0x448   :  { %4862 = vmatpush3.msra.mxu0 %v2809_v55  ;;  %4828 = vmatprep.subr.mxu1 %v5404_v1  ;;  %v2950_v55 = vcombine.low %v5215_v49, %v5213_v46  ;;  %v3374_v46 = vld [vmem:[#allocation13 + $0x420] sm:$0xff] }
 0x449   :  { %4863 = vmatprep.subr.mxu0 %v5404_v1  ;;  %4829 = vmatpush3.msra.mxu1 %v2694_v56  ;;  %v3064_v56 = vcombine.low %v5216_v51, %v5214_v47  ;;  %v5221_v47 = vld.sshfl [vmem:[#allocation2 + $0x1a] sm:$0xf pattern:$0x76325410]  ;;  %v3370_v51 = vld [vmem:[#allocation13 + $0x400] sm:$0xff] }
 0x44a   :  { %4864 = vmatpush3.msra.mxu0 %v2808_v57  ;;  %4830 = vmatprep.subr.mxu1 %v5404_v1  ;;  %v3157_v57 = vld [vmem:[#allocation13 + $0x378] sm:$0xff] }
 0x44b   :  { %4865 = vmatprep.subr.mxu0 %v5404_v1  ;;  %4831 = vmatpush3.msra.mxu1 %v2693_v58  ;;  %v3271_v58 = vld [vmem:[#allocation13 + $0x3f8] sm:$0xff] }
 0x44c   :  { %4866 = vmatpush3.msra.mxu0 %v2807_v59  ;;  %4832 = vmatprep.subr.mxu1 %v5404_v1  ;;  %v3156_v59 = vld [vmem:[#allocation13 + $0x370] sm:$0xff]  ;;  %v5222_v49 = vld.sshfl [vmem:[#allocation2 + $0xa] sm:$0xf pattern:$0x76325410] }
 0x44d   :  { %4867 = vmatprep.subr.mxu0 %v5404_v1  ;;  %4833 = vmatpush3.msra.mxu1 %v2692_v60  ;;  %v3270_v60 = vld [vmem:[#allocation13 + $0x3f0] sm:$0xff] }
 0x44e   :  { %4868 = vmatpush3.msra.mxu0 %v2806_v61  ;;  %4834 = vmatprep.subr.mxu1 %v5404_v1  ;;  %v3155_v61 = vld [vmem:[#allocation13 + $0x368] sm:$0xff] }
 0x44f   :  { %4869 = vmatprep.subr.mxu0 %v5404_v1  ;;  %4835 = vmatpush3.msra.mxu1 %v2691_v62  ;;  %v3269_v62 = vld [vmem:[#allocation13 + $0x3e8] sm:$0xff] }
 0x450   :  { %4870 = vmatpush3.msra.mxu0 %v2805_v63  ;;  %4836 = vmatprep.subr.mxu1 %v5404_v1  ;;  %v3154_v63 = vld [vmem:[#allocation13 + $0x360] sm:$0xff] }
 0x451   :  { %4871 = vmatprep.subr.mxu0 %v5404_v1  ;;  %4837 = vmatpush3.msra.mxu1 %v2690_v0  ;;  %v3268_v0 = vld [vmem:[#allocation13 + $0x3e0] sm:$0xff] }
 0x452   :  { %4872 = vmatpush3.msra.mxu0 %v2804_v2  ;;  %4838 = vmatprep.subr.mxu1 %v5404_v1  ;;  %v3153_v2 = vld [vmem:[#allocation13 + $0x358] sm:$0xff] }
 0x453   :  { %4873 = vmatprep.subr.mxu0 %v5404_v1  ;;  %4839 = vmatpush3.msra.mxu1 %v2689_v3  ;;  %v3267_v3 = vld [vmem:[#allocation13 + $0x3d8] sm:$0xff] }
 0x454   :  { %4874 = vmatpush3.msra.mxu0 %v2803_v5  ;;  %4840 = vmatprep.subr.mxu1 %v5404_v1  ;;  %v3152_v5 = vld [vmem:[#allocation13 + $0x350] sm:$0xff] }
 0x455   :  { %4875 = vmatprep.subr.mxu0 %v5404_v1  ;;  %4841 = vmatpush3.msra.mxu1 %v2688_v8  ;;  %v3151_v8 = vld [vmem:[#allocation13 + $0x348] sm:$0xff] }
 0x456   :  { %4876 = vmatpush3.msra.mxu0 %v2802_v10  ;;  %4842 = vmatprep.subr.mxu1 %v5404_v1  ;;  %v3150_v10 = vld [vmem:[#allocation13 + $0x340] sm:$0xff] }
 0x457   :  { %4877 = vmatprep.subr.mxu0 %v5404_v1  ;;  %4843 = vmatpush3.msra.mxu1 %v2687_v12  ;;  %v3149_v12 = vld [vmem:[#allocation13 + $0x338] sm:$0xff] }
 0x458   :  { %4878 = vmatpush3.msra.mxu0 %v2801_v15  ;;  %4844 = vmatprep.subr.mxu1 %v5404_v1  ;;  %v3148_v15 = vld [vmem:[#allocation13 + $0x330] sm:$0xff] }
 0x459   :  { %4879 = vmatprep.subr.mxu0 %v5404_v1  ;;  %4845 = vmatpush3.msra.mxu1 %v2686_v13  ;;  %v3262_v13 = vld [vmem:[#allocation13 + $0x3b0] sm:$0xff] }
 0x45a   :  { %4846 = vmatprep.mubr.msk.f32.mxu1 %vm5405_vm0, %v5404_v1  ;;  %4880 = vmatpush3.msra.mxu0 %v2800_v16  ;;  %v3147_v16 = vld [vmem:[#allocation13 + $0x328] sm:$0xff] }
 0x45b   :  { %4881 = vmatprep.mubr.msk.f32.mxu0 %vm5405_vm0, %v5404_v1  ;;  %4847 = vmatmul.mubr.f32.vlgmr.msra.gmra.mxu1 %v2722_v17  ;;  %v3261_v17 = vld [vmem:[#allocation13 + $0x3a8] sm:$0xff] }
 0x45c   :  { %4882 = vmatmul.mubr.f32.vlgmr.msra.gmra.mxu0 %v2836_v18  ;;  %4884 = vmatprep.subr.mxu1 %v5404_v1  ;;  %v3146_v18 = vld [vmem:[#allocation13 + $0x320] sm:$0xff] }
 0x45d   :  { %4919 = vmatprep.subr.mxu0 %v5404_v1  ;;  %4885 = vmatpush3.msra.mxu1 %v2929_v19  ;;  %v3260_v19 = vld [vmem:[#allocation13 + $0x3a0] sm:$0xff] }
 0x45e   :  { %4920 = vmatpush3.msra.mxu0 %v3043_v20  ;;  %4886 = vmatprep.subr.mxu1 %v5404_v1  ;;  %v3145_v20 = vld [vmem:[#allocation13 + $0x318] sm:$0xff] }
 0x45f   :  { %4921 = vmatprep.subr.mxu0 %v5404_v1  ;;  %4887 = vmatpush3.msra.mxu1 %v2928_v21  ;;  %v3259_v21 = vld [vmem:[#allocation13 + $0x398] sm:$0xff] }
 0x460   :  { %4922 = vmatpush3.msra.mxu0 %v3042_v22  ;;  %4888 = vmatprep.subr.mxu1 %v5404_v1  ;;  %v5217_v22 = vld.sshfl [vmem:[#allocation2 + $0x18] sm:$0xf pattern:$0x76325410] }
 0x461   :  { %4923 = vmatprep.subr.mxu0 %v5404_v1  ;;  %4889 = vmatpush3.msra.mxu1 %v2927_v23  ;;  %v3144_v23 = vld [vmem:[#allocation13 + $0x310] sm:$0xff] }
 0x462   :  { %4924 = vmatpush3.msra.mxu0 %v3041_v25  ;;  %4890 = vmatprep.subr.mxu1 %v5404_v1  ;;  %v5218_v25 = vld.sshfl [vmem:[#allocation2 + $0x19] sm:$0xf pattern:$0x76325410] }
 0x463   :  { %4925 = vmatprep.subr.mxu0 %v5404_v1  ;;  %4891 = vmatpush3.msra.mxu1 %v2926_v24  ;;  %v3258_v24 = vld [vmem:[#allocation13 + $0x390] sm:$0xff] }
 0x464   :  { %4926 = vmatpush3.msra.mxu0 %v3040_v26  ;;  %4892 = vmatprep.subr.mxu1 %v5404_v1  ;;  %v5219_v26 = vld.sshfl [vmem:[#allocation2 + $0x8] sm:$0xf pattern:$0x76325410] }
 0x465   :  { %4927 = vmatprep.subr.mxu0 %v5404_v1  ;;  %4893 = vmatpush3.msra.mxu1 %v2925_v27  ;;  %v3143_v27 = vld [vmem:[#allocation13 + $0x308] sm:$0xff] }
 0x466   :  { %4928 = vmatpush3.msra.mxu0 %v3039_v28  ;;  %4894 = vmatprep.subr.mxu1 %v5404_v1  ;;  %v5220_v28 = vld.sshfl [vmem:[#allocation2 + $0x9] sm:$0xf pattern:$0x76325410] }
 0x467   :  { %4929 = vmatprep.subr.mxu0 %v5404_v1  ;;  %4895 = vmatpush3.msra.mxu1 %v2924_v29  ;;  %v3257_v29 = vld [vmem:[#allocation13 + $0x388] sm:$0xff] }
 0x468   :  { %4930 = vmatpush3.msra.mxu0 %v3038_v30  ;;  %4896 = vmatprep.subr.mxu1 %v5404_v1  ;;  %v3142_v30 = vld [vmem:[#allocation13 + $0x300] sm:$0xff] }
 0x469   :  { %4931 = vmatprep.subr.mxu0 %v5404_v1  ;;  %4897 = vmatpush3.msra.mxu1 %v2923_v32  ;;  %v3256_v32 = vld [vmem:[#allocation13 + $0x380] sm:$0xff] }
 0x46a   :  { %4932 = vmatpush3.msra.mxu0 %v3037_v33  ;;  %4898 = vmatprep.subr.mxu1 %v5404_v1  ;;  %v3178_v33 = vcombine.low %v5219_v26, %v5217_v22 }
 0x46b   :  { %4933 = vmatprep.subr.mxu0 %v5404_v1  ;;  %4899 = vmatpush3.msra.mxu1 %v2922_v34  ;;  %v3292_v34 = vcombine.low %v5220_v28, %v5218_v25 }
 0x46c   :  { %4934 = vmatpush3.msra.mxu0 %v3036_v35  ;;  %4900 = vmatprep.subr.mxu1 %v5404_v1  ;;  %v3385_v35 = vld [vmem:[#allocation13 + $0x478] sm:$0xff] }
 0x46d   :  { %4935 = vmatprep.subr.mxu0 %v5404_v1  ;;  %4901 = vmatpush3.msra.mxu1 %v2921_v36  ;;  %v3384_v36 = vld [vmem:[#allocation13 + $0x470] sm:$0xff] }
 0x46e   :  { %4936 = vmatpush3.msra.mxu0 %v3035_v37  ;;  %4902 = vmatprep.subr.mxu1 %v5404_v1  ;;  %v3383_v37 = vld [vmem:[#allocation13 + $0x468] sm:$0xff] }
 0x46f   :  { %4937 = vmatprep.subr.mxu0 %v5404_v1  ;;  %4903 = vmatpush3.msra.mxu1 %v2920_v38  ;;  %v3382_v38 = vld [vmem:[#allocation13 + $0x460] sm:$0xff] }
 0x470   :  { %4938 = vmatpush3.msra.mxu0 %v3034_v39  ;;  %4904 = vmatprep.subr.mxu1 %v5404_v1  ;;  %v3381_v39 = vld [vmem:[#allocation13 + $0x458] sm:$0xff] }
 0x471   :  { %4939 = vmatprep.subr.mxu0 %v5404_v1  ;;  %4905 = vmatpush3.msra.mxu1 %v2919_v41  ;;  %v3380_v41 = vld [vmem:[#allocation13 + $0x450] sm:$0xff] }
 0x472   :  { %4940 = vmatpush3.msra.mxu0 %v3033_v42  ;;  %4906 = vmatprep.subr.mxu1 %v5404_v1  ;;  %v3379_v42 = vld [vmem:[#allocation13 + $0x448] sm:$0xff] }
 0x473   :  { %4941 = vmatprep.subr.mxu0 %v5404_v1  ;;  %4907 = vmatpush3.msra.mxu1 %v2918_v4  ;;  %v3378_v4 = vld [vmem:[#allocation13 + $0x440] sm:$0xff] }
 0x474   :  { %4942 = vmatpush3.msra.mxu0 %v3032_v43  ;;  %4908 = vmatprep.subr.mxu1 %v5404_v1  ;;  %v3377_v43 = vld [vmem:[#allocation13 + $0x438] sm:$0xff] }
 0x475   :  { %4943 = vmatprep.subr.mxu0 %v5404_v1  ;;  %4909 = vmatpush3.msra.mxu1 %v2917_v44  ;;  %v3376_v44 = vld [vmem:[#allocation13 + $0x430] sm:$0xff] }
 0x476   :  { %4944 = vmatpush3.msra.mxu0 %v3031_v45  ;;  %4910 = vmatprep.subr.mxu1 %v5404_v1  ;;  %v3375_v45 = vld [vmem:[#allocation13 + $0x428] sm:$0xff] }
 0x477   :  { %4945 = vmatprep.subr.mxu0 %v5404_v1  ;;  %4911 = vmatpush3.msra.mxu1 %v2916_v6  ;;  %v3373_v6 = vld [vmem:[#allocation13 + $0x418] sm:$0xff] }
 0x478   :  { %4946 = vmatpush3.msra.mxu0 %v3030_v48  ;;  %4912 = vmatprep.subr.mxu1 %v5404_v1  ;;  %v3372_v48 = vld [vmem:[#allocation13 + $0x410] sm:$0xff] }
 0x479   :  { %4947 = vmatprep.subr.mxu0 %v5404_v1  ;;  %4913 = vmatpush3.msra.mxu1 %v2915_v50  ;;  %v3371_v50 = vld [vmem:[#allocation13 + $0x408] sm:$0xff] }
 0x47a   :  { %4948 = vmatpush3.msra.mxu0 %v3029_v52  ;;  %4914 = vmatprep.subr.mxu1 %v5404_v1  ;;  %v3406_v52 = vcombine.low %v5222_v49, %v5221_v47 }
 0x47b   :  { %4949 = vmatprep.subr.mxu0 %v5404_v1  ;;  %4915 = vmatpush3.msra.mxu1 %v2914_v53 }
 0x47c   :  { %4916 = vmatprep.mubr.msk.f32.mxu1 %vm5405_vm0, %v5404_v1  ;;  %4950 = vmatpush3.msra.mxu0 %v3028_v54 }
 0x47d   :  { %4951 = vmatprep.mubr.msk.f32.mxu0 %vm5405_vm0, %v5404_v1  ;;  %4917 = vmatmul.mubr.f32.vlgmr.msra.gmra.mxu1 %v2950_v55 }
 0x47e   :  { %4952 = vmatmul.mubr.f32.vlgmr.msra.gmra.mxu0 %v3064_v56  ;;  %4954 = vmatprep.subr.mxu1 %v5404_v1 }
 0x47f   :  { %4989 = vmatprep.subr.mxu0 %v5404_v1  ;;  %4955 = vmatpush3.msra.mxu1 %v3157_v57 }
 0x480   :  { %4990 = vmatpush3.msra.mxu0 %v3271_v58  ;;  %4956 = vmatprep.subr.mxu1 %v5404_v1  ;;  %v3531_v58 = vld [vmem:[#allocation15 + $0x78] sm:$0xff] }
 0x481   :  { %4991 = vmatprep.subr.mxu0 %v5404_v1  ;;  %4957 = vmatpush3.msra.mxu1 %v3156_v59  ;;  %v3530_v59 = vld [vmem:[#allocation15 + $0x70] sm:$0xff] }
 0x482   :  { %4992 = vmatpush3.msra.mxu0 %v3270_v60  ;;  %4958 = vmatprep.subr.mxu1 %v5404_v1 }
 0x483   :  { %4993 = vmatprep.subr.mxu0 %v5404_v1  ;;  %4959 = vmatpush3.msra.mxu1 %v3155_v61  ;;  %v3529_v61 = vld [vmem:[#allocation15 + $0x68] sm:$0xff] }
 0x484   :  { %4994 = vmatpush3.msra.mxu0 %v3269_v62  ;;  %4960 = vmatprep.subr.mxu1 %v5404_v1 }
 0x485   :  { %4995 = vmatprep.subr.mxu0 %v5404_v1  ;;  %4961 = vmatpush3.msra.mxu1 %v3154_v63 }
 0x486   :  { %4996 = vmatpush3.msra.mxu0 %v3268_v0  ;;  %4962 = vmatprep.subr.mxu1 %v5404_v1 }
 0x487   :  { %4997 = vmatprep.subr.mxu0 %v5404_v1  ;;  %4963 = vmatpush3.msra.mxu1 %v3153_v2  ;;  %v3528_v2 = vld [vmem:[#allocation15 + $0x60] sm:$0xff] }
 0x488   :  { %4998 = vmatpush3.msra.mxu0 %v3267_v3  ;;  %4964 = vmatprep.subr.mxu1 %v5404_v1 }
 0x489   :  { %4999 = vmatprep.subr.mxu0 %v5404_v1  ;;  %4965 = vmatpush3.msra.mxu1 %v3152_v5 }
 0x48a   :  { %5000 = vmatpush3.msra.mxu0 %v3266_v7  ;;  %4966 = vmatprep.subr.mxu1 %v5404_v1  ;;  %v3527_v7 = vld [vmem:[#allocation15 + $0x58] sm:$0xff] }
 0x48b   :  { %5001 = vmatprep.subr.mxu0 %v5404_v1  ;;  %4967 = vmatpush3.msra.mxu1 %v3151_v8  ;;  %v3526_v8 = vld [vmem:[#allocation15 + $0x50] sm:$0xff] }
 0x48c   :  { %5002 = vmatpush3.msra.mxu0 %v3265_v9  ;;  %4968 = vmatprep.subr.mxu1 %v5404_v1  ;;  %v3525_v9 = vld [vmem:[#allocation15 + $0x48] sm:$0xff] }
 0x48d   :  { %5003 = vmatprep.subr.mxu0 %v5404_v1  ;;  %4969 = vmatpush3.msra.mxu1 %v3150_v10  ;;  %v3524_v10 = vld [vmem:[#allocation15 + $0x40] sm:$0xff] }
 0x48e   :  { %5004 = vmatpush3.msra.mxu0 %v3264_v11  ;;  %4970 = vmatprep.subr.mxu1 %v5404_v1  ;;  %v3523_v11 = vld [vmem:[#allocation15 + $0x38] sm:$0xff] }
 0x48f   :  { %5005 = vmatprep.subr.mxu0 %v5404_v1  ;;  %4971 = vmatpush3.msra.mxu1 %v3149_v12  ;;  %v3522_v12 = vld [vmem:[#allocation15 + $0x30] sm:$0xff] }
 0x490   :  { %5006 = vmatpush3.msra.mxu0 %v3263_v14  ;;  %4972 = vmatprep.subr.mxu1 %v5404_v1  ;;  %v3521_v14 = vld [vmem:[#allocation15 + $0x28] sm:$0xff] }
 0x491   :  { %5007 = vmatprep.subr.mxu0 %v5404_v1  ;;  %4973 = vmatpush3.msra.mxu1 %v3148_v15  ;;  %v3520_v15 = vld [vmem:[#allocation15 + $0x20] sm:$0xff] }
 0x492   :  { %5008 = vmatpush3.msra.mxu0 %v3262_v13  ;;  %4974 = vmatprep.subr.mxu1 %v5404_v1  ;;  %v3519_v13 = vld [vmem:[#allocation15 + $0x18] sm:$0xff] }
 0x493   :  { %5009 = vmatprep.subr.mxu0 %v5404_v1  ;;  %4975 = vmatpush3.msra.mxu1 %v3147_v16  ;;  %v3518_v16 = vld [vmem:[#allocation15 + $0x10] sm:$0xff] }
 0x494   :  { %5010 = vmatpush3.msra.mxu0 %v3261_v17  ;;  %4976 = vmatprep.subr.mxu1 %v5404_v1  ;;  %v3517_v17 = vld [vmem:[#allocation15 + $0x8] sm:$0xff] }
 0x495   :  { %5011 = vmatprep.subr.mxu0 %v5404_v1  ;;  %4977 = vmatpush3.msra.mxu1 %v3146_v18  ;;  %v3516_v18 = vld [vmem:[#allocation15] sm:$0xff] }
 0x496   :  { %5012 = vmatpush3.msra.mxu0 %v3260_v19  ;;  %4978 = vmatprep.subr.mxu1 %v5404_v1 }
 0x497   :  { %5013 = vmatprep.subr.mxu0 %v5404_v1  ;;  %4979 = vmatpush3.msra.mxu1 %v3145_v20 }
 0x498   :  { %5014 = vmatpush3.msra.mxu0 %v3259_v21  ;;  %4980 = vmatprep.subr.mxu1 %v5404_v1 }
 0x499   :  { %5015 = vmatprep.subr.mxu0 %v5404_v1  ;;  %4981 = vmatpush3.msra.mxu1 %v3144_v23 }
 0x49a   :  { %5016 = vmatpush3.msra.mxu0 %v3258_v24  ;;  %4982 = vmatprep.subr.mxu1 %v5404_v1 }
 0x49b   :  { %5017 = vmatprep.subr.mxu0 %v5404_v1  ;;  %4983 = vmatpush3.msra.mxu1 %v3143_v27 }
 0x49c   :  { %5018 = vmatpush3.msra.mxu0 %v3257_v29  ;;  %4984 = vmatprep.subr.mxu1 %v5404_v1 }
 0x49d   :  { %5019 = vmatprep.subr.mxu0 %v5404_v1  ;;  %4985 = vmatpush3.msra.mxu1 %v3142_v30 }
 0x49e   :  { %4986 = vmatprep.mubr.msk.f32.mxu1 %vm5405_vm0, %v5404_v1  ;;  %5020 = vmatpush3.msra.mxu0 %v3256_v32 }
 0x49f   :  { %5021 = vmatprep.mubr.msk.f32.mxu0 %vm5405_vm0, %v5404_v1  ;;  %4987 = vmatmul.mubr.f32.vlgmr.msra.gmra.mxu1 %v3178_v33 }
 0x4a0   :  { %5022 = vmatmul.mubr.f32.vlgmr.msra.gmra.mxu0 %v3292_v34  ;;  %5024 = vmatprep.subr.mxu1 %v5404_v1 }
 0x4a1   :  { %5025 = vmatpush3.msra.mxu1 %v3385_v35  ;;  %5056 = vmatprep.mubr.msk.f32.mxu1 %vm5405_vm0, %v5404_v1 }
 0x4a2   :  { %5026 = vmatprep.subr.mxu1 %v5404_v1  ;;  %5059 = vmatprep.subr.mxu0 %v5404_v1 }
 0x4a3   :  { %5027 = vmatpush3.msra.mxu1 %v3384_v36  ;;  %5091 = vmatprep.mubr.msk.f32.mxu0 %vm5405_vm0, %v5404_v1 }
 0x4a4   :  { %5028 = vmatprep.subr.mxu1 %v5404_v1  ;;  %5060 = vmatpush3.msra.mxu0 %v3531_v58 }
 0x4a5   :  { %5029 = vmatpush3.msra.mxu1 %v3383_v37  ;;  %5061 = vmatprep.subr.mxu0 %v5404_v1 }
 0x4a6   :  { %5030 = vmatprep.subr.mxu1 %v5404_v1  ;;  %5062 = vmatpush3.msra.mxu0 %v3530_v59 }
 0x4a7   :  { %5031 = vmatpush3.msra.mxu1 %v3382_v38  ;;  %5063 = vmatprep.subr.mxu0 %v5404_v1 }
 0x4a8   :  { %5032 = vmatprep.subr.mxu1 %v5404_v1  ;;  %5064 = vmatpush3.msra.mxu0 %v3529_v61 }
 0x4a9   :  { %5033 = vmatpush3.msra.mxu1 %v3381_v39  ;;  %5065 = vmatprep.subr.mxu0 %v5404_v1 }
 0x4aa   :  { %5034 = vmatprep.subr.mxu1 %v5404_v1  ;;  %5066 = vmatpush3.msra.mxu0 %v3528_v2 }
 0x4ab   :  { %5035 = vmatpush3.msra.mxu1 %v3380_v41  ;;  %5067 = vmatprep.subr.mxu0 %v5404_v1 }
 0x4ac   :  { %5036 = vmatprep.subr.mxu1 %v5404_v1  ;;  %5068 = vmatpush3.msra.mxu0 %v3527_v7 }
 0x4ad   :  { %5037 = vmatpush3.msra.mxu1 %v3379_v42  ;;  %5069 = vmatprep.subr.mxu0 %v5404_v1 }
 0x4ae   :  { %5038 = vmatprep.subr.mxu1 %v5404_v1  ;;  %5070 = vmatpush3.msra.mxu0 %v3526_v8 }
 0x4af   :  { %5039 = vmatpush3.msra.mxu1 %v3378_v4  ;;  %5071 = vmatprep.subr.mxu0 %v5404_v1 }
 0x4b0   :  { %5040 = vmatprep.subr.mxu1 %v5404_v1  ;;  %5072 = vmatpush3.msra.mxu0 %v3525_v9 }
 0x4b1   :  { %5041 = vmatpush3.msra.mxu1 %v3377_v43  ;;  %5073 = vmatprep.subr.mxu0 %v5404_v1 }
 0x4b2   :  { %5042 = vmatprep.subr.mxu1 %v5404_v1  ;;  %5074 = vmatpush3.msra.mxu0 %v3524_v10 }
 0x4b3   :  { %5043 = vmatpush3.msra.mxu1 %v3376_v44  ;;  %5075 = vmatprep.subr.mxu0 %v5404_v1 }
 0x4b4   :  { %5044 = vmatprep.subr.mxu1 %v5404_v1  ;;  %5076 = vmatpush3.msra.mxu0 %v3523_v11 }
 0x4b5   :  { %5045 = vmatpush3.msra.mxu1 %v3375_v45  ;;  %5077 = vmatprep.subr.mxu0 %v5404_v1 }
 0x4b6   :  { %5046 = vmatprep.subr.mxu1 %v5404_v1  ;;  %5078 = vmatpush3.msra.mxu0 %v3522_v12 }
 0x4b7   :  { %5047 = vmatpush3.msra.mxu1 %v3374_v46  ;;  %5079 = vmatprep.subr.mxu0 %v5404_v1 }
 0x4b8   :  { %5048 = vmatprep.subr.mxu1 %v5404_v1  ;;  %5080 = vmatpush3.msra.mxu0 %v3521_v14 }
 0x4b9   :  { %5049 = vmatpush3.msra.mxu1 %v3373_v6  ;;  %5081 = vmatprep.subr.mxu0 %v5404_v1 }
 0x4ba   :  { %5050 = vmatprep.subr.mxu1 %v5404_v1  ;;  %5082 = vmatpush3.msra.mxu0 %v3520_v15 }
 0x4bb   :  { %5051 = vmatpush3.msra.mxu1 %v3372_v48  ;;  %5083 = vmatprep.subr.mxu0 %v5404_v1 }
 0x4bc   :  { %5052 = vmatprep.subr.mxu1 %v5404_v1  ;;  %5084 = vmatpush3.msra.mxu0 %v3519_v13 }
 0x4bd   :  { %5053 = vmatpush3.msra.mxu1 %v3371_v50  ;;  %5085 = vmatprep.subr.mxu0 %v5404_v1 }
 0x4be   :  { %5054 = vmatprep.subr.mxu1 %v5404_v1  ;;  %5086 = vmatpush3.msra.mxu0 %v3518_v16 }
 0x4bf   :  { %5055 = vmatpush3.msra.mxu1 %v3370_v51  ;;  %5087 = vmatprep.subr.mxu0 %v5404_v1  ;;  %v3496_v51 = vld [vmem:[%s6085_s6 + $0x2] sm:$0x1] }
 0x4c0   :  { %5057 = vmatmul.mubr.f32.vlgmr.msra.gmra.mxu1 %v3406_v52  ;;  %5088 = vmatpush3.msra.mxu0 %v3517_v17 }
 0x4c1   :  { %5089 = vmatprep.subr.mxu0 %v5404_v1 }
 0x4c2   :  { %5090 = vmatpush3.msra.mxu0 %v3516_v18 }
 0x4fa   :  { %v2585_v53 = vpop.f32.mrf.mxu1 }
 0x4fb   :  { %v2677_v54 = vpop.f32.mrf.mxu0 }
 0x4fc   :  { %v2678_v55 = vadd.f32 %v2677_v54, %v2585_v53  ;;  %v4778_v56 = vpop.f32.mrf.mxu1  ;;  %v3500_v54 = vld [vmem:[%s6086_s7 + $0x2] sm:$0x1]  ;;  %s5363_s7 = scalar_lea.vmem %s3611_s18, 128 }
 0x4fd   :  { %v4813_v57 = vpop.f32.mrf.mxu0  ;;  %p5364_p7 = scmp.ne.s32.totalorder %s3611_s18, %s5363_s7  ;;  %p5369_p9 = scmp.lt.s32.totalorder %s5363_s7, %s5363_s7 }
 0x4ff   :  { %p5370_p10 = por %p5369_p9, %p5368_p8 }
 0x501   :  { %p5371_p11 = pnand %p5370_p10, %p5364_p7 }
 0x51b   :  { %v2790_v60 = vpop.f32.mrf.mxu1 }
 0x51c   :  { %v2794_v62 = vadd.f32 %v2790_v60, %v2678_v55  ;;  %v2904_v63 = vpop.f32.mrf.mxu0 }
 0x51d   :  { %v4848_v0 = vpop.f32.mrf.mxu1 }
 0x51e   :  { %v2908_v3 = vadd.f32 %v2904_v63, %v2794_v62  ;;  %v4883_v5 = vpop.f32.mrf.mxu0  ;;  %v3532_v63 = vld [vmem:[%s6088_s9] sm:$0xff] }
 0x53d   :  { %v3018_v19 = vpop.f32.mrf.mxu1 }
 0x53e   :  { %v3132_v20 = vpop.f32.mrf.mxu0  ;;  %v3022_v27 = vadd.f32 %v3018_v19, %v2908_v3 }
 0x53f   :  { %v4918_v21 = vpop.f32.mrf.mxu1 }
 0x540   :  { %v4953_v22 = vpop.f32.mrf.mxu0  ;;  %v3136_v28 = vadd.f32 %v3132_v20, %v3022_v27 }
 0x55f   :  { %v3246_v23 = vpop.f32.mrf.mxu1 }
 0x560   :  { %v3360_v25 = vpop.f32.mrf.mxu0  ;;  %v3250_v29 = vadd.f32 %v3246_v23, %v3136_v28 }
 0x561   :  { %v4988_v24 = vpop.f32.mrf.mxu1 }
 0x562   :  { %v5023_v26 = vpop.f32.mrf.mxu0  ;;  %v3364_v30 = vadd.f32 %v3360_v25, %v3250_v29 }
 0x580   :  { %v3474_v32 = vpop.f32.mrf.mxu1 }
 0x581   :  { %v3478_v33 = vadd.f32 %v3474_v32, %v3364_v30 }
 0x582   :  { %v5058_v34 = vpop.f32.mrf.mxu1 }
 0x583   :  { %v3479_v35 = vrot.slane %v3478_v33, 4  ;;  %v3486_v36 = vmul.f32 %v3478_v33, %v3478_v33 }
 0x585   :  { %v3480_v37 = vadd.f32 %v3479_v35, %v3478_v33  ;;  %v3487_v1 = vrot.slane %v3486_v36, 4 }
 0x587   :  { %v3481_v38 = vrot.slane %v3480_v37, 2  ;;  %v3488_v39 = vadd.f32 %v3487_v1, %v3486_v36 }
 0x589   :  { %v3482_v41 = vadd.f32 %v3481_v38, %v3480_v37  ;;  %v3489_v42 = vrot.slane %v3488_v39, 2 }
 0x58b   :  { %v3483_v4 = vrot.slane %v3482_v41, 1  ;;  %v3490_v43 = vadd.f32 %v3489_v42, %v3488_v39 }
 0x58d   :  { %v3484_v44 = vadd.f32 %v3483_v4, %v3482_v41  ;;  %v3491_v45 = vrot.slane %v3490_v43, 1 }
 0x58f   :  { %v3485_v46 = vmul.f32 0.125, %v3484_v44  ;;  %v3492_v6 = vadd.f32 %v3491_v45, %v3490_v43 }
 0x591   :  { %v3493_v47 = vmul.f32 0.125, %v3492_v6  ;;  %v3494_v48 = vmul.f32 %v3485_v46, %v3485_v46 }
 0x593   :  { %v3495_v49 = vsub.f32 %v3493_v47, %v3494_v48 }
 0x595   :  { %v3497_v50 = vadd.f32 1e-05, %v3495_v49 }
 0x597   :  { %5167 = vrsqrt.f32 %v3497_v50 }
 0x5a4   :  { %v5168_v52 = vpop.eup %5167 }
 0x5a5   :  { %v3499_v53 = vmul.f32 %v5168_v52, %v3496_v51 }
 0x5a7   :  { %v3501_v55 = vmul.f32 %v3499_v53, %v3485_v46  ;;  %v3506_v56 = vrot.slane %v3499_v53, %v5735_v31 }
 0x5a9   :  { %v3502_v57 = vsub.f32 %v3500_v54, %v3501_v55  ;;  %v3507_v58 = vmul.f32 %v3506_v56, %v3478_v33 }
 0x5ab   :  { %v3511_v59 = vrot.slane %v3502_v57, %v5735_v31 }
 0x5ad   :  { %v3512_v60 = vadd.f32 %v3511_v59, %v3507_v58 }
 0x5af   :  { %v3514_v61 = vadd.f32 %v3512_v60, %v5742_v40 }
 0x5b1   :  { %v3515_v62 = vmax.f32 %v3514_v61, 0.0 }
 0x5b3   :  { %5092 = vmatmul.mubr.f32.vlgmr.msra.gmra.mxu0 %v3515_v62 }
 0x673   :  { %v3599_v0 = vpop.f32.mrf.mxu0 }
 0x674   :  { %v3600_v2 = vadd.f32 %v3599_v0, %v3532_v63 }
 0x675   :  { %v5093_v3 = vpop.f32.mrf.mxu0 }
 0x676   :  { %3603 = vst [vmem:[#allocation16] sm:$0xff] %v3600_v2 }
 0x677   :  { %5374 = shalt.err (!%p5371_p11)
}
 0x678   :  { %3613 = dma.vmem_to_hbm [thread:$0]  %s3611_s18, 128, %s6089_s10, [#allocation6]  }
 0x679   :  { %5391 = dma.done.wait [#allocation6], 128  }
 0x67a   :  { %5392 = vsyncadd [#allocation6], 4294967168 }
 0x67b   :  { %3617 = vsyncpa [#allocation5], 1 }
 0x67c   :  { %3618 = vsyncpa [#allocation8], 1 }
 0x67d   :  { %3619 = vsyncpa [#allocation11], 1 }
 0x67e   :  { %3620 = vsyncpa [#allocation14], 1 }
 0x67f   :  { %3621 = vsyncpa [#allocation6], 1 }

</bundles_post_ra>
